<compile_context>
chip_gen: v7x
topology: tpu7x:2x2x1
jax: 0.10.0
libtpu: 0.0.40
codegen_flags: <defaults>
</compile_context>

<pallas_src>
import math

import jax
import jax.numpy as jnp
from jax.experimental import pallas as pl
from jax.experimental.pallas import tpu as pltpu

NEG_INF_FILL = -10000000000.0

# Whether constant (weight) blocks may be single-buffered via pl.Buffered(1).
_WEIGHT_SINGLE_BUFFER = hasattr(pl, "Buffered")


# --------------------------------- kernel ---------------------------------
def _make_kernel(variant, n_heads, head_dim, n_extra, batch_block, q_block,
                 seq_len, hid_dim, key_block, mm_dtype, attn_dtype, cache_kv):
    Bt, Tq, S, H, hd, HID, Tk = (batch_block, q_block, seq_len, n_heads,
                                 head_dim, hid_dim, key_block)
    BH = Bt * H
    n_chunks = S // Tk
    use_energy_scratch = (variant == "additive" and n_chunks > 1)

    def mm(a, w):
        # Weights are pre-cast to mm_dtype in the wrapper; accumulate in fp32.
        return jnp.dot(a.astype(mm_dtype), w, preferred_element_type=jnp.float32)

    def to_heads(x2, length):
        # (Bt*length, HID) -> (Bt*H, length, hd); the only in-kernel relayouts.
        return (x2.reshape(Bt, length, H, hd)
                .transpose(0, 2, 1, 3)
                .reshape(BH, length, hd))

    def kernel(*refs):
        (q_ref, k_ref, v_ref, mask_ref,
         wq, bq, wk, bk, wv, bv, wo, bo) = refs[:12]
        extra = refs[12:12 + n_extra]
        x_out_ref = refs[12 + n_extra]
        attn_out_ref = refs[13 + n_extra]
        scratch = refs[14 + n_extra:]

        def project_kv():
            K = mm(k_ref[...].reshape(Bt * S, HID), wk[...]) + bk[...]
            V = mm(v_ref[...].reshape(Bt * S, HID), wv[...]) + bv[...]
            return (to_heads(K.astype(mm_dtype), S),
                    to_heads(V.astype(mm_dtype), S))

        if cache_kv:
            k_scr, v_scr = scratch[0], scratch[1]
            e_scr = scratch[2] if use_energy_scratch else None

            @pl.when(pl.program_id(1) == 0)
            def _():
                K3n, V3n = project_kv()
                k_scr[...] = K3n
                v_scr[...] = V3n

            K3, V3 = k_scr[...], v_scr[...]
        else:
            e_scr = scratch[0] if use_energy_scratch else None
            K3, V3 = project_kv()

        # fc_q (scale / Wa / Ua / W are pre-folded into the projection weights).
        Q = mm(q_ref[...].reshape(Bt * Tq, HID), wq[...]) + bq[...]
        Q3 = to_heads(Q.astype(mm_dtype), Tq)                      # (BH, Tq, hd)

        if variant == "additive":
            v_w, v_b = extra                                       # (1, hd), (1, 1)

            def energy_chunk(Kc):
                # tanh on the EUP; head_dim reduction is a VPU mul + fp32 sum.
                e = jnp.tanh(Q3[:, :, None, :] + Kc[:, None, :, :])
                return jnp.sum(e * v_w[...], axis=-1, dtype=jnp.float32)

            if n_chunks == 1:
                energy3 = energy_chunk(K3)                         # (BH, Tq, S)
            else:
                # Tile the (BH, Tq, Tk, hd) tanh temporary over key chunks.
                for c in range(n_chunks):
                    e_scr[:, :, c * Tk:(c + 1) * Tk] = energy_chunk(
                        K3[:, c * Tk:(c + 1) * Tk, :])
                energy3 = e_scr[...]
            energy3 = energy3 + v_b[...]
        else:
            energy3 = jnp.einsum("bqd,bkd->bqk", Q3, K3,
                                 preferred_element_type=jnp.float32)

        # masked_fill(mask == 0, -1e10); mask broadcasts over heads.
        energy = energy3.reshape(Bt, H, Tq, S)
        mask_q = mask_ref[...].astype(jnp.int32)                   # (Bt, 1, Tq, S)
        energy = jnp.where(mask_q == 0, NEG_INF_FILL, energy)

        # Softmax over keys (fp32).  EUP approx reciprocal + one Newton step.
        m = jnp.max(energy, axis=-1, keepdims=True)
        ex = jnp.exp(energy - m)
        den = jnp.sum(ex, axis=-1, keepdims=True)
        r = pl.reciprocal(den, approx=True)
        r = r * (2.0 - den * r)
        attention = ex * r
        # nn.Dropout is identity in eval mode.
        attn_out_ref[...] = attention.astype(attn_dtype)

        # attention @ V (batched over Bt*H), merge heads, fc_o.
        x3 = jnp.einsum("bqk,bkd->bqd",
                        attention.reshape(BH, Tq, S).astype(mm_dtype), V3,
                        preferred_element_type=jnp.float32)
        x2 = (x3.astype(mm_dtype).reshape(Bt, H, Tq, hd)
              .transpose(0, 2, 1, 3).reshape(Bt * Tq, HID))
        x_out_ref[...] = (mm(x2, wo[...]) + bo[...]).reshape(Bt, Tq, HID)

    return kernel


# ------------------------------ tile planning ------------------------------
def _plan(B, S, HID, H, variant, mm_dtype, attn_dtype, tq=None):
    hd = HID // H
    try:
        cap = int(pltpu.get_tpu_info().vmem_capacity_bytes)   # 64 MiB v7x, 128 MiB v5e/v6e
    except Exception:
        cap = 64 << 20                                        # v7x-safe fallback
    budget = int(cap * 0.6)           # per-step working-set target (pipeline headroom)
    vmem_limit = max(32 << 20, min(int(cap * 0.8), 100 << 20))

    mm_sz = jnp.dtype(mm_dtype).itemsize
    attn_sz = jnp.dtype(attn_dtype).itemsize

    def divisors(n):
        return [d for d in range(1, n + 1) if n % d == 0]

    if tq is None:
        tq_cands = sorted({d for d in divisors(S)
                           if (d % 8 == 0 or d == S) and d <= 512}, reverse=True)
        if not tq_cands:
            tq_cands = [S]
    else:
        assert S % tq == 0
        tq_cands = [tq]

    def pick_tk(bt, tq_):
        if variant != "additive":
            return S
        cands = sorted({d for d in divisors(S) if d % 8 == 0 or d == S}, reverse=True)
        for tk in cands:
            if bt * H * tq_ * tk * hd * mm_sz <= budget // 4:
                return tk
        return cands[-1]

    def est(bt, tq_, tk):
        bh = bt * H
        w = 4 * HID * HID * mm_sz + 8 * HID * 4                   # weights + biases
        act = 2 * bt * tq_ * HID * 4 + 4 * bt * S * HID * 4       # q / k / v blocks (dbl-buffered)
        msk = 2 * bt * tq_ * S * 4                                # mask block (worst case int32)
        kv_scr = 2 * bh * S * hd * mm_sz                          # cached K/V heads
        proj = 6 * bt * max(tq_, S) * HID * 4                     # projection temps + relayouts
        eng = 3 * bh * tq_ * S * 4                                # energy / exp / attention (fp32)
        outs = 2 * bh * tq_ * S * attn_sz + 2 * bt * tq_ * HID * 4
        tnh = 2 * bh * tq_ * tk * hd * mm_sz if variant == "additive" else 0
        e_scr = bh * tq_ * S * 4 if (variant == "additive" and tk < S) else 0
        return w + act + msk + kv_scr + proj + eng + outs + tnh + e_scr

    bt_cap = B if B == 1 else max(1, B // 2)   # keep >=2 batch grid steps when B >= 2
    bt_cands = sorted([d for d in divisors(B) if d <= bt_cap], reverse=True)
    for bt in bt_cands:
        for tq_ in tq_cands:                   # shrink the query tile before the batch tile
            tk = pick_tk(bt, tq_)
            if est(bt, tq_, tk) <= budget:
                return bt, tq_, tk, vmem_limit
    bt, tq_ = 1, min(tq_cands)
    return bt, tq_, pick_tk(bt, tq_), vmem_limit


# ----------------------------- weight folding ------------------------------
def _prepare_weights(params, variant, H, hd, HID, mm_dtype):
    inv_scale = 1.0 / math.sqrt(float(hd))

    def fold_head_linear(w, b, m, mb):
        # Compose a per-head (hd, hd) linear into the (HID, HID) projection:
        #   (x @ w + b) @ m + mb == x @ fold(w) + fold(b)   (per head block).
        wf = jnp.einsum("ihd,de->ihe", w.reshape(HID, H, hd), m).reshape(HID, HID)
        bf = (b.reshape(1, H, hd) @ m + mb).reshape(1, HID)
        return wf, bf

    wq, bq = params["wq"], params["bq"]
    wk, bk = params["wk"], params["bk"]
    extra = []
    if variant == "multiplicative":
        wk, bk = fold_head_linear(wk, bk, params["w_w"], params["w_b"])
        wq, bq = wq * inv_scale, bq * inv_scale
    elif variant == "general":
        wq, bq = wq * inv_scale, bq * inv_scale
    elif variant == "additive":
        wq, bq = fold_head_linear(wq, bq, params["wa_w"], params["wa_b"])
        wk, bk = fold_head_linear(wk, bk, params["ua_w"], params["ua_b"])
        extra = [params["v_w"].reshape(1, hd).astype(mm_dtype), params["v_b"]]
    else:
        raise ValueError(f"unknown attn_variant: {variant}")

    weights = [wq.astype(mm_dtype), bq, wk.astype(mm_dtype), bk,
               params["wv"].astype(mm_dtype), params["bv"],
               params["wo"].astype(mm_dtype), params["bo"]]
    return weights, extra


# --------------------------------- wrapper ---------------------------------
def mha_forward(query, key, value, mask, params, attn_variant, n_heads,
                mm_dtype=jnp.float32, attn_dtype=jnp.float32, tq=None):
    global _WEIGHT_SINGLE_BUFFER
    B, S, HID = query.shape
    H = n_heads
    assert HID % H == 0
    hd = HID // H

    Bt, Tq, Tk, vmem_limit = _plan(B, S, HID, H, attn_variant,
                                   mm_dtype, attn_dtype, tq=tq)
    batch_steps, q_steps = B // Bt, S // Tq
    # Keep the attention-map store layout-legal for narrow tiles.
    if jnp.dtype(attn_dtype) != jnp.dtype(jnp.float32) and not (Tq % 16 == 0 or Tq == S):
        attn_dtype = jnp.float32
    # Cache K/V in VMEM across query tiles (q axis sequential) whenever the
    # batch axis already gives >= 2 parallel grid steps; with a single batch
    # step (B == 1) recompute K/V per tile so the q axis can be "parallel"
    # and feed both v7x TensorCores.
    cache_kv = batch_steps >= 2 or q_steps == 1

    if mask is None:
        mask = jnp.ones((B, 1, S, S), jnp.int32)
    mask = jnp.broadcast_to(mask, (B, 1, S, S))
    mask_dtype = jnp.int8 if (Tq % 32 == 0 or Tq == S) else jnp.int32
    mask = (mask != 0).astype(mask_dtype)

    weights, extra = _prepare_weights(params, attn_variant, H, hd, HID, mm_dtype)
    n_extra = len(extra)
    args = [query, key, value, mask] + weights + extra

    n_chunks = S // Tk
    scratch_shapes = []
    if cache_kv:
        scratch_shapes += [pltpu.VMEM((Bt * H, S, hd), mm_dtype),
                           pltpu.VMEM((Bt * H, S, hd), mm_dtype)]
    if attn_variant == "additive" and n_chunks > 1:
        scratch_shapes += [pltpu.VMEM((Bt * H, Tq, S), jnp.float32)]

    kernel = _make_kernel(attn_variant, H, hd, n_extra, Bt, Tq, S, HID, Tk,
                          mm_dtype, attn_dtype, cache_kv)

    data_specs = [
        pl.BlockSpec((Bt, Tq, HID), lambda b, q: (b, q, 0)),       # query tile
        pl.BlockSpec((Bt, S, HID), lambda b, q: (b, 0, 0)),        # key (full key axis)
        pl.BlockSpec((Bt, S, HID), lambda b, q: (b, 0, 0)),        # value
        pl.BlockSpec((Bt, 1, Tq, S), lambda b, q: (b, 0, q, 0)),   # mask tile
    ]
    out_specs = [
        pl.BlockSpec((Bt, Tq, HID), lambda b, q: (b, q, 0)),       # x
        pl.BlockSpec((Bt, H, Tq, S), lambda b, q: (b, 0, q, 0)),   # attention map
    ]
    out_shape = [
        jax.ShapeDtypeStruct((B, S, HID), jnp.float32),
        jax.ShapeDtypeStruct((B, H, S, S), attn_dtype),
    ]
    sems = ("parallel", "arbitrary") if cache_kv else ("parallel", "parallel")

    def run(single_buffer_weights):
        def const_spec(arr):
            nd = arr.ndim
            idx = lambda b, q, _nd=nd: (0,) * _nd
            if single_buffer_weights:
                # Constant-index weight blocks: single-buffer to halve their VMEM.
                return pl.BlockSpec(arr.shape, idx, pipeline_mode=pl.Buffered(1))
            return pl.BlockSpec(arr.shape, idx)

        in_specs = data_specs + [const_spec(a) for a in args[4:]]
        return pl.pallas_call(
            kernel,
            out_shape=out_shape,
            grid_spec=pltpu.PrefetchScalarGridSpec(
                num_scalar_prefetch=0,
                grid=(batch_steps, q_steps),
                in_specs=in_specs,
                out_specs=out_specs,
                scratch_shapes=scratch_shapes),
            compiler_params=pltpu.CompilerParams(
                dimension_semantics=sems,
                vmem_limit_bytes=vmem_limit),
        )(*args)

    if _WEIGHT_SINGLE_BUFFER:
        try:
            return run(True)
        except Exception:
            _WEIGHT_SINGLE_BUFFER = False
    return run(False)


# ----------------------- pure-JAX reference for checking -----------------------
def mha_reference(query, key, value, mask, params, variant, n_heads):
    B, S, hid = query.shape
    hd = hid // n_heads
    scale = math.sqrt(float(hd))
    lin = lambda x, w, b: x @ w + b[0]
    Q = lin(query, params["wq"], params["bq"])
    K = lin(key, params["wk"], params["bk"])
    V = lin(value, params["wv"], params["bv"])
    Q = Q.reshape(B, S, n_heads, hd).transpose(0, 2, 1, 3)
    K = K.reshape(B, S, n_heads, hd).transpose(0, 2, 1, 3)
    V = V.reshape(B, S, n_heads, hd).transpose(0, 2, 1, 3)
    if variant == "multiplicative":
        Kt = lin(K, params["w_w"], params["w_b"])
        energy = jnp.einsum("bhqd,bhkd->bhqk", Q, Kt) / scale
    elif variant == "general":
        energy = jnp.einsum("bhqd,bhkd->bhqk", Q, K) / scale
    else:
        Qa = lin(Q, params["wa_w"], params["wa_b"])
        Ka = lin(K, params["ua_w"], params["ua_b"])
        e = jnp.tanh(Qa[:, :, :, None, :] + Ka[:, :, None, :, :])
        energy = (e @ params["v_w"])[..., 0] + params["v_b"][0, 0]
    if mask is not None:
        energy = jnp.where(mask == 0, NEG_INF_FILL, energy)
    attention = jax.nn.softmax(energy, axis=-1)
    x = jnp.einsum("bhqk,bhkd->bhqd", attention, V)
    x = x.transpose(0, 2, 1, 3).reshape(B, S, hid)
    x = lin(x, params["wo"], params["bo"])
    return x, attention


def init_params(key, hid, n_heads):
    hd = hid // n_heads

    def lin_init(k, din, dout):
        kw, kb = jax.random.split(k)
        w = jax.random.normal(kw, (din, dout), jnp.float32) / math.sqrt(din)
        b = jax.random.normal(kb, (1, dout), jnp.float32) * 0.01
        return w, b

    ks = jax.random.split(key, 8)
    p = {}
    p["wq"], p["bq"] = lin_init(ks[0], hid, hid)
    p["wk"], p["bk"] = lin_init(ks[1], hid, hid)
    p["wv"], p["bv"] = lin_init(ks[2], hid, hid)
    p["wo"], p["bo"] = lin_init(ks[3], hid, hid)
    p["w_w"], p["w_b"] = lin_init(ks[4], hd, hd)      # multiplicative W
    p["wa_w"], p["wa_b"] = lin_init(ks[5], hd, hd)    # additive Wa
    p["ua_w"], p["ua_b"] = lin_init(ks[6], hd, hd)    # additive Ua
    p["v_w"], p["v_b"] = lin_init(ks[7], hd, 1)       # additive V
    return p


if __name__ == "__main__":
    B, S, HID, NH = 2, 16, 32, 4   # batch=2, seq=16, hidden=32, 4 heads (head_dim=8)

    root = jax.random.PRNGKey(0)
    kp, kq, kk, kv = jax.random.split(root, 4)
    params = init_params(kp, HID, NH)

    query = jax.random.normal(kq, (B, S, HID), jnp.float32)
    key_ = jax.random.normal(kk, (B, S, HID), jnp.float32)
    value = jax.random.normal(kv, (B, S, HID), jnp.float32)
    # causal mask, broadcast over heads like torch's masked_fill(mask == 0, ...)
    mask = jnp.broadcast_to(
        jnp.tril(jnp.ones((S, S), jnp.int32))[None, None], (B, 1, S, S))

    for variant in ("multiplicative", "general", "additive"):
        xr, ar = mha_reference(query, key_, value, mask, params, variant, NH)

        # (a) fp32, default plan: single query tile per row, K/V cached.
        x, a = mha_forward(query, key_, value, mask, params, variant, NH)
        x, a = jax.block_until_ready(x), jax.block_until_ready(a)
        assert x.shape == (B, S, HID) and a.shape == (B, NH, S, S)
        assert jnp.allclose(x, xr, atol=1e-4, rtol=1e-4), variant
        assert jnp.allclose(a, ar, atol=1e-4, rtol=1e-4), variant

        # (b) fp32, forced query tiling (two query tiles per batch row).
        x, a = mha_forward(query, key_, value, mask, params, variant, NH, tq=8)
        x, a = jax.block_until_ready(x), jax.block_until_ready(a)
        assert jnp.allclose(x, xr, atol=1e-4, rtol=1e-4), variant
        assert jnp.allclose(a, ar, atol=1e-4, rtol=1e-4), variant

        # (c) bf16 matmul inputs + bf16 attention map (fp32 accum / softmax).
        xb, ab = mha_forward(query, key_, value, mask, params, variant, NH,
                             mm_dtype=jnp.bfloat16, attn_dtype=jnp.bfloat16)
        xb, ab = jax.block_until_ready(xb), jax.block_until_ready(ab)
        assert bool(jnp.all(jnp.isfinite(xb)))
        assert jnp.allclose(xb, xr, atol=2e-1, rtol=2e-1), variant
        assert jnp.allclose(ab.astype(jnp.float32), ar, atol=5e-2, rtol=5e-2), variant

    # (d) B == 1: the query axis becomes the parallel grid axis (v7x megacore path).
    xr1, ar1 = mha_reference(query[:1], key_[:1], value[:1], mask[:1],
                             params, "general", NH)
    x1, a1 = mha_forward(query[:1], key_[:1], value[:1], mask[:1],
                         params, "general", NH, tq=8)
    x1, a1 = jax.block_until_ready(x1), jax.block_until_ready(a1)
    assert jnp.allclose(x1, xr1, atol=1e-4, rtol=1e-4)
    assert jnp.allclose(a1, ar1, atol=1e-4, rtol=1e-4)

    print("KERNEL_OK")
</pallas_src>

<mosaic_0001>
module attributes {stable_mosaic.version = 11 : i64} {
  func.func @kernel(%arg0: i32, %arg1: i32, %arg2: memref<1x16x32xf32, #tpu.memory_space<vmem>>, %arg3: memref<1x16x32xf32, #tpu.memory_space<vmem>>, %arg4: memref<1x16x32xf32, #tpu.memory_space<vmem>>, %arg5: memref<1x1x16x16xi8, #tpu.memory_space<vmem>>, %arg6: memref<32x32xf32, #tpu.memory_space<vmem>>, %arg7: memref<1x32xf32, #tpu.memory_space<vmem>>, %arg8: memref<32x32xf32, #tpu.memory_space<vmem>>, %arg9: memref<1x32xf32, #tpu.memory_space<vmem>>, %arg10: memref<32x32xf32, #tpu.memory_space<vmem>>, %arg11: memref<1x32xf32, #tpu.memory_space<vmem>>, %arg12: memref<32x32xf32, #tpu.memory_space<vmem>>, %arg13: memref<1x32xf32, #tpu.memory_space<vmem>>, %arg14: memref<1x16x32xf32, #tpu.memory_space<vmem>>, %arg15: memref<1x4x16x16xf32, #tpu.memory_space<vmem>>, %arg16: memref<4x16x8xf32, #tpu.memory_space<vmem>>, %arg17: memref<4x16x8xf32, #tpu.memory_space<vmem>>) attributes {dimension_semantics = [#tpu.dimension_semantics<parallel>, #tpu.dimension_semantics<arbitrary>], iteration_bounds = array<i64: 2, 1>, scalar_prefetch = 0 : i64, scratch_operands = 2 : i64, tpu.core_type = #tpu.core_type<tc>, window_params = [{transform_indices = @transform_0, window_bounds = array<i64: 1, 16, 32>}, {transform_indices = @transform_1, window_bounds = array<i64: 1, 16, 32>}, {transform_indices = @transform_2, window_bounds = array<i64: 1, 16, 32>}, {transform_indices = @transform_3, window_bounds = array<i64: 1, 1, 16, 16>}, {pipeline_mode = #tpu.pipeline_mode<synchronous>, transform_indices = @transform_4, window_bounds = array<i64: 32, 32>}, {pipeline_mode = #tpu.pipeline_mode<synchronous>, transform_indices = @transform_5, window_bounds = array<i64: 1, 32>}, {pipeline_mode = #tpu.pipeline_mode<synchronous>, transform_indices = @transform_6, window_bounds = array<i64: 32, 32>}, {pipeline_mode = #tpu.pipeline_mode<synchronous>, transform_indices = @transform_7, window_bounds = array<i64: 1, 32>}, {pipeline_mode = #tpu.pipeline_mode<synchronous>, transform_indices = @transform_8, window_bounds = array<i64: 32, 32>}, {pipeline_mode = #tpu.pipeline_mode<synchronous>, transform_indices = @transform_9, window_bounds = array<i64: 1, 32>}, {pipeline_mode = #tpu.pipeline_mode<synchronous>, transform_indices = @transform_10, window_bounds = array<i64: 32, 32>}, {pipeline_mode = #tpu.pipeline_mode<synchronous>, transform_indices = @transform_11, window_bounds = array<i64: 1, 32>}, {transform_indices = @transform_12, window_bounds = array<i64: 1, 16, 32>}, {transform_indices = @transform_13, window_bounds = array<i64: 1, 4, 16, 16>}]} {
    %c0_i32 = arith.constant 0 : i32
    %0 = arith.cmpi eq, %arg1, %c0_i32 : i32
    %1 = arith.extui %0 : i1 to i32
    %c0_i32_0 = arith.constant 0 : i32
    %2 = arith.cmpi ne, %1, %c0_i32_0 : i32
    scf.if %2 {
      %c0_36 = arith.constant 0 : index
      %c0_37 = arith.constant 0 : index
      %c0_38 = arith.constant 0 : index
      %52 = vector.load %arg3[%c0_36, %c0_37, %c0_38] : memref<1x16x32xf32, #tpu.memory_space<vmem>>, vector<1x16x32xf32>
      %53 = vector.shape_cast %52 : vector<1x16x32xf32> to vector<16x32xf32>
      %c0_39 = arith.constant 0 : index
      %c0_40 = arith.constant 0 : index
      %54 = vector.load %arg8[%c0_39, %c0_40] : memref<32x32xf32, #tpu.memory_space<vmem>>, vector<32x32xf32>
      %cst_41 = arith.constant dense<0.000000e+00> : vector<16x32xf32>
      %55 = tpu.matmul %53, %54, %cst_41 {dimension_numbers = #tpu.dot_dimension_numbers<[1], [0], [0], [1], [0, 0, 1, 1], [], []>} : vector<16x32xf32>, vector<32x32xf32>, vector<16x32xf32> -> vector<16x32xf32>
      %c0_42 = arith.constant 0 : index
      %c0_43 = arith.constant 0 : index
      %56 = vector.load %arg9[%c0_42, %c0_43] : memref<1x32xf32, #tpu.memory_space<vmem>>, vector<1x32xf32>
      %57 = vector.broadcast %56 : vector<1x32xf32> to vector<16x32xf32>
      %58 = arith.addf %55, %57 : vector<16x32xf32>
      %c0_44 = arith.constant 0 : index
      %c0_45 = arith.constant 0 : index
      %c0_46 = arith.constant 0 : index
      %59 = vector.load %arg4[%c0_44, %c0_45, %c0_46] : memref<1x16x32xf32, #tpu.memory_space<vmem>>, vector<1x16x32xf32>
      %60 = vector.shape_cast %59 : vector<1x16x32xf32> to vector<16x32xf32>
      %c0_47 = arith.constant 0 : index
      %c0_48 = arith.constant 0 : index
      %61 = vector.load %arg10[%c0_47, %c0_48] : memref<32x32xf32, #tpu.memory_space<vmem>>, vector<32x32xf32>
      %cst_49 = arith.constant dense<0.000000e+00> : vector<16x32xf32>
      %62 = tpu.matmul %60, %61, %cst_49 {dimension_numbers = #tpu.dot_dimension_numbers<[1], [0], [0], [1], [0, 0, 1, 1], [], []>} : vector<16x32xf32>, vector<32x32xf32>, vector<16x32xf32> -> vector<16x32xf32>
      %c0_50 = arith.constant 0 : index
      %c0_51 = arith.constant 0 : index
      %63 = vector.load %arg11[%c0_50, %c0_51] : memref<1x32xf32, #tpu.memory_space<vmem>>, vector<1x32xf32>
      %64 = vector.broadcast %63 : vector<1x32xf32> to vector<16x32xf32>
      %65 = arith.addf %62, %64 : vector<16x32xf32>
      %66 = vector.shape_cast %58 : vector<16x32xf32> to vector<1x16x4x8xf32>
      %67 = tpu.transpose %66, [0, 2, 1, 3] : vector<1x16x4x8xf32> -> vector<1x4x16x8xf32>
      %68 = vector.shape_cast %67 : vector<1x4x16x8xf32> to vector<4x16x8xf32>
      %69 = vector.shape_cast %65 : vector<16x32xf32> to vector<1x16x4x8xf32>
      %70 = tpu.transpose %69, [0, 2, 1, 3] : vector<1x16x4x8xf32> -> vector<1x4x16x8xf32>
      %71 = vector.shape_cast %70 : vector<1x4x16x8xf32> to vector<4x16x8xf32>
      %c0_52 = arith.constant 0 : index
      %c0_53 = arith.constant 0 : index
      %c0_54 = arith.constant 0 : index
      %72 = vector.load %arg16[%c0_52, %c0_53, %c0_54] : memref<4x16x8xf32, #tpu.memory_space<vmem>>, vector<4x16x8xf32>
      tpu.vector_store %arg16[%c0_52, %c0_53, %c0_54], %68 {strides = array<i32>} : memref<4x16x8xf32, #tpu.memory_space<vmem>>, vector<4x16x8xf32>,
      %c0_55 = arith.constant 0 : index
      %c0_56 = arith.constant 0 : index
      %c0_57 = arith.constant 0 : index
      %73 = vector.load %arg17[%c0_55, %c0_56, %c0_57] : memref<4x16x8xf32, #tpu.memory_space<vmem>>, vector<4x16x8xf32>
      tpu.vector_store %arg17[%c0_55, %c0_56, %c0_57], %71 {strides = array<i32>} : memref<4x16x8xf32, #tpu.memory_space<vmem>>, vector<4x16x8xf32>,
    } else {
    }
    %c0 = arith.constant 0 : index
    %c0_1 = arith.constant 0 : index
    %c0_2 = arith.constant 0 : index
    %3 = vector.load %arg16[%c0, %c0_1, %c0_2] : memref<4x16x8xf32, #tpu.memory_space<vmem>>, vector<4x16x8xf32>
    %c0_3 = arith.constant 0 : index
    %c0_4 = arith.constant 0 : index
    %c0_5 = arith.constant 0 : index
    %4 = vector.load %arg17[%c0_3, %c0_4, %c0_5] : memref<4x16x8xf32, #tpu.memory_space<vmem>>, vector<4x16x8xf32>
    %c0_6 = arith.constant 0 : index
    %c0_7 = arith.constant 0 : index
    %c0_8 = arith.constant 0 : index
    %5 = vector.load %arg2[%c0_6, %c0_7, %c0_8] : memref<1x16x32xf32, #tpu.memory_space<vmem>>, vector<1x16x32xf32>
    %6 = vector.shape_cast %5 : vector<1x16x32xf32> to vector<16x32xf32>
    %c0_9 = arith.constant 0 : index
    %c0_10 = arith.constant 0 : index
    %7 = vector.load %arg6[%c0_9, %c0_10] : memref<32x32xf32, #tpu.memory_space<vmem>>, vector<32x32xf32>
    %cst = arith.constant dense<0.000000e+00> : vector<16x32xf32>
    %8 = tpu.matmul %6, %7, %cst {dimension_numbers = #tpu.dot_dimension_numbers<[1], [0], [0], [1], [0, 0, 1, 1], [], []>} : vector<16x32xf32>, vector<32x32xf32>, vector<16x32xf32> -> vector<16x32xf32>
    %c0_11 = arith.constant 0 : index
    %c0_12 = arith.constant 0 : index
    %9 = vector.load %arg7[%c0_11, %c0_12] : memref<1x32xf32, #tpu.memory_space<vmem>>, vector<1x32xf32>
    %10 = vector.broadcast %9 : vector<1x32xf32> to vector<16x32xf32>
    %11 = arith.addf %8, %10 : vector<16x32xf32>
    %12 = vector.shape_cast %11 : vector<16x32xf32> to vector<1x16x4x8xf32>
    %13 = tpu.transpose %12, [0, 2, 1, 3] : vector<1x16x4x8xf32> -> vector<1x4x16x8xf32>
    %14 = vector.shape_cast %13 : vector<1x4x16x8xf32> to vector<4x16x8xf32>
    "tpu.trace_start"() <{level = 10 : i32, message = "bqd,bkd->bqk"}> : () -> ()
    %cst_13 = arith.constant dense<0.000000e+00> : vector<4x16x16xf32>
    %15 = tpu.matmul %14, %3, %cst_13 {dimension_numbers = #tpu.dot_dimension_numbers<[2], [2], [1], [1], [0, 0, 0, 1, 1, 1], [0], [0]>} : vector<4x16x8xf32>, vector<4x16x8xf32>, vector<4x16x16xf32> -> vector<4x16x16xf32>
    "tpu.trace_stop"() : () -> ()
    %16 = vector.shape_cast %15 : vector<4x16x16xf32> to vector<1x4x16x16xf32>
    %c0_14 = arith.constant 0 : index
    %c0_15 = arith.constant 0 : index
    %c0_16 = arith.constant 0 : index
    %c0_17 = arith.constant 0 : index
    %17 = vector.load %arg5[%c0_14, %c0_15, %c0_16, %c0_17] : memref<1x1x16x16xi8, #tpu.memory_space<vmem>>, vector<1x1x16x16xi8>
    %18 = arith.extsi %17 : vector<1x1x16x16xi8> to vector<1x1x16x16xi32>
    %c0_i32_18 = arith.constant 0 : i32
    %19 = vector.broadcast %c0_i32_18 : i32 to vector<1x1x16x16xi32>
    %20 = arith.cmpi eq, %18, %19 : vector<1x1x16x16xi32>
    %cst_19 = arith.constant -1.000000e+10 : f32
    %21 = vector.shape_cast %20 : vector<1x1x16x16xi1> to vector<1x1x16x16xi1>
    %22 = vector.broadcast %21 : vector<1x1x16x16xi1> to vector<1x4x16x16xi1>
    %23 = vector.broadcast %cst_19 : f32 to vector<1x4x16x16xf32>
    %24 = arith.select %22, %23, %16 : vector<1x4x16x16xi1>, vector<1x4x16x16xf32>
    %cst_20 = arith.constant dense<0xFF800000> : vector<1x4x16xf32>
    %25 = vector.multi_reduction <maximumf>, %24, %cst_20 [3] : vector<1x4x16x16xf32> to vector<1x4x16xf32>
    %26 = vector.shape_cast %25 : vector<1x4x16xf32> to vector<1x4x16x1xf32>
    %27 = vector.broadcast %26 : vector<1x4x16x1xf32> to vector<1x4x16x16xf32>
    %28 = arith.subf %24, %27 : vector<1x4x16x16xf32>
    %29 = math.exp %28 : vector<1x4x16x16xf32>
    %cst_21 = arith.constant dense<0.000000e+00> : vector<1x4x16xf32>
    %30 = vector.multi_reduction <add>, %29, %cst_21 [3] : vector<1x4x16x16xf32> to vector<1x4x16xf32>
    %31 = vector.shape_cast %30 : vector<1x4x16xf32> to vector<1x4x16x1xf32>
    %32 = tpu.reciprocal %31 {approx = true} : vector<1x4x16x1xf32> -> vector<1x4x16x1xf32>
    %33 = arith.mulf %31, %32 : vector<1x4x16x1xf32>
    %cst_22 = arith.constant 2.000000e+00 : f32
    %34 = vector.broadcast %cst_22 : f32 to vector<1x4x16x1xf32>
    %35 = arith.subf %34, %33 : vector<1x4x16x1xf32>
    %36 = arith.mulf %32, %35 : vector<1x4x16x1xf32>
    %37 = vector.broadcast %36 : vector<1x4x16x1xf32> to vector<1x4x16x16xf32>
    %38 = arith.mulf %29, %37 : vector<1x4x16x16xf32>
    %c0_23 = arith.constant 0 : index
    %c0_24 = arith.constant 0 : index
    %c0_25 = arith.constant 0 : index
    %c0_26 = arith.constant 0 : index
    %39 = vector.load %arg15[%c0_23, %c0_24, %c0_25, %c0_26] : memref<1x4x16x16xf32, #tpu.memory_space<vmem>>, vector<1x4x16x16xf32>
    tpu.vector_store %arg15[%c0_23, %c0_24, %c0_25, %c0_26], %38 {strides = array<i32>} : memref<1x4x16x16xf32, #tpu.memory_space<vmem>>, vector<1x4x16x16xf32>,
    %40 = vector.shape_cast %38 : vector<1x4x16x16xf32> to vector<4x16x16xf32>
    "tpu.trace_start"() <{level = 10 : i32, message = "bqk,bkd->bqd"}> : () -> ()
    %cst_27 = arith.constant dense<0.000000e+00> : vector<4x16x8xf32>
    %41 = tpu.matmul %40, %4, %cst_27 {dimension_numbers = #tpu.dot_dimension_numbers<[2], [1], [1], [2], [0, 0, 0, 1, 1, 2], [0], [0]>} : vector<4x16x16xf32>, vector<4x16x8xf32>, vector<4x16x8xf32> -> vector<4x16x8xf32>
    "tpu.trace_stop"() : () -> ()
    %42 = vector.shape_cast %41 : vector<4x16x8xf32> to vector<1x4x16x8xf32>
    %43 = tpu.transpose %42, [0, 2, 1, 3] : vector<1x4x16x8xf32> -> vector<1x16x4x8xf32>
    %44 = vector.shape_cast %43 : vector<1x16x4x8xf32> to vector<16x32xf32>
    %c0_28 = arith.constant 0 : index
    %c0_29 = arith.constant 0 : index
    %45 = vector.load %arg12[%c0_28, %c0_29] : memref<32x32xf32, #tpu.memory_space<vmem>>, vector<32x32xf32>
    %cst_30 = arith.constant dense<0.000000e+00> : vector<16x32xf32>
    %46 = tpu.matmul %44, %45, %cst_30 {dimension_numbers = #tpu.dot_dimension_numbers<[1], [0], [0], [1], [0, 0, 1, 1], [], []>} : vector<16x32xf32>, vector<32x32xf32>, vector<16x32xf32> -> vector<16x32xf32>
    %c0_31 = arith.constant 0 : index
    %c0_32 = arith.constant 0 : index
    %47 = vector.load %arg13[%c0_31, %c0_32] : memref<1x32xf32, #tpu.memory_space<vmem>>, vector<1x32xf32>
    %48 = vector.broadcast %47 : vector<1x32xf32> to vector<16x32xf32>
    %49 = arith.addf %46, %48 : vector<16x32xf32>
    %50 = vector.shape_cast %49 : vector<16x32xf32> to vector<1x16x32xf32>
    %c0_33 = arith.constant 0 : index
    %c0_34 = arith.constant 0 : index
    %c0_35 = arith.constant 0 : index
    %51 = vector.load %arg14[%c0_33, %c0_34, %c0_35] : memref<1x16x32xf32, #tpu.memory_space<vmem>>, vector<1x16x32xf32>
    tpu.vector_store %arg14[%c0_33, %c0_34, %c0_35], %50 {strides = array<i32>} : memref<1x16x32xf32, #tpu.memory_space<vmem>>, vector<1x16x32xf32>,
    return
  }
  func.func @transform_0(%arg0: i32, %arg1: i32) -> (i32, i32, i32) {
    %c0_i32 = arith.constant 0 : i32
    %c0_i32_0 = arith.constant 0 : i32
    return %arg0, %arg1, %c0_i32 : i32, i32, i32
  }
  func.func @transform_1(%arg0: i32, %arg1: i32) -> (i32, i32, i32) {
    %c0_i32 = arith.constant 0 : i32
    %c0_i32_0 = arith.constant 0 : i32
    %c0_i32_1 = arith.constant 0 : i32
    return %arg0, %c0_i32, %c0_i32_0 : i32, i32, i32
  }
  func.func @transform_2(%arg0: i32, %arg1: i32) -> (i32, i32, i32) {
    %c0_i32 = arith.constant 0 : i32
    %c0_i32_0 = arith.constant 0 : i32
    %c0_i32_1 = arith.constant 0 : i32
    return %arg0, %c0_i32, %c0_i32_0 : i32, i32, i32
  }
  func.func @transform_3(%arg0: i32, %arg1: i32) -> (i32, i32, i32, i32) {
    %c0_i32 = arith.constant 0 : i32
    %c0_i32_0 = arith.constant 0 : i32
    %c0_i32_1 = arith.constant 0 : i32
    return %arg0, %c0_i32, %arg1, %c0_i32_0 : i32, i32, i32, i32
  }
  func.func @transform_4(%arg0: i32, %arg1: i32) -> (i32, i32) {
    %c0_i32 = arith.constant 0 : i32
    %c0_i32_0 = arith.constant 0 : i32
    %c0_i32_1 = arith.constant 0 : i32
    return %c0_i32, %c0_i32_0 : i32, i32
  }
  func.func @transform_5(%arg0: i32, %arg1: i32) -> (i32, i32) {
    %c0_i32 = arith.constant 0 : i32
    %c0_i32_0 = arith.constant 0 : i32
    %c0_i32_1 = arith.constant 0 : i32
    return %c0_i32, %c0_i32_0 : i32, i32
  }
  func.func @transform_6(%arg0: i32, %arg1: i32) -> (i32, i32) {
    %c0_i32 = arith.constant 0 : i32
    %c0_i32_0 = arith.constant 0 : i32
    %c0_i32_1 = arith.constant 0 : i32
    return %c0_i32, %c0_i32_0 : i32, i32
  }
  func.func @transform_7(%arg0: i32, %arg1: i32) -> (i32, i32) {
    %c0_i32 = arith.constant 0 : i32
    %c0_i32_0 = arith.constant 0 : i32
    %c0_i32_1 = arith.constant 0 : i32
    return %c0_i32, %c0_i32_0 : i32, i32
  }
  func.func @transform_8(%arg0: i32, %arg1: i32) -> (i32, i32) {
    %c0_i32 = arith.constant 0 : i32
    %c0_i32_0 = arith.constant 0 : i32
    %c0_i32_1 = arith.constant 0 : i32
    return %c0_i32, %c0_i32_0 : i32, i32
  }
  func.func @transform_9(%arg0: i32, %arg1: i32) -> (i32, i32) {
    %c0_i32 = arith.constant 0 : i32
    %c0_i32_0 = arith.constant 0 : i32
    %c0_i32_1 = arith.constant 0 : i32
    return %c0_i32, %c0_i32_0 : i32, i32
  }
  func.func @transform_10(%arg0: i32, %arg1: i32) -> (i32, i32) {
    %c0_i32 = arith.constant 0 : i32
    %c0_i32_0 = arith.constant 0 : i32
    %c0_i32_1 = arith.constant 0 : i32
    return %c0_i32, %c0_i32_0 : i32, i32
  }
  func.func @transform_11(%arg0: i32, %arg1: i32) -> (i32, i32) {
    %c0_i32 = arith.constant 0 : i32
    %c0_i32_0 = arith.constant 0 : i32
    %c0_i32_1 = arith.constant 0 : i32
    return %c0_i32, %c0_i32_0 : i32, i32
  }
  func.func @transform_12(%arg0: i32, %arg1: i32) -> (i32, i32, i32) {
    %c0_i32 = arith.constant 0 : i32
    %c0_i32_0 = arith.constant 0 : i32
    return %arg0, %arg1, %c0_i32 : i32, i32, i32
  }
  func.func @transform_13(%arg0: i32, %arg1: i32) -> (i32, i32, i32, i32) {
    %c0_i32 = arith.constant 0 : i32
    %c0_i32_0 = arith.constant 0 : i32
    %c0_i32_1 = arith.constant 0 : i32
    return %arg0, %c0_i32, %arg1, %c0_i32_0 : i32, i32, i32, i32
  }
}

module attributes {stable_mosaic.version = 11 : i64} {
  func.func @kernel(%arg0: i32, %arg1: i32, %arg2: memref<1x16x32xf32, #tpu.memory_space<vmem>>, %arg3: memref<1x16x32xf32, #tpu.memory_space<vmem>>, %arg4: memref<1x16x32xf32, #tpu.memory_space<vmem>>, %arg5: memref<1x1x16x16xi8, #tpu.memory_space<vmem>>, %arg6: memref<32x32xf32, #tpu.memory_space<vmem>>, %arg7: memref<1x32xf32, #tpu.memory_space<vmem>>, %arg8: memref<32x32xf32, #tpu.memory_space<vmem>>, %arg9: memref<1x32xf32, #tpu.memory_space<vmem>>, %arg10: memref<32x32xf32, #tpu.memory_space<vmem>>, %arg11: memref<1x32xf32, #tpu.memory_space<vmem>>, %arg12: memref<32x32xf32, #tpu.memory_space<vmem>>, %arg13: memref<1x32xf32, #tpu.memory_space<vmem>>, %arg14: memref<1x16x32xf32, #tpu.memory_space<vmem>>, %arg15: memref<1x4x16x16xf32, #tpu.memory_space<vmem>>, %arg16: memref<4x16x8xf32, #tpu.memory_space<vmem>>, %arg17: memref<4x16x8xf32, #tpu.memory_space<vmem>>) attributes {dimension_semantics = [#tpu.dimension_semantics<parallel>, #tpu.dimension_semantics<arbitrary>], iteration_bounds = array<i64: 2, 1>, scalar_prefetch = 0 : i64, scratch_operands = 2 : i64, tpu.core_type = #tpu.core_type<tc>, window_params = [{transform_indices = @transform_0, window_bounds = array<i64: 1, 16, 32>}, {transform_indices = @transform_1, window_bounds = array<i64: 1, 16, 32>}, {transform_indices = @transform_2, window_bounds = array<i64: 1, 16, 32>}, {transform_indices = @transform_3, window_bounds = array<i64: 1, 1, 16, 16>}, {pipeline_mode = #tpu.pipeline_mode<synchronous>, transform_indices = @transform_4, window_bounds = array<i64: 32, 32>}, {pipeline_mode = #tpu.pipeline_mode<synchronous>, transform_indices = @transform_5, window_bounds = array<i64: 1, 32>}, {pipeline_mode = #tpu.pipeline_mode<synchronous>, transform_indices = @transform_6, window_bounds = array<i64: 32, 32>}, {pipeline_mode = #tpu.pipeline_mode<synchronous>, transform_indices = @transform_7, window_bounds = array<i64: 1, 32>}, {pipeline_mode = #tpu.pipeline_mode<synchronous>, transform_indices = @transform_8, window_bounds = array<i64: 32, 32>}, {pipeline_mode = #tpu.pipeline_mode<synchronous>, transform_indices = @transform_9, window_bounds = array<i64: 1, 32>}, {pipeline_mode = #tpu.pipeline_mode<synchronous>, transform_indices = @transform_10, window_bounds = array<i64: 32, 32>}, {pipeline_mode = #tpu.pipeline_mode<synchronous>, transform_indices = @transform_11, window_bounds = array<i64: 1, 32>}, {transform_indices = @transform_12, window_bounds = array<i64: 1, 16, 32>}, {transform_indices = @transform_13, window_bounds = array<i64: 1, 4, 16, 16>}]} {
    %c0_i32 = arith.constant 0 : i32
    %0 = arith.cmpi eq, %arg1, %c0_i32 : i32
    %1 = arith.extui %0 : i1 to i32
    %c0_i32_0 = arith.constant 0 : i32
    %2 = arith.cmpi ne, %1, %c0_i32_0 : i32
    scf.if %2 {
      %c0_36 = arith.constant 0 : index
      %c0_37 = arith.constant 0 : index
      %c0_38 = arith.constant 0 : index
      %52 = vector.load %arg3[%c0_36, %c0_37, %c0_38] : memref<1x16x32xf32, #tpu.memory_space<vmem>>, vector<1x16x32xf32>
      %53 = vector.shape_cast %52 : vector<1x16x32xf32> to vector<16x32xf32>
      %c0_39 = arith.constant 0 : index
      %c0_40 = arith.constant 0 : index
      %54 = vector.load %arg8[%c0_39, %c0_40] : memref<32x32xf32, #tpu.memory_space<vmem>>, vector<32x32xf32>
      %cst_41 = arith.constant dense<0.000000e+00> : vector<16x32xf32>
      %55 = tpu.matmul %53, %54, %cst_41 {dimension_numbers = #tpu.dot_dimension_numbers<[1], [0], [0], [1], [0, 0, 1, 1], [], []>} : vector<16x32xf32>, vector<32x32xf32>, vector<16x32xf32> -> vector<16x32xf32>
      %c0_42 = arith.constant 0 : index
      %c0_43 = arith.constant 0 : index
      %56 = vector.load %arg9[%c0_42, %c0_43] : memref<1x32xf32, #tpu.memory_space<vmem>>, vector<1x32xf32>
      %57 = vector.broadcast %56 : vector<1x32xf32> to vector<16x32xf32>
      %58 = arith.addf %55, %57 : vector<16x32xf32>
      %c0_44 = arith.constant 0 : index
      %c0_45 = arith.constant 0 : index
      %c0_46 = arith.constant 0 : index
      %59 = vector.load %arg4[%c0_44, %c0_45, %c0_46] : memref<1x16x32xf32, #tpu.memory_space<vmem>>, vector<1x16x32xf32>
      %60 = vector.shape_cast %59 : vector<1x16x32xf32> to vector<16x32xf32>
      %c0_47 = arith.constant 0 : index
      %c0_48 = arith.constant 0 : index
      %61 = vector.load %arg10[%c0_47, %c0_48] : memref<32x32xf32, #tpu.memory_space<vmem>>, vector<32x32xf32>
      %cst_49 = arith.constant dense<0.000000e+00> : vector<16x32xf32>
      %62 = tpu.matmul %60, %61, %cst_49 {dimension_numbers = #tpu.dot_dimension_numbers<[1], [0], [0], [1], [0, 0, 1, 1], [], []>} : vector<16x32xf32>, vector<32x32xf32>, vector<16x32xf32> -> vector<16x32xf32>
      %c0_50 = arith.constant 0 : index
      %c0_51 = arith.constant 0 : index
      %63 = vector.load %arg11[%c0_50, %c0_51] : memref<1x32xf32, #tpu.memory_space<vmem>>, vector<1x32xf32>
      %64 = vector.broadcast %63 : vector<1x32xf32> to vector<16x32xf32>
      %65 = arith.addf %62, %64 : vector<16x32xf32>
      %66 = vector.shape_cast %58 : vector<16x32xf32> to vector<1x16x4x8xf32>
      %67 = tpu.transpose %66, [0, 2, 1, 3] : vector<1x16x4x8xf32> -> vector<1x4x16x8xf32>
      %68 = vector.shape_cast %67 : vector<1x4x16x8xf32> to vector<4x16x8xf32>
      %69 = vector.shape_cast %65 : vector<16x32xf32> to vector<1x16x4x8xf32>
      %70 = tpu.transpose %69, [0, 2, 1, 3] : vector<1x16x4x8xf32> -> vector<1x4x16x8xf32>
      %71 = vector.shape_cast %70 : vector<1x4x16x8xf32> to vector<4x16x8xf32>
      %c0_52 = arith.constant 0 : index
      %c0_53 = arith.constant 0 : index
      %c0_54 = arith.constant 0 : index
      %72 = vector.load %arg16[%c0_52, %c0_53, %c0_54] : memref<4x16x8xf32, #tpu.memory_space<vmem>>, vector<4x16x8xf32>
      tpu.vector_store %arg16[%c0_52, %c0_53, %c0_54], %68 {strides = array<i32>} : memref<4x16x8xf32, #tpu.memory_space<vmem>>, vector<4x16x8xf32>,
      %c0_55 = arith.constant 0 : index
      %c0_56 = arith.constant 0 : index
      %c0_57 = arith.constant 0 : index
      %73 = vector.load %arg17[%c0_55, %c0_56, %c0_57] : memref<4x16x8xf32, #tpu.memory_space<vmem>>, vector<4x16x8xf32>
      tpu.vector_store %arg17[%c0_55, %c0_56, %c0_57], %71 {strides = array<i32>} : memref<4x16x8xf32, #tpu.memory_space<vmem>>, vector<4x16x8xf32>,
    } else {
    }
    %c0 = arith.constant 0 : index
    %c0_1 = arith.constant 0 : index
    %c0_2 = arith.constant 0 : index
    %3 = vector.load %arg16[%c0, %c0_1, %c0_2] : memref<4x16x8xf32, #tpu.memory_space<vmem>>, vector<4x16x8xf32>
    %c0_3 = arith.constant 0 : index
    %c0_4 = arith.constant 0 : index
    %c0_5 = arith.constant 0 : index
    %4 = vector.load %arg17[%c0_3, %c0_4, %c0_5] : memref<4x16x8xf32, #tpu.memory_space<vmem>>, vector<4x16x8xf32>
    %c0_6 = arith.constant 0 : index
    %c0_7 = arith.constant 0 : index
    %c0_8 = arith.constant 0 : index
    %5 = vector.load %arg2[%c0_6, %c0_7, %c0_8] : memref<1x16x32xf32, #tpu.memory_space<vmem>>, vector<1x16x32xf32>
    %6 = vector.shape_cast %5 : vector<1x16x32xf32> to vector<16x32xf32>
    %c0_9 = arith.constant 0 : index
    %c0_10 = arith.constant 0 : index
    %7 = vector.load %arg6[%c0_9, %c0_10] : memref<32x32xf32, #tpu.memory_space<vmem>>, vector<32x32xf32>
    %cst = arith.constant dense<0.000000e+00> : vector<16x32xf32>
    %8 = tpu.matmul %6, %7, %cst {dimension_numbers = #tpu.dot_dimension_numbers<[1], [0], [0], [1], [0, 0, 1, 1], [], []>} : vector<16x32xf32>, vector<32x32xf32>, vector<16x32xf32> -> vector<16x32xf32>
    %c0_11 = arith.constant 0 : index
    %c0_12 = arith.constant 0 : index
    %9 = vector.load %arg7[%c0_11, %c0_12] : memref<1x32xf32, #tpu.memory_space<vmem>>, vector<1x32xf32>
    %10 = vector.broadcast %9 : vector<1x32xf32> to vector<16x32xf32>
    %11 = arith.addf %8, %10 : vector<16x32xf32>
    %12 = vector.shape_cast %11 : vector<16x32xf32> to vector<1x16x4x8xf32>
    %13 = tpu.transpose %12, [0, 2, 1, 3] : vector<1x16x4x8xf32> -> vector<1x4x16x8xf32>
    %14 = vector.shape_cast %13 : vector<1x4x16x8xf32> to vector<4x16x8xf32>
    "tpu.trace_start"() <{level = 10 : i32, message = "bqd,bkd->bqk"}> : () -> ()
    %cst_13 = arith.constant dense<0.000000e+00> : vector<4x16x16xf32>
    %15 = tpu.matmul %14, %3, %cst_13 {dimension_numbers = #tpu.dot_dimension_numbers<[2], [2], [1], [1], [0, 0, 0, 1, 1, 1], [0], [0]>} : vector<4x16x8xf32>, vector<4x16x8xf32>, vector<4x16x16xf32> -> vector<4x16x16xf32>
    "tpu.trace_stop"() : () -> ()
    %16 = vector.shape_cast %15 : vector<4x16x16xf32> to vector<1x4x16x16xf32>
    %c0_14 = arith.constant 0 : index
    %c0_15 = arith.constant 0 : index
    %c0_16 = arith.constant 0 : index
    %c0_17 = arith.constant 0 : index
    %17 = vector.load %arg5[%c0_14, %c0_15, %c0_16, %c0_17] : memref<1x1x16x16xi8, #tpu.memory_space<vmem>>, vector<1x1x16x16xi8>
    %18 = arith.extsi %17 : vector<1x1x16x16xi8> to vector<1x1x16x16xi32>
    %c0_i32_18 = arith.constant 0 : i32
    %19 = vector.broadcast %c0_i32_18 : i32 to vector<1x1x16x16xi32>
    %20 = arith.cmpi eq, %18, %19 : vector<1x1x16x16xi32>
    %cst_19 = arith.constant -1.000000e+10 : f32
    %21 = vector.shape_cast %20 : vector<1x1x16x16xi1> to vector<1x1x16x16xi1>
    %22 = vector.broadcast %21 : vector<1x1x16x16xi1> to vector<1x4x16x16xi1>
    %23 = vector.broadcast %cst_19 : f32 to vector<1x4x16x16xf32>
    %24 = arith.select %22, %23, %16 : vector<1x4x16x16xi1>, vector<1x4x16x16xf32>
    %cst_20 = arith.constant dense<0xFF800000> : vector<1x4x16xf32>
    %25 = vector.multi_reduction <maximumf>, %24, %cst_20 [3] : vector<1x4x16x16xf32> to vector<1x4x16xf32>
    %26 = vector.shape_cast %25 : vector<1x4x16xf32> to vector<1x4x16x1xf32>
    %27 = vector.broadcast %26 : vector<1x4x16x1xf32> to vector<1x4x16x16xf32>
    %28 = arith.subf %24, %27 : vector<1x4x16x16xf32>
    %29 = math.exp %28 : vector<1x4x16x16xf32>
    %cst_21 = arith.constant dense<0.000000e+00> : vector<1x4x16xf32>
    %30 = vector.multi_reduction <add>, %29, %cst_21 [3] : vector<1x4x16x16xf32> to vector<1x4x16xf32>
    %31 = vector.shape_cast %30 : vector<1x4x16xf32> to vector<1x4x16x1xf32>
    %32 = tpu.reciprocal %31 {approx = true} : vector<1x4x16x1xf32> -> vector<1x4x16x1xf32>
    %33 = arith.mulf %31, %32 : vector<1x4x16x1xf32>
    %cst_22 = arith.constant 2.000000e+00 : f32
    %34 = vector.broadcast %cst_22 : f32 to vector<1x4x16x1xf32>
    %35 = arith.subf %34, %33 : vector<1x4x16x1xf32>
    %36 = arith.mulf %32, %35 : vector<1x4x16x1xf32>
    %37 = vector.broadcast %36 : vector<1x4x16x1xf32> to vector<1x4x16x16xf32>
    %38 = arith.mulf %29, %37 : vector<1x4x16x16xf32>
    %c0_23 = arith.constant 0 : index
    %c0_24 = arith.constant 0 : index
    %c0_25 = arith.constant 0 : index
    %c0_26 = arith.constant 0 : index
    %39 = vector.load %arg15[%c0_23, %c0_24, %c0_25, %c0_26] : memref<1x4x16x16xf32, #tpu.memory_space<vmem>>, vector<1x4x16x16xf32>
    tpu.vector_store %arg15[%c0_23, %c0_24, %c0_25, %c0_26], %38 {strides = array<i32>} : memref<1x4x16x16xf32, #tpu.memory_space<vmem>>, vector<1x4x16x16xf32>,
    %40 = vector.shape_cast %38 : vector<1x4x16x16xf32> to vector<4x16x16xf32>
    "tpu.trace_start"() <{level = 10 : i32, message = "bqk,bkd->bqd"}> : () -> ()
    %cst_27 = arith.constant dense<0.000000e+00> : vector<4x16x8xf32>
    %41 = tpu.matmul %40, %4, %cst_27 {dimension_numbers = #tpu.dot_dimension_numbers<[2], [1], [1], [2], [0, 0, 0, 1, 1, 2], [0], [0]>} : vector<4x16x16xf32>, vector<4x16x8xf32>, vector<4x16x8xf32> -> vector<4x16x8xf32>
    "tpu.trace_stop"() : () -> ()
    %42 = vector.shape_cast %41 : vector<4x16x8xf32> to vector<1x4x16x8xf32>
    %43 = tpu.transpose %42, [0, 2, 1, 3] : vector<1x4x16x8xf32> -> vector<1x16x4x8xf32>
    %44 = vector.shape_cast %43 : vector<1x16x4x8xf32> to vector<16x32xf32>
    %c0_28 = arith.constant 0 : index
    %c0_29 = arith.constant 0 : index
    %45 = vector.load %arg12[%c0_28, %c0_29] : memref<32x32xf32, #tpu.memory_space<vmem>>, vector<32x32xf32>
    %cst_30 = arith.constant dense<0.000000e+00> : vector<16x32xf32>
    %46 = tpu.matmul %44, %45, %cst_30 {dimension_numbers = #tpu.dot_dimension_numbers<[1], [0], [0], [1], [0, 0, 1, 1], [], []>} : vector<16x32xf32>, vector<32x32xf32>, vector<16x32xf32> -> vector<16x32xf32>
    %c0_31 = arith.constant 0 : index
    %c0_32 = arith.constant 0 : index
    %47 = vector.load %arg13[%c0_31, %c0_32] : memref<1x32xf32, #tpu.memory_space<vmem>>, vector<1x32xf32>
    %48 = vector.broadcast %47 : vector<1x32xf32> to vector<16x32xf32>
    %49 = arith.addf %46, %48 : vector<16x32xf32>
    %50 = vector.shape_cast %49 : vector<16x32xf32> to vector<1x16x32xf32>
    %c0_33 = arith.constant 0 : index
    %c0_34 = arith.constant 0 : index
    %c0_35 = arith.constant 0 : index
    %51 = vector.load %arg14[%c0_33, %c0_34, %c0_35] : memref<1x16x32xf32, #tpu.memory_space<vmem>>, vector<1x16x32xf32>
    tpu.vector_store %arg14[%c0_33, %c0_34, %c0_35], %50 {strides = array<i32>} : memref<1x16x32xf32, #tpu.memory_space<vmem>>, vector<1x16x32xf32>,
    return
  }
  func.func @transform_0(%arg0: i32, %arg1: i32) -> (i32, i32, i32) {
    %c0_i32 = arith.constant 0 : i32
    %c0_i32_0 = arith.constant 0 : i32
    return %arg0, %arg1, %c0_i32 : i32, i32, i32
  }
  func.func @transform_1(%arg0: i32, %arg1: i32) -> (i32, i32, i32) {
    %c0_i32 = arith.constant 0 : i32
    %c0_i32_0 = arith.constant 0 : i32
    %c0_i32_1 = arith.constant 0 : i32
    return %arg0, %c0_i32, %c0_i32_0 : i32, i32, i32
  }
  func.func @transform_2(%arg0: i32, %arg1: i32) -> (i32, i32, i32) {
    %c0_i32 = arith.constant 0 : i32
    %c0_i32_0 = arith.constant 0 : i32
    %c0_i32_1 = arith.constant 0 : i32
    return %arg0, %c0_i32, %c0_i32_0 : i32, i32, i32
  }
  func.func @transform_3(%arg0: i32, %arg1: i32) -> (i32, i32, i32, i32) {
    %c0_i32 = arith.constant 0 : i32
    %c0_i32_0 = arith.constant 0 : i32
    %c0_i32_1 = arith.constant 0 : i32
    return %arg0, %c0_i32, %arg1, %c0_i32_0 : i32, i32, i32, i32
  }
  func.func @transform_4(%arg0: i32, %arg1: i32) -> (i32, i32) {
    %c0_i32 = arith.constant 0 : i32
    %c0_i32_0 = arith.constant 0 : i32
    %c0_i32_1 = arith.constant 0 : i32
    return %c0_i32, %c0_i32_0 : i32, i32
  }
  func.func @transform_5(%arg0: i32, %arg1: i32) -> (i32, i32) {
    %c0_i32 = arith.constant 0 : i32
    %c0_i32_0 = arith.constant 0 : i32
    %c0_i32_1 = arith.constant 0 : i32
    return %c0_i32, %c0_i32_0 : i32, i32
  }
  func.func @transform_6(%arg0: i32, %arg1: i32) -> (i32, i32) {
    %c0_i32 = arith.constant 0 : i32
    %c0_i32_0 = arith.constant 0 : i32
    %c0_i32_1 = arith.constant 0 : i32
    return %c0_i32, %c0_i32_0 : i32, i32
  }
  func.func @transform_7(%arg0: i32, %arg1: i32) -> (i32, i32) {
    %c0_i32 = arith.constant 0 : i32
    %c0_i32_0 = arith.constant 0 : i32
    %c0_i32_1 = arith.constant 0 : i32
    return %c0_i32, %c0_i32_0 : i32, i32
  }
  func.func @transform_8(%arg0: i32, %arg1: i32) -> (i32, i32) {
    %c0_i32 = arith.constant 0 : i32
    %c0_i32_0 = arith.constant 0 : i32
    %c0_i32_1 = arith.constant 0 : i32
    return %c0_i32, %c0_i32_0 : i32, i32
  }
  func.func @transform_9(%arg0: i32, %arg1: i32) -> (i32, i32) {
    %c0_i32 = arith.constant 0 : i32
    %c0_i32_0 = arith.constant 0 : i32
    %c0_i32_1 = arith.constant 0 : i32
    return %c0_i32, %c0_i32_0 : i32, i32
  }
  func.func @transform_10(%arg0: i32, %arg1: i32) -> (i32, i32) {
    %c0_i32 = arith.constant 0 : i32
    %c0_i32_0 = arith.constant 0 : i32
    %c0_i32_1 = arith.constant 0 : i32
    return %c0_i32, %c0_i32_0 : i32, i32
  }
  func.func @transform_11(%arg0: i32, %arg1: i32) -> (i32, i32) {
    %c0_i32 = arith.constant 0 : i32
    %c0_i32_0 = arith.constant 0 : i32
    %c0_i32_1 = arith.constant 0 : i32
    return %c0_i32, %c0_i32_0 : i32, i32
  }
  func.func @transform_12(%arg0: i32, %arg1: i32) -> (i32, i32, i32) {
    %c0_i32 = arith.constant 0 : i32
    %c0_i32_0 = arith.constant 0 : i32
    return %arg0, %arg1, %c0_i32 : i32, i32, i32
  }
  func.func @transform_13(%arg0: i32, %arg1: i32) -> (i32, i32, i32, i32) {
    %c0_i32 = arith.constant 0 : i32
    %c0_i32_0 = arith.constant 0 : i32
    %c0_i32_1 = arith.constant 0 : i32
    return %arg0, %c0_i32, %arg1, %c0_i32_0 : i32, i32, i32, i32
  }
}

</mosaic_0001>

<bundles_post_ra>
// kernel: tpu_custom_call.1
= control target key start
LH: loop header
LB: loop body
LE: loop exit
PB: predicated region body
PF: predicated region fallthrough
CT: control target
= control target key end

     0   :  { %s5117_s0 = inlined_call_operand.hbm [shape: f32[2,16,32], index: 0, kind: input, shape index: {}]   ;;  %s5118_s1 = inlined_call_operand.hbm [shape: f32[2,16,32], index: 1, kind: input, shape index: {}]   ;;  %s5119_s2 = inlined_call_operand.hbm [shape: f32[2,16,32], index: 2, kind: input, shape index: {}]   ;;  %s5120_s3 = inlined_call_operand.hbm [shape: s8[2,1,16,16], index: 3, kind: input, shape index: {}]   ;;  %s5121_s4 = inlined_call_operand.hbm [shape: f32[32,32], index: 4, kind: input, shape index: {}]   ;;  %s5122_s5 = inlined_call_operand.vmem [shape: f32[1,32], index: 5, kind: input, shape index: {}]   ;;  %s5123_s6 = inlined_call_operand.hbm [shape: f32[32,32], index: 6, kind: input, shape index: {}]   ;;  %s5124_s7 = inlined_call_operand.vmem [shape: f32[1,32], index: 7, kind: input, shape index: {}]   ;;  %s5125_s8 = inlined_call_operand.hbm [shape: f32[32,32], index: 8, kind: input, shape index: {}]   ;;  %s5126_s9 = inlined_call_operand.vmem [shape: f32[1,32], index: 9, kind: input, shape index: {}]   ;;  %s5127_s10 = inlined_call_operand.vmem [shape: f32[32,32], index: 10, kind: input, shape index: {}]   ;;  %s5128_s11 = inlined_call_operand.vmem [shape: f32[1,32], index: 11, kind: input, shape index: {}]   ;;  %s5129_s12 = inlined_call_operand.hbm [shape: f32[2,16,32], index: 12, kind: output, shape index: {0}]   ;;  %s5130_s13 = inlined_call_operand.hbm [shape: f32[2,4,16,16], index: 13, kind: output, shape index: {1}]  }
   0x1   :  { %5157 = sst [smem:[#allocation34_spill]] %s5118_s1 }
   0x2   :  { %5158 = sst [smem:[#allocation35_spill]] %s5121_s4 }
   0x3   :  { %5159 = sst [smem:[#allocation36_spill]] %s5122_s5 }
   0x4   :  { %5160 = sst [smem:[#allocation37_spill]] %s5123_s6 }
   0x5   :  { %5161 = sst [smem:[#allocation38_spill]] %s5124_s7 }
   0x6   :  { %5162 = sst [smem:[#allocation39_spill]] %s5126_s9 }
   0x7   :  { %5163 = sst [smem:[#allocation40_spill]] %s5127_s10 }
   0x8   :  { %5164 = sst [smem:[#allocation41_spill]] %s5128_s11 }
   0x9   :  { %5165 = sst [smem:[#allocation42_spill]] %s5129_s12 }
   0xa   :  { %5166 = sst [smem:[#allocation43_spill]] %s5130_s13 }
   0xb   :  { %19 = vsyncpa [#allocation5], 0 }
   0xc   :  { %21 = vsyncpa [#allocation5 + $0x1], 0 }
   0xd   :  { %22 = vsyncpa [#allocation8], 0 }
   0xe   :  { %24 = vsyncpa [#allocation8 + $0x1], 0 }
   0xf   :  { %25 = vsyncpa [#allocation11], 0 }
  0x10   :  { %27 = vsyncpa [#allocation11 + $0x1], 0 }
  0x11   :  { %28 = vsyncpa [#allocation14], 0 }
  0x12   :  { %29 = vsyncpa [#allocation6], 0 }
  0x13   :  { %31 = vsyncpa [#allocation6 + $0x1], 0 }
  0x14   :  { %32 = vsyncpa [#allocation18], 0 }
  0x15   :  { %34 = vsyncpa [#allocation18 + $0x1], 0  ;;  %s4235_s25 = smov 0   ;;  %s4237_s26 = smov 0  }
  0x16   :  { %s4239_s27 = smov 0   ;;  %s4241_s28 = smov 0  }
  0x17   :  { %s4243_s29 = smov 0   ;;  %s4245_s30 = smov 0  }
  0x18 LB: > { %5167 = sst [smem:[#allocation26_spill]] %s4121_s25  ;;  %s4266_s14 = sadd.s32 4294967295, %s4141_s30   ;;  %s4141_s30 = sphi %s4245_s30, %s40_s30   ;;  %s4137_s29 = sphi %s4243_s29, %s5229_s29   ;;  %s4133_s28 = sphi %s4241_s28, %s5228_s28   ;;  %s4129_s27 = sphi %s4239_s27, %s5224_s27   ;;  %s4125_s26 = sphi %s4237_s26, %s5227_s26   ;;  %s4121_s25 = sphi %s4235_s25, %s5226_s25  }
  0x19   : > { %5168 = sst [smem:[#allocation27_spill]] %s4129_s27  ;;  %s3323_s15 = sadd.s32 4294967294, %s4141_s30  }
  0x1a   : > { %5169 = sst [smem:[#allocation28_spill]] %s4133_s28  ;;  %p68_p0 = scmp.ne.s32.totalorder %s4129_s27, %s4125_s26 }
  0x1b   : > { %5170 = sst [smem:[#allocation29_spill]] %s4266_s14  ;;  %p69_p1 = scmp.eq.s32.totalorder %s4141_s30, 0 }
  0x1c   : > { %p74_p2 = scmp.ne.s32.totalorder %s4125_s26, %s4121_s25  ;;  %p5138_p3 = scmp.eq.s32.totalorder %s4266_s14, 0 }
  0x1d   : > { %p348_p4 = scmp.eq.s32.totalorder %s4266_s14, 1  ;;  %p4277_p5 = por %p69_p1, %p68_p0 }
  0x1e   : > { %p354_p6 = scmp.eq.s32.totalorder %s3323_s15, 1  ;;  %p4283_p7 = por %p5138_p3, %p74_p2 }
  0x1f   : > { %p4287_p8 = por %p348_p4, %p68_p0  ;;  %p3324_p10 = scmp.ge.s32.totalorder %s4141_s30, 1 }
  0x20   : > { %s5172_s18 = scalar_select %p4283_p7, 1, 0 }
  0x21   : > { %s5173_s19 = scalar_select %p4287_p8, 1, 0 }
  0x22   : > { %p4291_p9 = por %p354_p6, %p74_p2  ;;  %p389_p11 = scmp.lt.s32.totalorder %s4141_s30, 3 }
  0x23   : > { %5174 = sst [smem:[#allocation30_spill]] %s5173_s19  ;;  %s4143_s22 = smov [#allocation12]  }
  0x24   : > { %s5175_s20 = scalar_select %p4291_p9, 1, 0 }
  0x25   : > { %p4297_p12 = pnand %p3324_p10, %p389_p11  ;;  %s401_s23 = sshll.u32 %s4143_s22, 4  ;;  %s4301_s23 = int_to_ptr.vmem [resolvable:$true] %s401_s23 }
  0x26   : > { %5176 = sst [smem:[#allocation31_spill]] %s5175_s20  ;;  %s4144_s15 = smov [#allocation13]  }
  0x27   : > { %s5177_s21 = scalar_select %p4297_p12, 1, 0 }
  0x28   : > { %p3673_p13 = pneg %p4297_p12  ;;  %s417_s16 = sshll.u32 %s4144_s15, 4  ;;  %s4312_s16 = int_to_ptr.vmem [resolvable:$true] %s417_s16 }
  0x29   : > { %s5179_s4 = sld [smem:[#allocation35_spill]] }
  0x2a   : > { %p4308_p1 = pnand %p3673_p13, %p5138_p3 }
  0x2c   : > { %s5178_s24 = scalar_select %p4308_p1, 1, 0 }
  0x2d   : > { %p4323_p4 = pneg %p4308_p1 }
  0x2f   : > { %s3807_s22 = scalar_lea.hbm %s5179_s4, 512 }
  0x30   : > { %p3808_p2 = scmp.ne.s32.totalorder %s5179_s4, %s3807_s22  ;;  %p3814_p11 = scmp.lt.u32.totalorder %s3807_s22, %s5179_s4 }
  0x31   : > { %s5180_s19 = scalar_select %p4323_p4, 1, 0 }
  0x32   : > { %p3810_p6 = pnand %p4323_p4, %p3808_p2 }
  0x34   : > { %p3811_p10 = pneg %p3810_p6 }
  0x36   : > { %p3816_p13 = pnand %p3814_p11, %p3811_p10 }
  0x38   : > { %3819 = shalt.err (!%p3816_p13)
}
  0x39   : > { %s3820_s11 = scalar_lea.vmem %s4301_s23, 512  ;;  %p3828_p8 = scmp.lt.s32.totalorder %s4301_s23, %s4301_s23 }
  0x3a   : > { %p3821_p0 = scmp.ne.s32.totalorder %s4301_s23, %s3820_s11  ;;  %p3829_p7 = scmp.lt.s32.totalorder %s3820_s11, %s3820_s11 }
  0x3c   : > { %p3823_p3 = pnand %p3821_p0, %p4323_p4  ;;  %p3830_p2 = por %p3829_p7, %p3828_p8 }
  0x3e   : > { %p3824_p9 = pneg %p3823_p3 }
  0x40   : > { %p3831_p6 = pnand %p3830_p2, %p3824_p9 }
  0x42   : > { %3834 = shalt.err (!%p3831_p6)
}
  0x43   : > { %s5142_s12 = smov 128   ;;  %s5144_s13 = smov 8  }
  0x44   : > { %3676 = dma.hbm_to_vmem [thread:$0]  (!%p4308_p1), %s5179_s4, 512, %s4301_s23, [#allocation11], %s5142_s12, %s5142_s12, %s5144_s13  }
  0x45   : > { %s5181_s6 = sld [smem:[#allocation37_spill]] }
  0x4b   : > { %s3835_s11 = scalar_lea.hbm %s5181_s6, 512 }
  0x4c   : > { %p3836_p3 = scmp.ne.s32.totalorder %s5181_s6, %s3835_s11  ;;  %p3842_p9 = scmp.lt.u32.totalorder %s3835_s11, %s5181_s6 }
  0x4e   : > { %p3838_p7 = pnand %p3836_p3, %p4323_p4 }
  0x50   : > { %p3839_p8 = pneg %p3838_p7 }
  0x52   : > { %p3844_p0 = pnand %p3842_p9, %p3839_p8 }
  0x54   : > { %3847 = shalt.err (!%p3844_p0)
}
  0x55   : > { %s3848_s23 = scalar_lea.vmem %s4312_s16, 512  ;;  %p3856_p2 = scmp.lt.s32.totalorder %s4312_s16, %s4312_s16 }
  0x56   : > { %p3849_p10 = scmp.ne.s32.totalorder %s4312_s16, %s3848_s23  ;;  %p3857_p6 = scmp.lt.s32.totalorder %s3848_s23, %s3848_s23 }
  0x58   : > { %p3851_p11 = pnand %p3849_p10, %p4323_p4  ;;  %p3858_p3 = por %p3857_p6, %p3856_p2 }
  0x5a   : > { %p3852_p13 = pneg %p3851_p11 }
  0x5c   : > { %p3859_p7 = pnand %p3858_p3, %p3852_p13 }
  0x5e   : > { %3862 = shalt.err (!%p3859_p7)
}
  0x5f   : > { %3679 = dma.hbm_to_vmem [thread:$0]  (!%p4308_p1), %s5181_s6, 512, %s4312_s16, [#allocation14], %s5142_s12, %s5142_s12, %s5144_s13  }
  0x60   : > { %s5182_s10 = sadd.s32 1, %s4137_s29  ;;  %p3706_p9 = scmp.lt.s32.totalorder %s4141_s30, 2 }
  0x61   : > { %p54_p8 = scmp.ge.s32.totalorder %s5182_s10, 2  ;;  %s4377_s20 = sand.u32 1, %s4129_s27  }
  0x62   : > { %s4380_s25 = sshll.u32 %s4137_s29, 8  ;;  %s5183_s28 = smov %s5182_s10 }
  0x63   : > { %s5231_s28 = smov (%p54_p8, %s5183_s28), 0  ;;  %s4387_s22 = sshll.u32 %s4377_s20, 4 }
  0x64   : > { %5184 = sst [smem:[#allocation32_spill]] %s5231_s28  ;;  %p4391_p0 = pnand %p3706_p9, %p4277_p5 }
  0x65   : > { %s56_s15 = ssub.s32 %s4137_s29, %s5231_s28  ;;  %s5147_s11 = sand.u32 1, %s4141_s30  }
  0x66   : > { %s5185_s16 = scalar_select %p4391_p0, 1, 0 }
  0x67   : > { %p59_p10 = scmp.eq.s32.totalorder %s56_s15, 0  ;;  %s5186_s23 = sadd.s32 1, %s4129_s27 }
  0x68   : > { %s5188_s1 = sld [smem:[#allocation34_spill]]  ;;  %s483_s17 = scalar_lea.vmem [#allocation7], %s4387_s22 }
  0x69   : > { %s4401_s5 = scalar_select %p59_p10, %s4129_s27, %s5186_s23  }
  0x6a   : > { %s490_s13 = sshll.u32 %s483_s17, 4  ;;  %s4414_s4 = scalar_lea.sflag [#allocation8], %s5147_s11  ;;  %s4410_s13 = int_to_ptr.vmem [resolvable:$true] %s490_s13 }
  0x6b   : > { %5187 = sst [smem:[#allocation33_spill]] %s4401_s5  ;;  %p4420_p11 = pneg %p4391_p0 }
  0x6e   : > { %s4407_s12 = scalar_lea.hbm %s5188_s1, %s4380_s25  ;;  %s3868_s17 = scalar_lea.hbm %s5188_s1, 512 }
  0x6f   : > { %s3863_s15 = scalar_lea.hbm %s4407_s12, 256  ;;  %p3869_p6 = scmp.lt.u32.totalorder %s4407_s12, %s5188_s1 }
  0x70   : > { %p3864_p5 = scmp.ne.s32.totalorder %s4407_s12, %s3863_s15  ;;  %p3870_p3 = scmp.lt.u32.totalorder %s3868_s17, %s3863_s15 }
  0x71   : > { %p3872_p8 = scmp.lt.u32.totalorder %s3863_s15, %s4407_s12 }
  0x72   : > { %p3866_p13 = pnand %p4420_p11, %p3864_p5  ;;  %p3871_p7 = por %p3870_p3, %p3869_p6 }
  0x74   : > { %p3867_p2 = pneg %p3866_p13  ;;  %p3873_p9 = por %p3872_p8, %p3871_p7 }
  0x76   : > { %p3874_p10 = pnand %p3873_p9, %p3867_p2 }
  0x78   : > { %3877 = shalt.err (!%p3874_p10)
}
  0x79   : > { %s3878_s11 = scalar_lea.vmem %s4410_s13, 256  ;;  %s4147_s9 = smov [#allocation7]  }
  0x7a   : > { %p3879_p5 = scmp.ne.s32.totalorder %s4410_s13, %s3878_s11  ;;  %s3883_s10 = sshll.u32 %s4147_s9, 4  ;;  %s3884_s10 = int_to_ptr.vmem [resolvable:$false] %s3883_s10 }
  0x7b   : > { %s3885_s6 = scalar_lea.vmem %s3884_s10, 512  ;;  %p3886_p1 = scmp.lt.s32.totalorder %s4410_s13, %s3884_s10 }
  0x7c   : > { %p3881_p13 = pnand %p3879_p5, %p4420_p11  ;;  %p3887_p4 = scmp.lt.s32.totalorder %s3885_s6, %s3878_s11 }
  0x7e   : > { %p3882_p12 = pneg %p3881_p13  ;;  %p3888_p6 = por %p3887_p4, %p3886_p1 }
  0x80   : > { %p3889_p3 = pnand %p3888_p6, %p3882_p12 }
  0x82   : > { %3892 = shalt.err (!%p3889_p3)
}
  0x83   : > { %s5190_s28 = smov 8   ;;  %s5191_s15 = smov 128  }
  0x84   : > { %3689 = dma.hbm_to_vmem [thread:$0]  (!%p4391_p0), %s4407_s12, 256, %s4410_s13, %s4414_s4, %s5191_s15, %s5191_s15, %s5190_s28  }
  0x85   : > { %s4148_s17 = smov [#allocation15]   ;;  %s4451_s11 = scalar_lea.hbm %s5117_s0, %s4380_s25 }
  0x86   : > { %s433_s9 = sshll.u32 %s4148_s17, 4  ;;  %s3893_s27 = scalar_lea.hbm %s5125_s8, 512  ;;  %s434_s9 = int_to_ptr.vmem [resolvable:$true] %s433_s9 }
  0x87   : > { %p3894_p12 = scmp.ne.s32.totalorder %s5125_s8, %s3893_s27  ;;  %p5192_p1 = scmp.ne.s32.totalorder %s5180_s19, 0 }
  0x88   : > { %p3900_p7 = scmp.lt.u32.totalorder %s3893_s27, %s5125_s8 }
  0x89   : > { %p3896_p4 = pnand %p3894_p12, %p5192_p1 }
  0x8b   : > { %p3897_p2 = pneg %p3896_p4 }
  0x8d   : > { %p3902_p8 = pnand %p3900_p7, %p3897_p2 }
  0x8f   : > { %3905 = shalt.err (!%p3902_p8)
}
  0x90   : > { %s3906_s1 = scalar_lea.vmem %s434_s9, 512  ;;  %p3914_p13 = scmp.lt.s32.totalorder %s434_s9, %s434_s9 }
  0x91   : > { %p3907_p9 = scmp.ne.s32.totalorder %s434_s9, %s3906_s1  ;;  %p3915_p6 = scmp.lt.s32.totalorder %s3906_s1, %s3906_s1 }
  0x93   : > { %p3909_p10 = pnand %p3907_p9, %p5192_p1  ;;  %p3916_p3 = por %p3915_p6, %p3914_p13 }
  0x95   : > { %p3910_p5 = pneg %p3909_p10 }
  0x97   : > { %p3917_p0 = pnand %p3916_p3, %p3910_p5 }
  0x99   : > { %3920 = shalt.err (!%p3917_p0)
}
  0x9a   : > { %p5193_p12 = scmp.ne.s32.totalorder %s5178_s24, 0  ;;  %s460_s14 = scalar_lea.vmem [#allocation4], %s4387_s22 }
  0x9b   : > { %s469_s19 = sshll.u32 %s460_s14, 4  ;;  %s4481_s17 = scalar_lea.hbm %s5119_s2, %s4380_s25  ;;  %s4475_s19 = int_to_ptr.vmem [resolvable:$true] %s469_s19 }
  0x9c   : > { %3682 = dma.hbm_to_vmem [thread:$0]  (!%p5193_p12), %s5125_s8, 512, %s434_s9, [#allocation14], %s5191_s15, %s5191_s15, %s5190_s28  }
  0x9d   : > { %s457_s10 = scalar_lea.sflag [#allocation5], %s4377_s20  ;;  %s3921_s6 = scalar_lea.hbm %s4451_s11, 256 }
  0x9e   : > { %p3922_p0 = scmp.ne.s32.totalorder %s4451_s11, %s3921_s6  ;;  %s3926_s1 = scalar_lea.hbm %s5117_s0, 512 }
  0x9f   : > { %p3927_p2 = scmp.lt.u32.totalorder %s4451_s11, %s5117_s0  ;;  %p3928_p7 = scmp.lt.u32.totalorder %s3926_s1, %s3921_s6 }
  0xa0   : > { %p3924_p1 = pnand %p3922_p0, %p4420_p11  ;;  %p3930_p9 = scmp.lt.u32.totalorder %s3921_s6, %s4451_s11 }
  0xa1   : > { %p3929_p8 = por %p3928_p7, %p3927_p2 }
  0xa2   : > { %p3925_p4 = pneg %p3924_p1 }
  0xa3   : > { %p3931_p10 = por %p3930_p9, %p3929_p8 }
  0xa5   : > { %p3932_p5 = pnand %p3931_p10, %p3925_p4 }
  0xa7   : > { %3935 = shalt.err (!%p3932_p5)
}
  0xa8   : > { %s3936_s25 = scalar_lea.vmem %s4475_s19, 256  ;;  %s4149_s27 = smov [#allocation4]  }
  0xa9   : > { %p3937_p13 = scmp.ne.s32.totalorder %s4475_s19, %s3936_s25  ;;  %s3941_s14 = sshll.u32 %s4149_s27, 4  ;;  %s3942_s14 = int_to_ptr.vmem [resolvable:$false] %s3941_s14 }
  0xaa   : > { %s3943_s24 = scalar_lea.vmem %s3942_s14, 512  ;;  %p3944_p12 = scmp.lt.s32.totalorder %s4475_s19, %s3942_s14 }
  0xab   : > { %p3939_p6 = pnand %p3937_p13, %p4420_p11  ;;  %p3945_p0 = scmp.lt.s32.totalorder %s3943_s24, %s3936_s25 }
  0xad   : > { %p3940_p3 = pneg %p3939_p6  ;;  %p3946_p1 = por %p3945_p0, %p3944_p12 }
  0xaf   : > { %p3947_p2 = pnand %p3946_p1, %p3940_p3 }
  0xb1   : > { %3950 = shalt.err (!%p3947_p2)
}
  0xb2   : > { %p5194_p4 = scmp.ne.s32.totalorder %s5185_s16, 0  ;;  %s504_s5 = scalar_lea.vmem [#allocation9], %s4387_s22 }
  0xb3   : > { %s511_s6 = sshll.u32 %s504_s5, 4  ;;  %s3338_s12 = sshll.u32 %s4377_s20, 2  ;;  %s4512_s6 = int_to_ptr.vmem [resolvable:$true] %s511_s6 }
  0xb4   : > { %3686 = dma.hbm_to_vmem [thread:$0]  (!%p5194_p4), %s4451_s11, 256, %s4475_s19, %s457_s10, %s5191_s15, %s5191_s15, %s5190_s28  }
  0xb5   : > { %s3951_s13 = scalar_lea.hbm %s4481_s17, 256  ;;  %s3956_s7 = scalar_lea.hbm %s5119_s2, 512 }
  0xb6   : > { %p3952_p7 = scmp.ne.s32.totalorder %s4481_s17, %s3951_s13  ;;  %p3957_p10 = scmp.lt.u32.totalorder %s4481_s17, %s5119_s2 }
  0xb7   : > { %p3958_p5 = scmp.lt.u32.totalorder %s3956_s7, %s3951_s13  ;;  %p3960_p6 = scmp.lt.u32.totalorder %s3951_s13, %s4481_s17 }
  0xb8   : > { %p3954_p8 = pnand %p3952_p7, %p4420_p11 }
  0xb9   : > { %p3959_p13 = por %p3958_p5, %p3957_p10 }
  0xba   : > { %p3955_p9 = pneg %p3954_p8 }
  0xbb   : > { %p3961_p3 = por %p3960_p6, %p3959_p13 }
  0xbd   : > { %p3962_p12 = pnand %p3961_p3, %p3955_p9 }
  0xbf   : > { %3965 = shalt.err (!%p3962_p12)
}
  0xc0   : > { %s3966_s22 = scalar_lea.vmem %s4512_s6, 256  ;;  %s4150_s11 = smov [#allocation9]  }
  0xc1   : > { %p3967_p0 = scmp.ne.s32.totalorder %s4512_s6, %s3966_s22  ;;  %s3971_s19 = sshll.u32 %s4150_s11, 4  ;;  %s3972_s19 = int_to_ptr.vmem [resolvable:$false] %s3971_s19 }
  0xc2   : > { %s3973_s10 = scalar_lea.vmem %s3972_s19, 512  ;;  %p3974_p7 = scmp.lt.s32.totalorder %s4512_s6, %s3972_s19 }
  0xc3   : > { %p3969_p1 = pnand %p3967_p0, %p4420_p11  ;;  %p3975_p8 = scmp.lt.s32.totalorder %s3973_s10, %s3966_s22 }
  0xc5   : > { %p3970_p2 = pneg %p3969_p1  ;;  %p3976_p10 = por %p3975_p8, %p3974_p7 }
  0xc7   : > { %p3977_p5 = pnand %p3976_p10, %p3970_p2 }
  0xc9   : > { %3980 = shalt.err (!%p3977_p5)
}
  0xca   : > { %3692 = dma.hbm_to_vmem [thread:$0]  (!%p5194_p4), %s4481_s17, 256, %s4512_s6, %s4414_s4, %s5191_s15, %s5191_s15, %s5190_s28  }
  0xcb   : > { %s3414_s14 = sshll.u32 %s4137_s29, 6  ;;  %s525_s24 = scalar_lea.vmem [#allocation10], %s3338_s12 }
  0xcc   : > { %s534_s5 = sshll.u32 %s525_s24, 4  ;;  %s4545_s9 = scalar_lea.hbm %s5120_s3, %s3414_s14  ;;  %s4547_s5 = int_to_ptr.vmem [resolvable:$true] %s534_s5 }
  0xcd   : > { %s5195_s7 = sand.u32 1, %s4141_s30   ;;  %s3981_s27 = scalar_lea.hbm %s4545_s9, 64 }
  0xce   : > { %s4551_s25 = scalar_lea.sflag [#allocation11], %s5195_s7  ;;  %p3982_p9 = scmp.ne.s32.totalorder %s4545_s9, %s3981_s27 }
  0xcf   : > { %s3986_s28 = scalar_lea.hbm %s5120_s3, 128  ;;  %p3987_p3 = scmp.lt.u32.totalorder %s4545_s9, %s5120_s3 }
  0xd0   : > { %p3984_p13 = pnand %p3982_p9, %p4420_p11  ;;  %p3988_p12 = scmp.lt.u32.totalorder %s3986_s28, %s3981_s27 }
  0xd1   : > { %p3990_p1 = scmp.lt.u32.totalorder %s3981_s27, %s4545_s9 }
  0xd2   : > { %p3985_p6 = pneg %p3984_p13  ;;  %p3989_p0 = por %p3988_p12, %p3987_p3 }
  0xd4   : > { %p3991_p2 = por %p3990_p1, %p3989_p0 }
  0xd6   : > { %p3992_p7 = pnand %p3991_p2, %p3985_p6 }
  0xd8   : > { %3995 = shalt.err (!%p3992_p7)
}
  0xd9   : > { %s3996_s6 = scalar_lea.vmem %s4547_s5, 64  ;;  %s4151_s12 = smov [#allocation10]  }
  0xda   : > { %p3997_p8 = scmp.ne.s32.totalorder %s4547_s5, %s3996_s6  ;;  %s4001_s22 = sshll.u32 %s4151_s12, 4  ;;  %s4002_s22 = int_to_ptr.vmem [resolvable:$false] %s4001_s22 }
  0xdb   : > { %s4003_s11 = scalar_lea.vmem %s4002_s22, 128  ;;  %p4004_p9 = scmp.lt.s32.totalorder %s4547_s5, %s4002_s22 }
  0xdc   : > { %p3999_p10 = pnand %p3997_p8, %p4420_p11  ;;  %p4005_p13 = scmp.lt.s32.totalorder %s4003_s11, %s3996_s6 }
  0xde   : > { %p4000_p5 = pneg %p3999_p10  ;;  %p4006_p3 = por %p4005_p13, %p4004_p9 }
  0xe0   : > { %p4007_p12 = pnand %p4006_p3, %p4000_p5 }
  0xe2   : > { %4010 = shalt.err (!%p4007_p12)
}
  0xe3   : > { %s4152_s19 = smov 32   ;;  %s4153_s10 = smov 2  }
  0xe4   : > { %3695 = dma.hbm_to_vmem [thread:$0]  (!%p5194_p4), %s4545_s9, 64, %s4547_s5, %s4551_s25, %s4152_s19, %s4152_s19, %s4153_s10  }
  0xe5   : > { %p5196_p11 = scmp.ne.s32.totalorder %s5177_s21, 0 }
  0xe6   : > { %s4578_s23 = sand.u32 (!%p5196_p11), 1, %s4125_s26   ;;  %p5197_p6 = scmp.ne.s32.totalorder (!%p5196_p11), %s5172_s18, 0 }
  0xe7   : > { %546 = sbr.rel (%p5196_p11) target bundleno = 1832 (0x728), region = 68  ;;  %s4581_s14 = sshll.u32 (!%p5196_p11), %s4578_s23, 4 }
  0xe8   : > { %s549_s24 = scalar_lea.sflag (!%p5196_p11), [#allocation5], %s4578_s23  ;;  %s552_s13 = scalar_lea.vmem (!%p5196_p11), [#allocation4], %s4581_s14 }
  0xee   : > { %4092 = dma.done.wait (%p5197_p6), %s549_s24, 256  }
  0xef   : > { %4094 = vsyncadd (%p5197_p6), %s549_s24, 4294967040  ;;  %s5198_s16 = sld [smem:[#allocation29_spill]]  ;;  %s561_s1 = scalar_lea.vmem [#allocation7], %s4581_s14 }
  0xf5   : > { %s557_s21 = sand.u32 1, %s5198_s16  }
  0xf6   : > { %s558_s5 = scalar_lea.sflag [#allocation8], %s557_s21 }
  0xf7   : > { %4096 = dma.done.wait (%p5197_p6), %s558_s5, 512  }
  0xf8   : > { %4098 = vsyncadd (%p5197_p6), %s558_s5, 4294966784  ;;  %s3345_s9 = sshll.u32 %s4578_s23, 2  ;;  %s570_s7 = scalar_lea.vmem [#allocation9], %s4581_s14 }
  0xf9   : > { %s576_s25 = scalar_lea.sflag [#allocation11], %s557_s21  ;;  %s4597_s27 = scalar_lea.vmem [#allocation10], %s3345_s9 }
  0xfa   : > { %4100 = dma.done.wait (%p5197_p6), %s576_s25, 64  }
  0xfb   : > { %4102 = vsyncadd (%p5197_p6), %s576_s25, 4294967232  ;;  %p5199_p4 = scmp.eq.s32.totalorder %s5198_s16, 0 }
  0xfd   : > { %4104 = dma.done.wait (%p5199_p4), [#allocation11], 512   ;;  %p5200_p0 = pmov %p5199_p4 }
  0xff   : > { %4106 = vsyncadd (%p5200_p0), [#allocation11], 4294966784  ;;  %p5201_p1 = pmov %p5200_p0 }
 0x100   : > { %p5202_p2 = pmov %p5200_p0 }
 0x101   : > { %4108 = dma.done.wait (%p5201_p1), [#allocation14], 1024  }
 0x102   : > { %4110 = vsyncadd (%p5202_p2), [#allocation14], 4294966272  ;;  %vm675_vm0 = vcmask 261120   ;;  %v664_v0 = vld [vmem:[#allocation13] sm:$0xff]  ;;  %v665_v1 = vld [vmem:[#allocation13 + $0x8] sm:$0xff]  ;;  %s5203_s20 = sld [smem:[#allocation38_spill]]  ;;  %v876_v36 = vlaneseq }
 0x103   : > { %v666_v2 = vld [vmem:[#allocation13 + $0x10] sm:$0xff]  ;;  %v3577_v3 = vpack.c.bf16 %v665_v1, %v664_v0  ;;  %v667_v4 = vld [vmem:[#allocation13 + $0x18] sm:$0xff]  ;;  %v1470_v7 = vld [vmem:[#allocation12] sm:$0xff]  ;;  %s4154_s28 = smov 112   ;;  %s4155_s15 = smov 120   ;;  %vm1435_vm1 = vcmask 64512  }
 0x104   : > { %v662_v5 = vld [vmem:[%s561_s1] sm:$0xff]  ;;  %v3581_v6 = vpack.c.bf16 %v667_v4, %v666_v2  ;;  %v1472_v10 = vld [vmem:[#allocation12 + $0x10] sm:$0xff]  ;;  %s5204_s12 = sld [smem:[#allocation36_spill]]  ;;  %s4156_s22 = smov 104   ;;  %v759_v26 = vld [vmem:[#allocation15] sm:$0xff]  ;;  %v877_v40 = vshrl.u32 %v876_v36, 7 }
 0x105   : > { %3485 = vmatprep.mubr.msk.f32.mxu0 %vm675_vm0, %v662_v5  ;;  %v1471_v8 = vld [vmem:[#allocation12 + $0x8] sm:$0xff]  ;;  %3578 = vmatprep.subr.bf16.mxu0 %v3577_v3  ;;  %v1473_v11 = vld [vmem:[#allocation12 + $0x18] sm:$0xff]  ;;  %v663_v12 = vld [vmem:[%s561_s1 + $0x8] sm:$0xff]  ;;  %v4157_v34 = vmov 1983009808   ;;  %vm2222_vm5 = vcmask 130048  }
 0x106   : > { %3580 = vmatpush3.bf16.msra.mxu0 %v3577_v3  ;;  %v3593_v9 = vpack.c.bf16 %v1471_v8, %v1470_v7  ;;  %v3597_v13 = vpack.c.bf16 %v1473_v11, %v1472_v10  ;;  %v1468_v14 = vld [vmem:[%s552_s13] sm:$0xff]  ;;  %v1469_v15 = vld [vmem:[%s552_s13 + $0x8] sm:$0xff]  ;;  %v874_v35 = vunpack.c.l.s4 %v4157_v34  ;;  %v4158_v41 = vmov 1934713408   ;;  %vm4746_vm2 = vmpackc.low %vm1435_vm1, %vm1435_vm1  ;;  %s5211_s10 = sld [smem:[#allocation39_spill]]  ;;  %s3350_s24 = sshll.u32 %s4578_s23, 6 }
 0x107   : > { %3582 = vmatprep.subr.bf16.mxu0 %v3581_v6  ;;  %v760_v27 = vld [vmem:[#allocation15 + $0x8] sm:$0xff]  ;;  %v761_v29 = vld [vmem:[#allocation15 + $0x10] sm:$0xff]  ;;  %v762_v30 = vld [vmem:[#allocation15 + $0x18] sm:$0xff]  ;;  %v906_v42 = vunpack.c.l.s4 %v4158_v41  ;;  %s4925_s13 = scalar_lea.vmem [#allocation17], %s3350_s24  ;;  %s5212_s5 = sld [smem:[#allocation40_spill]]  ;;  %vm2967_vm6 = vcmask 195584  }
 0x108   : > { %v3351_v16 = vld [vmem:[%s5203_s20] ss:$0 sm:$0xff]  ;;  %v3585_v28 = vpack.c.bf16 %v760_v27, %v759_v26  ;;  %v3589_v31 = vpack.c.bf16 %v762_v30, %v761_v29  ;;  %v758_v33 = vld [vmem:[%s570_s7 + $0x8] sm:$0xff]  ;;  %v875_v39 = vunpack.c.0.s8 %v874_v35  ;;  %s4159_s4 = smov 16   ;;  %s4160_s20 = smov 8  }
 0x109   : > { %v757_v32 = vld [vmem:[%s570_s7] sm:$0xff]  ;;  %v907_v48 = vunpack.c.0.s8 %v906_v42  ;;  %s5214_s17 = sld [smem:[#allocation30_spill]]  ;;  %s5215_s19 = sld [smem:[#allocation43_spill]] }
 0x10a   : > { %3584 = vmatpush3.bf16.msra.mxu0 %v3581_v6  ;;  %v3365_v22 = vld [vmem:[%s5204_s12] ss:$0 sm:$0xff]  ;;  %3586 = vmatprep.subr.bf16.mxu1 %v3585_v28  ;;  %v4662_v45 = vsub.s32 %v875_v39, %v877_v40  ;;  %s3103_s12 = sshll.u32 %s4925_s13, 4  ;;  %s3070_s24 = scalar_lea.sflag [#allocation18], %s4578_s23  ;;  %s5024_s12 = int_to_ptr.vmem [resolvable:$true] %s3103_s12 }
 0x10b   : > { %3594 = vmatprep.subr.bf16.mxu0 %v3593_v9  ;;  %3588 = vmatpush3.bf16.msra.mxu1 %v3585_v28  ;;  %v4668_v59 = vsub.s32 %v907_v48, %v877_v40  ;;  %s4011_s16 = scalar_lea.vmem %s5024_s12, 1024  ;;  %s4162_s21 = smov [#allocation17]  }
 0x10c   : > { %3590 = vmatprep.subr.bf16.mxu1 %v3589_v31  ;;  %3496 = vmatprep.mubr.msk.f32.mxu1 %vm675_vm0, %v757_v32  ;;  %p4012_p7 = scmp.ne.s32.totalorder %s5024_s12, %s4011_s16  ;;  %s4015_s1 = sshll.u32 %s4162_s21, 4  ;;  %s4016_s1 = int_to_ptr.vmem [resolvable:$false] %s4015_s1 }
 0x10d   : > { %3486 = vmatmul.mubr.msk.f32.vlgmr.msra.gmra.mrb[0].mxu0 %vm675_vm0, %v663_v12  ;;  %p4018_p9 = scmp.lt.s32.totalorder %s5024_s12, %s4016_s1 }
 0x10e   : > { %3596 = vmatpush3.bf16.msra.mxu0 %v3593_v9  ;;  %3507 = vmatprep.mubr.msk.f32.mxu0 %vm675_vm0, %v1468_v14 }
 0x10f   : > { %3598 = vmatprep.subr.bf16.mxu0 %v3597_v13  ;;  %3592 = vmatpush3.bf16.msra.mxu1 %v3589_v31  ;;  %p5216_p8 = scmp.ne.s32.totalorder %s5214_s17, 0 }
 0x111   : > { %p4013_p10 = pnand %p4012_p7, %p5216_p8 }
 0x112   : > { %3600 = vmatpush3.bf16.msra.mxu0 %v3597_v13  ;;  %3497 = vmatmul.mubr.msk.f32.vlgmr.msra.gmra.mrb[0].mxu1 %vm675_vm0, %v758_v33 }
 0x113   : > { %p4014_p5 = pneg %p4013_p10 }
 0x115   : > { %3508 = vmatmul.mubr.msk.f32.vlgmr.msra.gmra.mrb[2].mxu0 %vm675_vm0, %v1469_v15 }
 0x1e0   : > { %v3487_v17 = vpop.f32.mrb[0].mxu0 }
 0x1e1   : > { %v754_v18 = vadd.f32 %v3487_v17, %v3351_v16  ;;  %v748_v19 = vpop.f32.mrb[1].mxu0 }
 0x1e2   : > { %v4628_v20 = vadd.f32 %v3351_v16, %v748_v19 }
 0x1e3   : > { %861 = vrot.lane.b32.xlu1 %v754_v18, %s4154_s28  ;;  %855 = vrot.lane.b32.xlu0 %v754_v18, %s4155_s15 }
 0x1e7   : > { %859 = vrot.lane.b32.xlu1 %v4628_v20, %s4154_s28  ;;  %853 = vrot.lane.b32.xlu0 %v4628_v20, %s4155_s15 }
 0x1e8   : > { %v3509_v21 = vpop.f32.mrb[2].mxu0 }
 0x1e9   : > { %v1554_v23 = vpop.f32.mrb[3].mxu0  ;;  %v4637_v24 = vadd.f32 %v3509_v21, %v3365_v22 }
 0x1ea   : > { %v4642_v25 = vadd.f32 %v3365_v22, %v1554_v23 }
 0x1eb   : > { %867 = vrot.lane.b32.xlu1 %v754_v18, %s4156_s22  ;;  %865 = vrot.lane.b32.xlu0 %v4628_v20, %s4156_s22 }
 0x1ef   : > { %1567 = vrot.lane.b32.xlu1 %v4637_v24, %s4155_s15  ;;  %1565 = vrot.lane.b32.xlu0 %v4642_v25, %s4155_s15 }
 0x1f3   : > { %1571 = vrot.lane.b32.xlu1 %v4642_v25, %s4154_s28  ;;  %1577 = vrot.lane.b32.xlu0 %v4642_v25, %s4156_s22 }
 0x1f7   : > { %1579 = vrot.lane.b32.xlu1 %v4637_v24, %s4156_s22  ;;  %1573 = vrot.lane.b32.xlu0 %v4637_v24, %s4154_s28 }
 0x255   : > { %v862_v37 = vpop.permute.xlu1 %861  ;;  %v856_v38 = vpop.permute.xlu0 %855 }
 0x256   : > { %v939_v46 = vcombine.low %v754_v18, %v862_v37  ;;  %v940_v47 = vcombine.high %v754_v18, %v862_v37 }
 0x258   : > { %v947_v57 = vrot.slane %v939_v46, %v4662_v45  ;;  %v954_v58 = vrot.slane %v940_v47, %v4662_v45 }
 0x259   : > { %v860_v43 = vpop.permute.xlu1 %859  ;;  %v854_v44 = vpop.permute.xlu0 %853 }
 0x25a   : > { %v871_v49 = vcombine.low %v4628_v20, %v860_v43  ;;  %v872_v50 = vcombine.high %v4628_v20, %v860_v43 }
 0x25c   : > { %v879_v0 = vrot.slane %v871_v49, %v4662_v45  ;;  %v886_v1 = vrot.slane %v872_v50, %v4662_v45 }
 0x25d   : > { %v868_v51 = vpop.permute.xlu1 %867  ;;  %v866_v52 = vpop.permute.xlu0 %865 }
 0x25e   : > { %v955_v53 = vcombine.low %v856_v38, %v868_v51  ;;  %v956_v54 = vcombine.high %v856_v38, %v868_v51  ;;  %v887_v55 = vcombine.low %v854_v44, %v866_v52  ;;  %v888_v56 = vcombine.high %v854_v44, %v866_v52 }
 0x260   : > { %v963_v60 = vrot.slane %v955_v53, %v4662_v45  ;;  %v970_v61 = vrot.slane %v956_v54, %v4662_v45  ;;  %v895_v62 = vrot.slane %v887_v55, %v4662_v45  ;;  %v902_v63 = vrot.slane %v888_v56, %v4662_v45 }
 0x261   : > { %v4676_v6 = vpop.permute.xlu1 %1567  ;;  %v4678_v7 = vpop.permute.xlu0 %1565 }
 0x262   : > { %v971_v2 = vcombine.low %v947_v57, %v963_v60  ;;  %v972_v3 = vcombine.high %v947_v57, %v963_v60  ;;  %v987_v4 = vcombine.low %v954_v58, %v970_v61  ;;  %v988_v5 = vcombine.high %v954_v58, %v970_v61 }
 0x263   : > { %v903_v8 = vcombine.low %v879_v0, %v895_v62  ;;  %v904_v9 = vcombine.high %v879_v0, %v895_v62  ;;  %v919_v10 = vcombine.low %v886_v1, %v902_v63  ;;  %v920_v11 = vcombine.high %v886_v1, %v902_v63 }
 0x264   : > { %v979_v12 = vrot.slane %v971_v2, %v4668_v59  ;;  %v986_v13 = vrot.slane %v972_v3, %v4668_v59  ;;  %v995_v14 = vrot.slane %v987_v4, %v4668_v59  ;;  %v1002_v15 = vrot.slane %v988_v5, %v4668_v59 }
 0x265   : > { %v911_v16 = vrot.slane %v903_v8, %v4668_v59  ;;  %v918_v17 = vrot.slane %v904_v9, %v4668_v59  ;;  %v927_v18 = vrot.slane %v919_v10, %v4668_v59  ;;  %v934_v19 = vrot.slane %v920_v11, %v4668_v59  ;;  %v1572_v34 = vpop.permute.xlu1 %1571  ;;  %v1578_v35 = vpop.permute.xlu0 %1577 }
 0x266   : > { %v1075_v20 = vcombine.low %v979_v12, %v986_v13  ;;  %v3359_v21 = vcombine.high %v979_v12, %v986_v13  ;;  %v1091_v22 = vcombine.low %v995_v14, %v1002_v15  ;;  %v3360_v23 = vcombine.high %v995_v14, %v1002_v15 }
 0x267   : > { %v1007_v26 = vcombine.low %v911_v16, %v918_v17  ;;  %v3357_v27 = vcombine.high %v911_v16, %v918_v17  ;;  %v1023_v28 = vcombine.low %v927_v18, %v934_v19  ;;  %v3358_v29 = vcombine.high %v927_v18, %v934_v19 }
 0x268   : > { %v1082_v30 = vrot.slane %v1075_v20, %v4662_v45  ;;  %v1090_v31 = vrot.slane %v3359_v21, %v4662_v45  ;;  %v1098_v32 = vrot.slane %v1091_v22, %v4662_v45  ;;  %v1106_v33 = vrot.slane %v3360_v23, %v4662_v45 }
 0x269   : > { %v1014_v36 = vrot.slane %v1007_v26, %v4662_v45  ;;  %v1022_v37 = vrot.slane %v3357_v27, %v4662_v45  ;;  %v1030_v38 = vrot.slane %v1023_v28, %v4662_v45  ;;  %v1038_v39 = vrot.slane %v3358_v29, %v4662_v45  ;;  %v1580_v62 = vpop.permute.xlu1 %1579  ;;  %v1574_v63 = vpop.permute.xlu0 %1573 }
 0x26a   : > { %v1107_v40 = vcombine.low %v1082_v30, %v1090_v31  ;;  %v1108_v41 = vcombine.high %v1082_v30, %v1090_v31  ;;  %v1123_v42 = vcombine.low %v1098_v32, %v1106_v33  ;;  %v1124_v43 = vcombine.high %v1098_v32, %v1106_v33 }
 0x26b   : > { %v1039_v44 = vcombine.low %v1014_v36, %v1022_v37  ;;  %v1040_v46 = vcombine.high %v1014_v36, %v1022_v37  ;;  %v1055_v47 = vcombine.low %v1030_v38, %v1038_v39  ;;  %v1056_v48 = vcombine.high %v1030_v38, %v1038_v39 }
 0x26c   : > { %v1115_v49 = vrot.slane %v1107_v40, %v4668_v59  ;;  %v1122_v50 = vrot.slane %v1108_v41, %v4668_v59  ;;  %v1131_v51 = vrot.slane %v1123_v42, %v4668_v59  ;;  %v1138_v52 = vrot.slane %v1124_v43, %v4668_v59 }
 0x26d   : > { %v1047_v53 = vrot.slane %v1039_v44, %v4668_v59  ;;  %v1054_v54 = vrot.slane %v1040_v46, %v4668_v59  ;;  %v1063_v55 = vrot.slane %v1055_v47, %v4668_v59  ;;  %v1070_v56 = vrot.slane %v1056_v48, %v4668_v59 }
 0x26e   : > { %v1139_v57 = vcombine.low %v1115_v49, %v1131_v51  ;;  %v1140_v58 = vcombine.high %v1115_v49, %v1131_v51  ;;  %v1141_v60 = vcombine.low %v1122_v50, %v1138_v52  ;;  %v1142_v61 = vcombine.high %v1122_v50, %v1138_v52 }
 0x26f   : > { %v1071_v0 = vcombine.low %v1047_v53, %v1063_v55  ;;  %v1072_v1 = vcombine.high %v1047_v53, %v1063_v55  ;;  %v1073_v2 = vcombine.low %v1054_v54, %v1070_v56  ;;  %v1074_v3 = vcombine.high %v1054_v54, %v1070_v56 }
 0x270   : > { %1437 = vst.msk [vmem:[#allocation2 + $0x8] sm:$0xff] %vm1435_vm1, %v1139_v57  ;;  %1439 = vst.msk [vmem:[#allocation2 + $0x18] sm:$0xff] %vm1435_vm1, %v1140_v58  ;;  %v1583_v4 = vcombine.low %v4642_v25, %v1572_v34  ;;  %v1584_v5 = vcombine.high %v4642_v25, %v1572_v34  ;;  %v1599_v8 = vcombine.low %v4678_v7, %v1578_v35 }
 0x271   : > { %1441 = vst.msk [vmem:[#allocation2 + $0x28] sm:$0xff] %vm1435_vm1, %v1141_v60  ;;  %1443 = vst.msk [vmem:[#allocation2 + $0x38] sm:$0xff] %vm1435_vm1, %v1142_v61  ;;  %v1600_v9 = vcombine.high %v4678_v7, %v1578_v35  ;;  %v1667_v10 = vcombine.low %v4676_v6, %v1580_v62  ;;  %v1668_v11 = vcombine.high %v4676_v6, %v1580_v62 }
 0x272   : > { %1436 = vst.msk [vmem:[#allocation2] sm:$0xff] %vm1435_vm1, %v1071_v0  ;;  %1438 = vst.msk [vmem:[#allocation2 + $0x10] sm:$0xff] %vm1435_vm1, %v1072_v1  ;;  %v1651_v12 = vcombine.low %v4637_v24, %v1574_v63  ;;  %v1652_v25 = vcombine.high %v4637_v24, %v1574_v63  ;;  %v1591_v13 = vrot.slane %v1583_v4, %v4662_v45 }
 0x273   : > { %1440 = vst.msk [vmem:[#allocation2 + $0x20] sm:$0xff] %vm1435_vm1, %v1073_v2  ;;  %1442 = vst.msk [vmem:[#allocation2 + $0x30] sm:$0xff] %vm1435_vm1, %v1074_v3  ;;  %v1598_v7 = vrot.slane %v1584_v5, %v4662_v45  ;;  %v1607_v14 = vrot.slane %v1599_v8, %v4662_v45  ;;  %v1614_v15 = vrot.slane %v1600_v9, %v4662_v45 }
 0x274   : > { %v1675_v16 = vrot.slane %v1667_v10, %v4662_v45  ;;  %v1682_v17 = vrot.slane %v1668_v11, %v4662_v45  ;;  %v1659_v18 = vrot.slane %v1651_v12, %v4662_v45  ;;  %v1666_v6 = vrot.slane %v1652_v25, %v4662_v45 }
 0x275   : > { %v1615_v19 = vcombine.low %v1591_v13, %v1607_v14  ;;  %v1616_v20 = vcombine.high %v1591_v13, %v1607_v14  ;;  %v1631_v21 = vcombine.low %v1598_v7, %v1614_v15  ;;  %v1632_v24 = vcombine.high %v1598_v7, %v1614_v15 }
 0x276   : > { %v1683_v22 = vcombine.low %v1659_v18, %v1675_v16  ;;  %v1684_v23 = vcombine.high %v1659_v18, %v1675_v16  ;;  %v1699_v26 = vcombine.low %v1666_v6, %v1682_v17  ;;  %v1700_v27 = vcombine.high %v1666_v6, %v1682_v17 }
 0x277   : > { %v1623_v28 = vrot.slane %v1615_v19, %v4668_v59  ;;  %v1630_v29 = vrot.slane %v1616_v20, %v4668_v59  ;;  %v1639_v30 = vrot.slane %v1631_v21, %v4668_v59  ;;  %v1646_v31 = vrot.slane %v1632_v24, %v4668_v59  ;;  %v1453_v40 = vld [vmem:[#allocation2 + $0x8] sm:$0xff]  ;;  %v1455_v48 = vld [vmem:[#allocation2 + $0x18] sm:$0xff] }
 0x278   : > { %v1691_v32 = vrot.slane %v1683_v22, %v4668_v59  ;;  %v1698_v33 = vrot.slane %v1684_v23, %v4668_v59  ;;  %v1707_v34 = vrot.slane %v1699_v26, %v4668_v59  ;;  %v1714_v35 = vrot.slane %v1700_v27, %v4668_v59  ;;  %v1457_v60 = vld [vmem:[#allocation2 + $0x28] sm:$0xff]  ;;  %v1459_v2 = vld [vmem:[#allocation2 + $0x38] sm:$0xff]  ;;  %v3498_v27 = vpop.f32.mrb[0].mxu1 }
 0x279   : > { %v1719_v36 = vcombine.low %v1623_v28, %v1630_v29  ;;  %v3368_v37 = vcombine.high %v1623_v28, %v1630_v29  ;;  %v1735_v38 = vcombine.low %v1639_v30, %v1646_v31  ;;  %v3369_v39 = vcombine.high %v1639_v30, %v1646_v31  ;;  %v1452_v46 = vld [vmem:[#allocation2] sm:$0xff]  ;;  %v1454_v47 = vld [vmem:[#allocation2 + $0x10] sm:$0xff]  ;;  %v842_v28 = vpop.f32.mrb[1].mxu1 }
 0x27a   : > { %v1787_v41 = vcombine.low %v1691_v32, %v1698_v33  ;;  %v3370_v42 = vcombine.high %v1691_v32, %v1698_v33  ;;  %v1803_v43 = vcombine.low %v1707_v34, %v1714_v35  ;;  %v3371_v44 = vcombine.high %v1707_v34, %v1714_v35  ;;  %v1456_v58 = vld [vmem:[#allocation2 + $0x20] sm:$0xff]  ;;  %v1458_v1 = vld [vmem:[#allocation2 + $0x30] sm:$0xff] }
 0x27b   : > { %v1726_v49 = vrot.slane %v1719_v36, %v4662_v45  ;;  %v1734_v50 = vrot.slane %v3368_v37, %v4662_v45  ;;  %v1742_v51 = vrot.slane %v1735_v38, %v4662_v45  ;;  %v1750_v52 = vrot.slane %v3369_v39, %v4662_v45  ;;  %v3418_v29 = vld [vmem:[%s4597_s27] sm:$0xf]  }
 0x27c   : > { %v1794_v53 = vrot.slane %v1787_v41, %v4662_v45  ;;  %v1802_v54 = vrot.slane %v3370_v42, %v4662_v45  ;;  %v1810_v55 = vrot.slane %v1803_v43, %v4662_v45  ;;  %v1818_v56 = vrot.slane %v3371_v44, %v4662_v45 }
 0x27d   : > { %v1751_v61 = vcombine.low %v1726_v49, %v1734_v50  ;;  %v1767_v62 = vcombine.low %v1742_v51, %v1750_v52  ;;  %v3601_v63 = vpack.c.bf16 %v1453_v40, %v1452_v46  ;;  %v3607_v0 = vpack.c.bf16 %v1455_v48, %v1454_v47 }
 0x27e   : > { %v1819_v3 = vcombine.low %v1794_v53, %v1802_v54  ;;  %v1835_v4 = vcombine.low %v1810_v55, %v1818_v56  ;;  %v3613_v9 = vpack.c.bf16 %v1457_v60, %v1456_v58  ;;  %v3619_v10 = vpack.c.bf16 %v1459_v2, %v1458_v1 }
 0x27f   : > { %v1759_v5 = vrot.slane %v1751_v61, %v4668_v59  ;;  %v1775_v8 = vrot.slane %v1767_v62, %v4668_v59  ;;  %3603 = vmatprep.subr.msk.bf16.mxu1 %vm4746_vm2, %v3601_v63  ;;  %3609 = vmatprep.subr.msk.bf16.mxu0 %vm4746_vm2, %v3607_v0  ;;  %v1752_v7 = vcombine.high %v1726_v49, %v1734_v50  ;;  %v3420_v30 = vunpack.c.1.s8 %v3418_v29 }
 0x280   : > { %3606 = vmatpush3.bf16.xpose.msk.msra.mxu1 %vm4746_vm2, %v3601_v63  ;;  %3612 = vmatpush3.bf16.xpose.msk.msra.mxu0 %vm4746_vm2, %v3607_v0  ;;  %v1827_v11 = vrot.slane %v1819_v3, %v4668_v59  ;;  %v1843_v12 = vrot.slane %v1835_v4, %v4668_v59  ;;  %v1768_v14 = vcombine.high %v1742_v51, %v1750_v52  ;;  %v3419_v31 = vunpack.c.0.s8 %v3418_v29  ;;  %v3354_v52 = vld [vmem:[%s5211_s10] ss:$0 sm:$0xff] }
 0x281   : > { %v1783_v25 = vcombine.low %v1759_v5, %v1775_v8  ;;  %v1784_v13 = vcombine.high %v1759_v5, %v1775_v8  ;;  %3615 = vmatprep.subr.msk.bf16.mxu1 %vm4746_vm2, %v3613_v9  ;;  %3621 = vmatprep.subr.msk.bf16.mxu0 %vm4746_vm2, %v3619_v10  ;;  %v1766_v15 = vrot.slane %v1752_v7, %v4668_v59  ;;  %vm4783_vm3 = vcmp.eq.s32.totalorder %v3420_v30, 0 }
 0x282   : > { %v1782_v16 = vrot.slane %v1768_v14, %v4668_v59  ;;  %v1820_v17 = vcombine.high %v1794_v53, %v1802_v54  ;;  %v1836_v18 = vcombine.high %v1810_v55, %v1818_v56  ;;  %v1851_v6 = vcombine.low %v1827_v11, %v1843_v12 }
 0x283   : > { %3514 = vmatprep.mubr.msk.f32.mxu1 %vm1435_vm1, %v1783_v25  ;;  %3521 = vmatprep.mubr.msk.f32.mxu0 %vm1435_vm1, %v1784_v13  ;;  %v1852_v19 = vcombine.high %v1827_v11, %v1843_v12  ;;  %vm4787_vm4 = vcmp.eq.s32.totalorder %v3419_v31, 0  ;;  %v843_v55 = vadd.f32 %v3354_v52, %v842_v28  ;;  %v4823_v57 = vadd.f32 %v3498_v27, %v3354_v52 }
 0x284   : > { %v1785_v20 = vcombine.low %v1766_v15, %v1782_v16  ;;  %v1786_v21 = vcombine.high %v1766_v15, %v1782_v16  ;;  %v1834_v24 = vrot.slane %v1820_v17, %v4668_v59  ;;  %v1850_v22 = vrot.slane %v1836_v18, %v4668_v59 }
 0x286   : > { %v1853_v23 = vcombine.low %v1834_v24, %v1850_v22  ;;  %v1854_v26 = vcombine.high %v1834_v24, %v1850_v22 }
 0x287   : > { %3515 = vmatmul.mubr.msk.f32.vlgmr.msra.gmra.mrb[2].mxu1 %vm1435_vm1, %v1851_v6  ;;  %3522 = vmatmul.mubr.msk.f32.vlgmr.msra.gmra.mrb[4].mxu0 %vm1435_vm1, %v1852_v19 }
 0x288   : > { %3618 = vmatpush3.bf16.xpose.msk.msra.mxu1 %vm4746_vm2, %v3613_v9  ;;  %3528 = vmatprep.mubr.msk.f32.mxu1 %vm1435_vm1, %v1785_v20 }
 0x289   : > { %3624 = vmatpush3.bf16.xpose.msk.msra.mxu0 %vm4746_vm2, %v3619_v10  ;;  %3535 = vmatprep.mubr.msk.f32.mxu0 %vm1435_vm1, %v1786_v21 }
 0x28f   : > { %3529 = vmatmul.mubr.msk.f32.vlgmr.msra.gmra.mrb[4].mxu1 %vm1435_vm1, %v1853_v23 }
 0x290   : > { %3536 = vmatmul.mubr.msk.f32.vlgmr.msra.gmra.mrb[6].mxu0 %vm1435_vm1, %v1854_v26 }
 0x35a   : > { %v3516_v34 = vpop.f32.mrb[2].mxu1  ;;  %v3523_v35 = vpop.f32.mrb[4].mxu0 }
 0x35b   : > { %v2215_v36 = vsel %vm4783_vm3, -1e+10, %v3516_v34  ;;  %v1934_v37 = vpop.f32.mrb[3].mxu1  ;;  %v2021_v38 = vpop.f32.mrb[5].mxu0  ;;  %v4802_v44 = vsel %vm4783_vm3, -1e+10, %v3523_v35 }
 0x35c   : > { %v2214_v39 = vsel %vm4787_vm4, -1e+10, %v1934_v37  ;;  %v2226_v40 = vsel %vm2222_vm5, %v2215_v36, -inf  ;;  %v2216_v42 = vsel %vm4787_vm4, -1e+10, %v2021_v38  ;;  %v2232_v50 = vsel %vm2222_vm5, %v4802_v44, -inf }
 0x35d   : > { %2227 = vmax.xlane.f32.xlu1 %v2226_v40  ;;  %v2223_v41 = vsel %vm2222_vm5, %v2214_v39, -inf  ;;  %v2229_v43 = vsel %vm2222_vm5, %v2216_v42, -inf }
 0x35e   : > { %2224 = vmax.xlane.f32.xlu0 %v2223_v41 }
 0x362   : > { %2230 = vmax.xlane.f32.xlu0 %v2229_v43  ;;  %v3530_v46 = vpop.f32.mrb[4].mxu1 }
 0x363   : > { %v3537_v47 = vpop.f32.mrb[6].mxu0  ;;  %v2108_v48 = vpop.f32.mrb[5].mxu1  ;;  %v4808_v51 = vsel %vm4783_vm3, -1e+10, %v3530_v46 }
 0x364   : > { %v2195_v49 = vpop.f32.mrb[7].mxu0  ;;  %v2238_v53 = vsel %vm2222_vm5, %v4808_v51, -inf  ;;  %v4817_v54 = vsel %vm4783_vm3, -1e+10, %v3537_v47  ;;  %v4830_v58 = vsel %vm4787_vm4, -1e+10, %v2108_v48 }
 0x365   : > { %v2244_v56 = vsel %vm2222_vm5, %v4817_v54, -inf  ;;  %v2235_v60 = vsel %vm2222_vm5, %v4830_v58, -inf  ;;  %v4836_v61 = vsel %vm4787_vm4, -1e+10, %v2195_v49 }
 0x366   : > { %2233 = vmax.xlane.f32.xlu0 %v2232_v50  ;;  %v2241_v62 = vsel %vm2222_vm5, %v4836_v61, -inf }
 0x36a   : > { %2239 = vmax.xlane.f32.xlu0 %v2238_v53 }
 0x36e   : > { %1145 = vrot.lane.b32.xlu1 %v843_v55, %s4155_s15  ;;  %2245 = vmax.xlane.f32.xlu0 %v2244_v56 }
 0x372   : > { %1151 = vrot.lane.b32.xlu1 %v843_v55, %s4154_s28 }
 0x384   : > { %1147 = vrot.lane.b32.xlu0 %v4823_v57, %s4155_s15  ;;  %s5213_s15 = sld [smem:[#allocation28_spill]] }
 0x388   : > { %1157 = vrot.lane.b32.xlu0 %v843_v55, %s4156_s22 }
 0x38a   : > { %s3416_s6 = sshll.u32 %s5213_s15, 10 }
 0x38b   : > { %s5022_s10 = scalar_lea.hbm %s5215_s19, %s3416_s6 }
 0x396   : > { %2236 = vmax.xlane.f32.xlu1 %v2235_v60 }
 0x39a   : > { %2242 = vmax.xlane.f32.xlu1 %v2241_v62 }
 0x3ab   : > { %1153 = vrot.lane.b32.xlu1 %v4823_v57, %s4154_s28  ;;  %s4161_s28 = smov 24  }
 0x3ea   : > { %v2228_v63 = vpop.xlane.xlu1 %2227 }
 0x3eb   : > { %v2248_v0 = vsub.f32 %v2215_v36, %v2228_v63  ;;  %v2225_v1 = vpop.xlane.xlu0 %2224 }
 0x3ec   : > { %v2247_v2 = vsub.f32 %v2214_v39, %v2225_v1 }
 0x3ed   : > { %v2257_v3 = vmul.f32 1.442695, %v2248_v0 }
 0x3ee   : > { %v2255_v4 = vmul.f32 1.442695, %v2247_v2  ;;  %v1146_v25 = vpop.permute.xlu1 %1145 }
 0x3ef   : > { %3775 = vpow2.f32 %v2257_v3  ;;  %v2231_v5 = vpop.xlane.xlu0 %2230 }
 0x3f0   : > { %3777 = vpow2.f32 %v2255_v4  ;;  %v2249_v8 = vsub.f32 %v2216_v42, %v2231_v5 }
 0x3f2   : > { %v2259_v9 = vmul.f32 1.442695, %v2249_v8  ;;  %v1152_v17 = vpop.permute.xlu1 %1151 }
 0x3f3   : > { %v2234_v10 = vpop.xlane.xlu0 %2233  ;;  %v1163_v19 = vcombine.low %v843_v55, %v1152_v17  ;;  %v1164_v20 = vcombine.high %v843_v55, %v1152_v17 }
 0x3f4   : > { %3779 = vpow2.f32 %v2259_v9  ;;  %v2250_v1 = vsub.f32 %v4802_v44, %v2234_v10 }
 0x3f5   : > { %v1171_v23 = vrot.slane %v1163_v19, %v4662_v45  ;;  %v1178_v26 = vrot.slane %v1164_v20, %v4662_v45 }
 0x3f6   : > { %v2261_v2 = vmul.f32 1.442695, %v2250_v1 }
 0x3f7   : > { %v2240_v11 = vpop.xlane.xlu0 %2239 }
 0x3f8   : > { %v2252_v3 = vsub.f32 %v4808_v51, %v2240_v11  ;;  %3781 = vpow2.f32 %v2261_v2 }
 0x3f9   : > { %v4842_v12 = vpop.eup %3775 }
 0x3fa   : > { %v4844_v13 = vpop.eup %3777  ;;  %v2274_v7 = vsel %vm2222_vm5, %v4842_v12, 0.0  ;;  %v2265_v8 = vmul.f32 1.442695, %v2252_v3 }
 0x3fb   : > { %2275 = vadd.xlane.f32.xlu0 %v2274_v7  ;;  %v4848_v14 = vpop.xlane.xlu0 %2245  ;;  %v2271_v15 = vsel %vm2222_vm5, %v4844_v13, 0.0 }
 0x3fc   : > { %2272 = vadd.xlane.f32.xlu1 %v2271_v15  ;;  %v2254_v9 = vsub.f32 %v4817_v54, %v4848_v14 }
 0x3fe   : > { %v4852_v16 = vpop.eup %3779  ;;  %v2269_v17 = vmul.f32 1.442695, %v2254_v9 }
 0x3ff   : > { %v4854_v18 = vpop.permute.xlu0 %1147  ;;  %v2277_v6 = vsel %vm2222_vm5, %v4852_v16, 0.0 }
 0x400   : > { %2278 = vadd.xlane.f32.xlu0 %v2277_v6 }
 0x402   : > { %v4886_v44 = vpop.eup %3781 }
 0x403   : > { %v1158_v21 = vpop.permute.xlu0 %1157  ;;  %v2280_v51 = vsel %vm2222_vm5, %v4886_v44, 0.0 }
 0x404   : > { %v1179_v24 = vcombine.low %v1146_v25, %v1158_v21  ;;  %v1180_v22 = vcombine.high %v1146_v25, %v1158_v21 }
 0x406   : > { %v1187_v27 = vrot.slane %v1179_v24, %v4662_v45  ;;  %v1194_v28 = vrot.slane %v1180_v22, %v4662_v45 }
 0x408   : > { %v1195_v29 = vcombine.low %v1171_v23, %v1187_v27  ;;  %v1196_v30 = vcombine.high %v1171_v23, %v1187_v27  ;;  %v1211_v31 = vcombine.low %v1178_v26, %v1194_v28  ;;  %v1212_v32 = vcombine.high %v1178_v26, %v1194_v28 }
 0x40a   : > { %v1203_v33 = vrot.slane %v1195_v29, %v4668_v59  ;;  %v1210_v34 = vrot.slane %v1196_v30, %v4668_v59  ;;  %v1219_v35 = vrot.slane %v1211_v31, %v4668_v59  ;;  %v1226_v36 = vrot.slane %v1212_v32, %v4668_v59 }
 0x40c   : > { %v1299_v37 = vcombine.low %v1203_v33, %v1210_v34  ;;  %v3361_v38 = vcombine.high %v1203_v33, %v1210_v34  ;;  %v1315_v39 = vcombine.low %v1219_v35, %v1226_v36  ;;  %v3362_v40 = vcombine.high %v1219_v35, %v1226_v36 }
 0x40d   : > { %1159 = vrot.lane.b32.xlu1 %v4823_v57, %s4156_s22 }
 0x40e   : > { %v1306_v41 = vrot.slane %v1299_v37, %v4662_v45  ;;  %v1314_v42 = vrot.slane %v3361_v38, %v4662_v45  ;;  %v1322_v43 = vrot.slane %v1315_v39, %v4662_v45  ;;  %v1330_v46 = vrot.slane %v3362_v40, %v4662_v45 }
 0x410   : > { %v1331_v47 = vcombine.low %v1306_v41, %v1314_v42  ;;  %v1332_v48 = vcombine.high %v1306_v41, %v1314_v42  ;;  %v1347_v49 = vcombine.low %v1322_v43, %v1330_v46  ;;  %v1348_v50 = vcombine.high %v1322_v43, %v1330_v46 }
 0x412   : > { %v1339_v52 = vrot.slane %v1331_v47, %v4668_v59  ;;  %v1346_v53 = vrot.slane %v1332_v48, %v4668_v59  ;;  %v1355_v55 = vrot.slane %v1347_v49, %v4668_v59  ;;  %v1362_v56 = vrot.slane %v1348_v50, %v4668_v59 }
 0x414   : > { %v1363_v60 = vcombine.low %v1339_v52, %v1355_v55  ;;  %v1364_v62 = vcombine.high %v1339_v52, %v1355_v55  ;;  %v1365_v63 = vcombine.low %v1346_v53, %v1362_v56  ;;  %v1366_v0 = vcombine.high %v1346_v53, %v1362_v56 }
 0x416   : > { %1444 = vst.msk [vmem:[#allocation3] sm:$0xff] %vm1435_vm1, %v1363_v60  ;;  %1446 = vst.msk [vmem:[#allocation3 + $0x10] sm:$0xff] %vm1435_vm1, %v1364_v62 }
 0x417   : > { %1448 = vst.msk [vmem:[#allocation3 + $0x20] sm:$0xff] %vm1435_vm1, %v1365_v63  ;;  %1450 = vst.msk [vmem:[#allocation3 + $0x30] sm:$0xff] %vm1435_vm1, %v1366_v0 }
 0x423   : > { %v2237_v4 = vpop.xlane.xlu1 %2236 }
 0x424   : > { %v2251_v5 = vsub.f32 %v4830_v58, %v2237_v4 }
 0x426   : > { %v2263_v25 = vmul.f32 1.442695, %v2251_v5 }
 0x427   : > { %v2243_v7 = vpop.xlane.xlu1 %2242 }
 0x428   : > { %3783 = vpow2.f32 %v2263_v25  ;;  %v2253_v15 = vsub.f32 %v4836_v61, %v2243_v7 }
 0x429   : > { %3785 = vpow2.f32 %v2265_v8 }
 0x42a   : > { %v2267_v6 = vmul.f32 1.442695, %v2253_v15 }
 0x42b   : > { %v1154_v21 = vpop.permute.xlu1 %1153 }
 0x42c   : > { %3787 = vpow2.f32 %v2267_v6  ;;  %v1231_v23 = vcombine.low %v4823_v57, %v1154_v21  ;;  %v1232_v26 = vcombine.high %v4823_v57, %v1154_v21  ;;  %v1460_v21 = vld [vmem:[#allocation3] sm:$0xff] }
 0x42d   : > { %3789 = vpow2.f32 %v2269_v17 }
 0x42e   : > { %v1239_v31 = vrot.slane %v1231_v23, %v4662_v45  ;;  %v1246_v32 = vrot.slane %v1232_v26, %v4662_v45  ;;  %v1462_v26 = vld [vmem:[#allocation3 + $0x10] sm:$0xff] }
 0x431   : > { %2281 = vadd.xlane.f32.xlu1 %v2280_v51 }
 0x432   : > { %v4890_v58 = vpop.eup %3783 }
 0x433   : > { %v2283_v54 = vsel %vm2222_vm5, %v4890_v58, 0.0  ;;  %v4894_v10 = vpop.eup %3785 }
 0x434   : > { %2284 = vadd.xlane.f32.xlu0 %v2283_v54  ;;  %v2286_v11 = vsel %vm2222_vm5, %v4894_v10, 0.0 }
 0x436   : > { %v4896_v61 = vpop.eup %3787 }
 0x437   : > { %v2289_v14 = vsel %vm2222_vm5, %v4896_v61, 0.0  ;;  %v4902_v19 = vpop.eup %3789 }
 0x438   : > { %2287 = vadd.xlane.f32.xlu0 %v2286_v11  ;;  %2290 = vadd.xlane.f32.xlu1 %v2289_v14  ;;  %v2292_v20 = vsel %vm2222_vm5, %v4902_v19, 0.0 }
 0x43c   : > { %2293 = vadd.xlane.f32.xlu0 %v2292_v20 }
 0x488   : > { %v2276_v24 = vpop.xlane.xlu0 %2275 }
 0x489   : > { %3791 = vrcp.f32 %v2276_v24  ;;  %v2273_v22 = vpop.xlane.xlu1 %2272 }
 0x48a   : > { %3793 = vrcp.f32 %v2273_v22 }
 0x48d   : > { %v2279_v27 = vpop.xlane.xlu0 %2278  ;;  %v1160_v28 = vpop.permute.xlu1 %1159 }
 0x48e   : > { %3795 = vrcp.f32 %v2279_v27  ;;  %v1247_v29 = vcombine.low %v4854_v18, %v1160_v28  ;;  %v1248_v30 = vcombine.high %v4854_v18, %v1160_v28  ;;  %v1464_v28 = vld [vmem:[#allocation3 + $0x20] sm:$0xff] }
 0x490   : > { %v1255_v33 = vrot.slane %v1247_v29, %v4662_v45  ;;  %v1262_v34 = vrot.slane %v1248_v30, %v4662_v45 }
 0x492   : > { %v1263_v35 = vcombine.low %v1239_v31, %v1255_v33  ;;  %v1264_v36 = vcombine.high %v1239_v31, %v1255_v33  ;;  %v1279_v37 = vcombine.low %v1246_v32, %v1262_v34  ;;  %v1280_v57 = vcombine.high %v1246_v32, %v1262_v34 }
 0x493   : > { %v3792_v38 = vpop.eup %3791 }
 0x494   : > { %v3794_v39 = vpop.eup %3793  ;;  %v2304_v40 = vmul.f32 %v3792_v38, %v2276_v24  ;;  %v1271_v41 = vrot.slane %v1263_v35, %v4668_v59  ;;  %v1278_v18 = vrot.slane %v1264_v36, %v4668_v59  ;;  %v1287_v42 = vrot.slane %v1279_v37, %v4668_v59 }
 0x495   : > { %v2303_v43 = vmul.f32 %v3794_v39, %v2273_v22  ;;  %v1294_v46 = vrot.slane %v1280_v57, %v4668_v59 }
 0x496   : > { %v2312_v47 = vsub.f32 2.0, %v2304_v40  ;;  %v1367_v48 = vcombine.low %v1271_v41, %v1278_v18  ;;  %v3363_v49 = vcombine.high %v1271_v41, %v1278_v18 }
 0x497   : > { %v2311_v50 = vsub.f32 2.0, %v2303_v43  ;;  %v1383_v52 = vcombine.low %v1287_v42, %v1294_v46  ;;  %v3364_v53 = vcombine.high %v1287_v42, %v1294_v46 }
 0x498   : > { %v3796_v55 = vpop.eup %3795  ;;  %v2320_v56 = vmul.f32 %v3792_v38, %v2312_v47  ;;  %v1374_v60 = vrot.slane %v1367_v48, %v4662_v45  ;;  %v1382_v62 = vrot.slane %v3363_v49, %v4662_v45  ;;  %v1466_v48 = vld [vmem:[#allocation3 + $0x30] sm:$0xff] }
 0x499   : > { %v2319_v63 = vmul.f32 %v3794_v39, %v2311_v50  ;;  %v2305_v0 = vmul.f32 %v3796_v55, %v2279_v27  ;;  %v1390_v1 = vrot.slane %v1383_v52, %v4662_v45  ;;  %v1398_v2 = vrot.slane %v3364_v53, %v4662_v45 }
 0x49a   : > { %v2328_v3 = vmul.f32 %v4842_v12, %v2320_v56  ;;  %v1399_v4 = vcombine.low %v1374_v60, %v1382_v62  ;;  %v1400_v5 = vcombine.high %v1374_v60, %v1382_v62 }
 0x49b   : > { %v2327_v8 = vmul.f32 %v4844_v13, %v2319_v63  ;;  %v2313_v9 = vsub.f32 2.0, %v2305_v0  ;;  %v1415_v25 = vcombine.low %v1390_v1, %v1398_v2  ;;  %v1416_v7 = vcombine.high %v1390_v1, %v1398_v2 }
 0x49c   : > { %2336 = vst.msk [vmem:[%s4925_s13 + $0x8] sm:$0xff] %vm2222_vm5, %v2328_v3  ;;  %v1407_v15 = vrot.slane %v1399_v4, %v4668_v59  ;;  %v1414_v17 = vrot.slane %v1400_v5, %v4668_v59 }
 0x49d   : > { %2335 = vst.msk [vmem:[%s4925_s13] sm:$0xff] %vm2222_vm5, %v2327_v8  ;;  %v2321_v12 = vmul.f32 %v3796_v55, %v2313_v9  ;;  %v1423_v6 = vrot.slane %v1415_v25, %v4668_v59  ;;  %v1430_v13 = vrot.slane %v1416_v7, %v4668_v59  ;;  %3542 = vmatprep.mubr.msk.f32.mxu1 %vm2222_vm5, %v2327_v8 }
 0x49f   : > { %v2329_v51 = vmul.f32 %v4852_v16, %v2321_v12  ;;  %v1431_v54 = vcombine.low %v1407_v15, %v1423_v6  ;;  %v1432_v11 = vcombine.high %v1407_v15, %v1423_v6  ;;  %v1433_v14 = vcombine.low %v1414_v17, %v1430_v13 }
 0x4a0   : > { %v1434_v20 = vcombine.high %v1414_v17, %v1430_v13 }
 0x4a1   : > { %2337 = vst.msk [vmem:[%s4925_s13 + $0x10] sm:$0xff] %vm2222_vm5, %v2329_v51 }
 0x4a2   : > { %1445 = vst.msk [vmem:[#allocation3 + $0x8] sm:$0xff] %vm1435_vm1, %v1431_v54  ;;  %1447 = vst.msk [vmem:[#allocation3 + $0x18] sm:$0xff] %vm1435_vm1, %v1432_v11 }
 0x4a3   : > { %1449 = vst.msk [vmem:[#allocation3 + $0x28] sm:$0xff] %vm1435_vm1, %v1433_v14  ;;  %1451 = vst.msk [vmem:[#allocation3 + $0x38] sm:$0xff] %vm1435_vm1, %v1434_v20 }
 0x4a9   : > { %v1461_v24 = vld [vmem:[#allocation3 + $0x8] sm:$0xff]  ;;  %v1463_v22 = vld [vmem:[#allocation3 + $0x18] sm:$0xff] }
 0x4aa   : > { %v3625_v23 = vpack.c.bf16 %v1461_v24, %v1460_v21  ;;  %v3629_v16 = vpack.c.bf16 %v1463_v22, %v1462_v26  ;;  %v1465_v27 = vld [vmem:[#allocation3 + $0x28] sm:$0xff]  ;;  %v1467_v41 = vld [vmem:[#allocation3 + $0x38] sm:$0xff] }
 0x4ab   : > { %v3633_v29 = vpack.c.bf16 %v1465_v27, %v1464_v28  ;;  %v3637_v50 = vpack.c.bf16 %v1467_v41, %v1466_v48 }
 0x4ac   : > { %3626 = vmatprep.subr.bf16.mxu1 %v3625_v23 }
 0x4ad   : > { %3628 = vmatpush3.bf16.msra.mxu1 %v3625_v23 }
 0x4ae   : > { %3630 = vmatprep.subr.bf16.mxu1 %v3629_v16 }
 0x4b0   : > { %3543 = vmatmul.mubr.msk.f32.vlgmr.msra.gmra.mrb[6].mxu1 %vm2222_vm5, %v2328_v3 }
 0x4b1   : > { %3632 = vmatpush3.bf16.msra.mxu1 %v3629_v16  ;;  %3549 = vmatprep.mubr.msk.f32.mxu1 %vm2222_vm5, %v2329_v51 }
 0x4b2   : > { %3634 = vmatprep.subr.bf16.mxu1 %v3633_v29 }
 0x4be   : > { %v2282_v30 = vpop.xlane.xlu1 %2281 }
 0x4bf   : > { %3797 = vrcp.f32 %v2282_v30 }
 0x4c1   : > { %v2285_v31 = vpop.xlane.xlu0 %2284 }
 0x4c2   : > { %3799 = vrcp.f32 %v2285_v31 }
 0x4c5   : > { %v2288_v32 = vpop.xlane.xlu0 %2287  ;;  %v2291_v33 = vpop.xlane.xlu1 %2290 }
 0x4c6   : > { %3801 = vrcp.f32 %v2288_v32 }
 0x4c7   : > { %3803 = vrcp.f32 %v2291_v33 }
 0x4c9   : > { %v3798_v34 = vpop.eup %3797  ;;  %v2294_v35 = vpop.xlane.xlu0 %2293 }
 0x4ca   : > { %v2306_v36 = vmul.f32 %v3798_v34, %v2282_v30  ;;  %3805 = vrcp.f32 %v2294_v35 }
 0x4cc   : > { %v3800_v37 = vpop.eup %3799  ;;  %v2314_v57 = vsub.f32 2.0, %v2306_v36 }
 0x4cd   : > { %v2307_v38 = vmul.f32 %v3800_v37, %v2285_v31 }
 0x4ce   : > { %v2322_v39 = vmul.f32 %v3798_v34, %v2314_v57 }
 0x4cf   : > { %v2315_v40 = vsub.f32 2.0, %v2307_v38 }
 0x4d0   : > { %v3802_v18 = vpop.eup %3801  ;;  %v2330_v42 = vmul.f32 %v4886_v44, %v2322_v39 }
 0x4d1   : > { %v3804_v43 = vpop.eup %3803  ;;  %v2323_v46 = vmul.f32 %v3800_v37, %v2315_v40  ;;  %v2308_v47 = vmul.f32 %v3802_v18, %v2288_v32 }
 0x4d2   : > { %2338 = vst.msk [vmem:[%s4925_s13 + $0x18] sm:$0xff] %vm2222_vm5, %v2330_v42  ;;  %v2309_v49 = vmul.f32 %v3804_v43, %v2291_v33  ;;  %3550 = vmatmul.mubr.msk.f32.vlgmr.msra.gmra.mrb[8].mxu1 %vm2222_vm5, %v2330_v42 }
 0x4d3   : > { %v2331_v52 = vmul.f32 %v4890_v58, %v2323_v46  ;;  %v2316_v53 = vsub.f32 2.0, %v2308_v47  ;;  %3636 = vmatpush3.bf16.msra.mxu1 %v3633_v29 }
 0x4d4   : > { %v3806_v55 = vpop.eup %3805  ;;  %v2317_v56 = vsub.f32 2.0, %v2309_v49  ;;  %3638 = vmatprep.subr.bf16.mxu1 %v3637_v50 }
 0x4d5   : > { %2339 = vst.msk [vmem:[%s4925_s13 + $0x20] sm:$0xff] %vm2222_vm5, %v2331_v52  ;;  %v2324_v44 = vmul.f32 %v3802_v18, %v2316_v53  ;;  %v2310_v60 = vmul.f32 %v3806_v55, %v2294_v35  ;;  %3556 = vmatprep.mubr.msk.f32.mxu1 %vm2222_vm5, %v2331_v52 }
 0x4d6   : > { %v2325_v62 = vmul.f32 %v3804_v43, %v2317_v56 }
 0x4d7   : > { %v2332_v63 = vmul.f32 %v4894_v10, %v2324_v44  ;;  %v2318_v0 = vsub.f32 2.0, %v2310_v60 }
 0x4d8   : > { %v2333_v1 = vmul.f32 %v4896_v61, %v2325_v62 }
 0x4d9   : > { %2340 = vst.msk [vmem:[%s4925_s13 + $0x28] sm:$0xff] %vm2222_vm5, %v2332_v63  ;;  %v2326_v58 = vmul.f32 %v3806_v55, %v2318_v0  ;;  %3557 = vmatmul.mubr.msk.f32.vlgmr.msra.gmra.mrb[10].mxu1 %vm2222_vm5, %v2332_v63 }
 0x4da   : > { %2341 = vst.msk [vmem:[%s4925_s13 + $0x30] sm:$0xff] %vm2222_vm5, %v2333_v1  ;;  %3640 = vmatpush3.bf16.msra.mxu1 %v3637_v50  ;;  %3563 = vmatprep.mubr.msk.f32.mxu1 %vm2222_vm5, %v2333_v1 }
 0x4db   : > { %v2334_v2 = vmul.f32 %v4902_v19, %v2326_v58 }
 0x4dd   : > { %2342 = vst.msk [vmem:[%s4925_s13 + $0x38] sm:$0xff] %vm2222_vm5, %v2334_v2  ;;  %3564 = vmatmul.mubr.msk.f32.vlgmr.msra.gmra.mrb[12].mxu1 %vm2222_vm5, %v2334_v2  ;;  %s4017_s13 = scalar_lea.vmem %s4016_s1, 2048 }
 0x4de   : > { %p4019_p13 = scmp.lt.s32.totalorder %s4017_s13, %s4011_s16 }
 0x4e0   : > { %p4020_p3 = por %p4019_p13, %p4018_p9 }
 0x4e2   : > { %p4021_p12 = pnand %p4020_p3, %p4014_p5 }
 0x583   : > { %v3544_v10 = vpop.f32.mrb[6].mxu1 }
 0x584   : > { %v2415_v3 = vpop.f32.mrb[7].mxu1 }
 0x5a5   : > { %v3551_v4 = vpop.f32.mrb[8].mxu1 }
 0x5a6   : > { %v2496_v61 = vpop.f32.mrb[9].mxu1 }
 0x5ac   : > { %v3558_v5 = vpop.f32.mrb[10].mxu1 }
 0x5ad   : > { %v2735_v8 = vcombine.low %v3544_v10, %v3558_v5  ;;  %v2736_v9 = vcombine.high %v3544_v10, %v3558_v5  ;;  %v2577_v25 = vpop.f32.mrb[11].mxu1 }
 0x5ae   : > { %v2667_v7 = vcombine.low %v2415_v3, %v2577_v25  ;;  %v2668_v15 = vcombine.high %v2415_v3, %v2577_v25 }
 0x5af   : > { %v2743_v54 = vrot.slane %v2735_v8, %v4662_v45  ;;  %v2750_v11 = vrot.slane %v2736_v9, %v4662_v45 }
 0x5b0   : > { %v3565_v17 = vpop.f32.mrb[12].mxu1  ;;  %v2675_v21 = vrot.slane %v2667_v7, %v4662_v45  ;;  %v2682_v24 = vrot.slane %v2668_v15, %v4662_v45  ;;  %v2970_v15 = vld [vmem:[%s5212_s5] sm:$0xff] }
 0x5b1   : > { %v2751_v12 = vcombine.low %v3551_v4, %v3565_v17  ;;  %v2752_v6 = vcombine.high %v3551_v4, %v3565_v17  ;;  %v2658_v13 = vpop.f32.mrb[13].mxu1  ;;  %v2971_v17 = vld [vmem:[%s5212_s5 + $0x8] sm:$0xff] }
 0x5b2   : > { %v2683_v51 = vcombine.low %v2496_v61, %v2658_v13  ;;  %v2684_v19 = vcombine.high %v2496_v61, %v2658_v13 }
 0x5b3   : > { %v2759_v14 = vrot.slane %v2751_v12, %v4662_v45  ;;  %v2766_v20 = vrot.slane %v2752_v6, %v4662_v45 }
 0x5b4   : > { %v2691_v22 = vrot.slane %v2683_v51, %v4662_v45  ;;  %v2698_v23 = vrot.slane %v2684_v19, %v4662_v45  ;;  %v2972_v19 = vld [vmem:[%s5212_s5 + $0x10] sm:$0xff] }
 0x5b5   : > { %v2767_v26 = vcombine.low %v2743_v54, %v2759_v14  ;;  %v2768_v16 = vcombine.high %v2743_v54, %v2759_v14  ;;  %v2783_v27 = vcombine.low %v2750_v11, %v2766_v20  ;;  %v2784_v28 = vcombine.high %v2750_v11, %v2766_v20 }
 0x5b6   : > { %v2699_v29 = vcombine.low %v2675_v21, %v2691_v22  ;;  %v2700_v30 = vcombine.high %v2675_v21, %v2691_v22  ;;  %v2715_v31 = vcombine.low %v2682_v24, %v2698_v23  ;;  %v2716_v32 = vcombine.high %v2682_v24, %v2698_v23 }
 0x5b7   : > { %v2775_v33 = vrot.slane %v2767_v26, %v4668_v59  ;;  %v2782_v34 = vrot.slane %v2768_v16, %v4668_v59  ;;  %v2791_v35 = vrot.slane %v2783_v27, %v4668_v59  ;;  %v2798_v36 = vrot.slane %v2784_v28, %v4668_v59 }
 0x5b8   : > { %v2707_v37 = vrot.slane %v2699_v29, %v4668_v59  ;;  %v2714_v57 = vrot.slane %v2700_v30, %v4668_v59  ;;  %v2723_v38 = vrot.slane %v2715_v31, %v4668_v59  ;;  %v2730_v39 = vrot.slane %v2716_v32, %v4668_v59 }
 0x5b9   : > { %v2871_v40 = vcombine.low %v2775_v33, %v2782_v34  ;;  %v3398_v41 = vcombine.high %v2775_v33, %v2782_v34  ;;  %v2887_v18 = vcombine.low %v2791_v35, %v2798_v36  ;;  %v3399_v42 = vcombine.high %v2791_v35, %v2798_v36 }
 0x5ba   : > { %v2803_v43 = vcombine.low %v2707_v37, %v2714_v57  ;;  %v3396_v46 = vcombine.high %v2707_v37, %v2714_v57  ;;  %v2819_v47 = vcombine.low %v2723_v38, %v2730_v39  ;;  %v3397_v48 = vcombine.high %v2723_v38, %v2730_v39 }
 0x5bb   : > { %v2878_v49 = vrot.slane %v2871_v40, %v4662_v45  ;;  %v2886_v50 = vrot.slane %v3398_v41, %v4662_v45  ;;  %v2894_v52 = vrot.slane %v2887_v18, %v4662_v45  ;;  %v2902_v53 = vrot.slane %v3399_v42, %v4662_v45 }
 0x5bc   : > { %v2810_v55 = vrot.slane %v2803_v43, %v4662_v45  ;;  %v2818_v56 = vrot.slane %v3396_v46, %v4662_v45  ;;  %v2826_v44 = vrot.slane %v2819_v47, %v4662_v45  ;;  %v2834_v60 = vrot.slane %v3397_v48, %v4662_v45 }
 0x5bd   : > { %v2904_v62 = vcombine.high %v2878_v49, %v2886_v50  ;;  %v2920_v63 = vcombine.high %v2894_v52, %v2902_v53  ;;  %v2903_v0 = vcombine.low %v2878_v49, %v2886_v50  ;;  %v2919_v1 = vcombine.low %v2894_v52, %v2902_v53 }
 0x5be   : > { %v2836_v58 = vcombine.high %v2810_v55, %v2818_v56  ;;  %v2852_v2 = vcombine.high %v2826_v44, %v2834_v60  ;;  %v2835_v10 = vcombine.low %v2810_v55, %v2818_v56  ;;  %v2851_v3 = vcombine.low %v2826_v44, %v2834_v60 }
 0x5bf   : > { %v2918_v4 = vrot.slane %v2904_v62, %v4668_v59  ;;  %v2934_v61 = vrot.slane %v2920_v63, %v4668_v59  ;;  %v2911_v5 = vrot.slane %v2903_v0, %v4668_v59  ;;  %v2927_v8 = vrot.slane %v2919_v1, %v4668_v59 }
 0x5c0   : > { %v2850_v9 = vrot.slane %v2836_v58, %v4668_v59  ;;  %v2866_v45 = vrot.slane %v2852_v2, %v4668_v59  ;;  %v2843_v25 = vrot.slane %v2835_v10, %v4668_v59  ;;  %v2859_v7 = vrot.slane %v2851_v3, %v4668_v59  ;;  %v2973_v59 = vld [vmem:[%s5212_s5 + $0x18] sm:$0xff] }
 0x5c1   : > { %v2937_v12 = vcombine.low %v2918_v4, %v2934_v61  ;;  %v2936_v6 = vcombine.high %v2911_v5, %v2927_v8  ;;  %v2938_v13 = vcombine.high %v2918_v4, %v2934_v61  ;;  %v2935_v51 = vcombine.low %v2911_v5, %v2927_v8 }
 0x5c2   : > { %v2870_v54 = vcombine.high %v2850_v9, %v2866_v45  ;;  %v2868_v11 = vcombine.high %v2843_v25, %v2859_v7  ;;  %v2869_v14 = vcombine.low %v2850_v9, %v2866_v45  ;;  %v2867_v20 = vcombine.low %v2843_v25, %v2859_v7 }
 0x5c3   : > { %2951 = vrot.lane.b32.xlu1 %v2937_v12, %s4159_s4  ;;  %2943 = vrot.lane.b32.xlu0 %v2936_v6, %s4160_s20  ;;  %v3641_v21 = vpack.c.bf16 %v2971_v17, %v2970_v15  ;;  %v3645_v24 = vpack.c.bf16 %v2973_v59, %v2972_v19 }
 0x5c5   : > { %3642 = vmatprep.subr.bf16.mxu0 %v3641_v21 }
 0x5c6   : > { %3644 = vmatpush3.bf16.msra.mxu0 %v3641_v21 }
 0x5c7   : > { %2957 = vrot.lane.b32.xlu0 %v2870_v54, %s4161_s28  ;;  %2941 = vrot.lane.b32.xlu1 %v2868_v11, %s4160_s20 }
 0x5c8   : > { %3646 = vmatprep.subr.bf16.mxu0 %v3645_v24 }
 0x5ca   : > { %3648 = vmatpush3.bf16.msra.mxu0 %v3645_v24 }
 0x5cb   : > { %2949 = vrot.lane.b32.xlu1 %v2869_v14, %s4159_s4 }
 0x5cf   : > { %2959 = vrot.lane.b32.xlu1 %v2938_v13, %s4161_s28 }
 0x635   : > { %v2952_v22 = vpop.permute.xlu1 %2951  ;;  %v2944_v23 = vpop.permute.xlu0 %2943 }
 0x636   : > { %v2964_v28 = vsel %vm1435_vm1, %v2935_v51, %v2944_v23 }
 0x637   : > { %v2966_v32 = vsel %vm2222_vm5, %v2964_v28, %v2952_v22 }
 0x639   : > { %v2942_v26 = vpop.permute.xlu1 %2941  ;;  %v2958_v29 = vpop.permute.xlu0 %2957 }
 0x63a   : > { %v2963_v16 = vsel %vm1435_vm1, %v2867_v20, %v2942_v26 }
 0x63d   : > { %v2950_v27 = vpop.permute.xlu1 %2949 }
 0x63e   : > { %v2965_v30 = vsel %vm2222_vm5, %v2963_v16, %v2950_v27 }
 0x63f   : > { %v2968_v31 = vsel %vm2967_vm6, %v2965_v30, %v2958_v29 }
 0x640   : > { %3574 = vmatprep.mubr.msk.f32.mxu0 %vm675_vm0, %v2968_v31 }
 0x641   : > { %v2960_v33 = vpop.permute.xlu1 %2959 }
 0x642   : > { %v2969_v34 = vsel %vm2967_vm6, %v2966_v32, %v2960_v33 }
 0x643   : > { %3575 = vmatmul.mubr.msk.f32.vlgmr.msra.gmra.mrb[8].mxu0 %vm675_vm0, %v2969_v34 }
 0x644   : > { %4024 = shalt.err (!%p4021_p12)
}
 0x645   : > { %s4025_s9 = scalar_lea.hbm %s5022_s10, 1024  ;;  %s4029_s27 = scalar_lea.hbm %s5215_s19, 2048 }
 0x646   : > { %p4026_p11 = scmp.ne.s32.totalorder %s5022_s10, %s4025_s9  ;;  %p4030_p0 = scmp.lt.u32.totalorder %s5022_s10, %s5215_s19 }
 0x647   : > { %p4031_p1 = scmp.lt.u32.totalorder %s4029_s27, %s4025_s9  ;;  %p4033_p7 = scmp.lt.u32.totalorder %s4025_s9, %s5022_s10 }
 0x648   : > { %p4027_p6 = pnand %p4026_p11, %p5216_p8 }
 0x649   : > { %p4032_p2 = por %p4031_p1, %p4030_p0 }
 0x64a   : > { %p4028_p4 = pneg %p4027_p6 }
 0x64b   : > { %p4034_p10 = por %p4033_p7, %p4032_p2 }
 0x64d   : > { %p4035_p5 = pnand %p4034_p10, %p4028_p4 }
 0x64f   : > { %4038 = shalt.err (!%p4035_p5)
}
 0x650   : > { %s4163_s28 = smov 128   ;;  %s5217_s11 = sld [smem:[#allocation41_spill]] }
 0x651   : > { %3670 = dma.vmem_to_hbm [thread:$0]  (%p5216_p8), %s5024_s12, 1024, %s5022_s10, %s3070_s24, %s4163_s28, %s4163_s28, %s4160_s20  }
 0x652   : > { %s646_s16 = scalar_lea.vmem [#allocation16], %s4581_s14  ;;  %s3415_s1 = sshll.u32 %s5213_s15, 8 }
 0x653   : > { %s3085_s21 = sshll.u32 %s646_s16, 4  ;;  %s5218_s12 = sld [smem:[#allocation42_spill]]  ;;  %s5058_s21 = int_to_ptr.vmem [resolvable:$true] %s3085_s21 }
 0x654   : > { %s3065_s14 = scalar_lea.sflag [#allocation6], %s4578_s23  ;;  %s4039_s15 = scalar_lea.vmem %s5058_s21, 256 }
 0x655   : > { %p4040_p9 = scmp.ne.s32.totalorder %s5058_s21, %s4039_s15  ;;  %s4164_s24 = smov [#allocation16]  }
 0x656   : > { %v3400_v35 = vld [vmem:[%s5217_s11] ss:$0 sm:$0xff]  ;;  %s4043_s7 = sshll.u32 %s4164_s24, 4  ;;  %s4044_s7 = int_to_ptr.vmem [resolvable:$false] %s4043_s7 }
 0x657   : > { %p4041_p13 = pnand %p4040_p9, %p5216_p8  ;;  %s4045_s25 = scalar_lea.vmem %s4044_s7, 512 }
 0x658   : > { %p4046_p12 = scmp.lt.s32.totalorder %s5058_s21, %s4044_s7  ;;  %p4047_p11 = scmp.lt.s32.totalorder %s4045_s25, %s4039_s15 }
 0x659   : > { %s5063_s10 = scalar_lea.hbm %s5218_s12, %s3415_s1  ;;  %p4042_p3 = pneg %p4041_p13 }
 0x65a   : > { %p4048_p6 = por %p4047_p11, %p4046_p12 }
 0x65c   : > { %p4049_p4 = pnand %p4048_p6, %p4042_p3 }
 0x716   : > { %v3576_v36 = vpop.f32.mrb[8].mxu0 }
 0x717   : > { %v3059_v37 = vadd.f32 %v3576_v36, %v3400_v35  ;;  %v3053_v57 = vpop.f32.mrb[9].mxu0 }
 0x718   : > { %v3054_v38 = vadd.f32 %v3400_v35, %v3053_v57 }
 0x719   : > { %3063 = vst.msk [vmem:[%s646_s16 + $0x8] sm:$0xff] %vm675_vm0, %v3059_v37 }
 0x71a   : > { %3062 = vst.msk [vmem:[%s646_s16] sm:$0xff] %vm675_vm0, %v3054_v38 }
 0x71b   : > { %4052 = shalt.err (!%p4049_p4)
}
 0x71c   : > { %s4053_s27 = scalar_lea.hbm %s5063_s10, 256  ;;  %s4057_s6 = scalar_lea.hbm %s5218_s12, 512 }
 0x71d   : > { %p4054_p0 = scmp.ne.s32.totalorder %s5063_s10, %s4053_s27  ;;  %p4058_p7 = scmp.lt.u32.totalorder %s5063_s10, %s5218_s12 }
 0x71e   : > { %p4059_p10 = scmp.lt.u32.totalorder %s4057_s6, %s4053_s27  ;;  %p4061_p9 = scmp.lt.u32.totalorder %s4053_s27, %s5063_s10 }
 0x71f   : > { %p4055_p1 = pnand %p4054_p0, %p5216_p8 }
 0x720   : > { %p4060_p5 = por %p4059_p10, %p4058_p7 }
 0x721   : > { %p4056_p2 = pneg %p4055_p1 }
 0x722   : > { %p4062_p13 = por %p4061_p9, %p4060_p5 }
 0x724   : > { %p4063_p3 = pnand %p4062_p13, %p4056_p2 }
 0x726   : > { %4066 = shalt.err (!%p4063_p3)
}
 0x727   : > { %3669 = dma.vmem_to_hbm [thread:$0]  (%p5216_p8), %s5058_s21, 256, %s5063_s10, %s3065_s14, %s4163_s28, %s4163_s28, %s4160_s20  }
 0x728 PF: > { %s5219_s16 = sld [smem:[#allocation26_spill]]  ;;  %s5220_s1 = sld [smem:[#allocation31_spill]] }
 0x729   : > { %p5222_p11 = scmp.ge.s32.totalorder %s4141_s30, 2 }
 0x72e   : > { %s3118_s13 = sand.u32 1, %s5219_s16   ;;  %p5221_p12 = scmp.ne.s32.totalorder %s5220_s1, 0 }
 0x72f   : > { %s3119_s9 = scalar_lea.sflag [#allocation6], %s3118_s13 }
 0x730   : > { %p3697_p6 = pnand %p5222_p11, %p5221_p12 }
 0x732   : > { %4112 = dma.done.wait (!%p3697_p6), %s3119_s9, 256  }
 0x733   : > { %4114 = vsyncadd (!%p3697_p6), %s3119_s9, 4294967040  ;;  %s3128_s17 = scalar_lea.sflag [#allocation18], %s3118_s13 }
 0x734   : > { %4116 = dma.done.wait (!%p3697_p6), %s3128_s17, 1024  }
 0x735   : > { %4118 = vsyncadd (!%p3697_p6), %s3128_s17, 4294966272  ;;  %s40_s30 = sadd.s32 1, %s4141_s30   ;;  %s5223_s23 = sld [smem:[#allocation27_spill]] }
 0x736   : > { %p37_p4 = scmp.ge.s32.totalorder %s40_s30, 4   ;;  %s5224_s27 = sld [smem:[#allocation33_spill]] }
 0x737   : > { %s5225_s20 = sld [smem:[#allocation32_spill]]  ;;  %s5226_s25 = smov %s4125_s26 }
 0x738   : > { %s5228_s28 = smov %s4137_s29  ;;  %39 = sbr.rel (!%p37_p4) target bundleno = 24 (0x18), region = 183 }
 0x73b   : > { %s5227_s26 = smov %s5223_s23 }
 0x73d   : > { %s5229_s29 = smov %s5225_s20 }
 0x73f   :  { %3133 = vsyncpa [#allocation5], 1 }
 0x740   :  { %3135 = vsyncpa [#allocation5 + $0x1], 1 }
 0x741   :  { %3136 = vsyncpa [#allocation8], 1 }
 0x742   :  { %3138 = vsyncpa [#allocation8 + $0x1], 1 }
 0x743   :  { %3139 = vsyncpa [#allocation11], 1 }
 0x744   :  { %3141 = vsyncpa [#allocation11 + $0x1], 1 }
 0x745   :  { %3142 = vsyncpa [#allocation14], 1 }
 0x746   :  { %3143 = vsyncpa [#allocation6], 1 }
 0x747   :  { %3145 = vsyncpa [#allocation6 + $0x1], 1 }
 0x748   :  { %3146 = vsyncpa [#allocation18], 1 }
 0x749   :  { %3148 = vsyncpa [#allocation18 + $0x1], 1 }

// kernel: tpu_custom_call.1
= control target key start
LH: loop header
LB: loop body
LE: loop exit
PB: predicated region body
PF: predicated region fallthrough
CT: control target
= control target key end

     0   :  { %s5117_s0 = inlined_call_operand.hbm [shape: f32[2,16,32], index: 0, kind: input, shape index: {}]   ;;  %s5118_s1 = inlined_call_operand.hbm [shape: f32[2,16,32], index: 1, kind: input, shape index: {}]   ;;  %s5119_s2 = inlined_call_operand.hbm [shape: f32[2,16,32], index: 2, kind: input, shape index: {}]   ;;  %s5120_s3 = inlined_call_operand.hbm [shape: s8[2,1,16,16], index: 3, kind: input, shape index: {}]   ;;  %s5121_s4 = inlined_call_operand.hbm [shape: f32[32,32], index: 4, kind: input, shape index: {}]   ;;  %s5122_s5 = inlined_call_operand.vmem [shape: f32[1,32], index: 5, kind: input, shape index: {}]   ;;  %s5123_s6 = inlined_call_operand.hbm [shape: f32[32,32], index: 6, kind: input, shape index: {}]   ;;  %s5124_s7 = inlined_call_operand.vmem [shape: f32[1,32], index: 7, kind: input, shape index: {}]   ;;  %s5125_s8 = inlined_call_operand.hbm [shape: f32[32,32], index: 8, kind: input, shape index: {}]   ;;  %s5126_s9 = inlined_call_operand.vmem [shape: f32[1,32], index: 9, kind: input, shape index: {}]   ;;  %s5127_s10 = inlined_call_operand.vmem [shape: f32[32,32], index: 10, kind: input, shape index: {}]   ;;  %s5128_s11 = inlined_call_operand.vmem [shape: f32[1,32], index: 11, kind: input, shape index: {}]   ;;  %s5129_s12 = inlined_call_operand.hbm [shape: f32[2,16,32], index: 12, kind: output, shape index: {0}]   ;;  %s5130_s13 = inlined_call_operand.hbm [shape: f32[2,4,16,16], index: 13, kind: output, shape index: {1}]  }
   0x1   :  { %5157 = sst [smem:[#allocation34_spill]] %s5118_s1 }
   0x2   :  { %5158 = sst [smem:[#allocation35_spill]] %s5121_s4 }
   0x3   :  { %5159 = sst [smem:[#allocation36_spill]] %s5122_s5 }
   0x4   :  { %5160 = sst [smem:[#allocation37_spill]] %s5123_s6 }
   0x5   :  { %5161 = sst [smem:[#allocation38_spill]] %s5124_s7 }
   0x6   :  { %5162 = sst [smem:[#allocation39_spill]] %s5126_s9 }
   0x7   :  { %5163 = sst [smem:[#allocation40_spill]] %s5127_s10 }
   0x8   :  { %5164 = sst [smem:[#allocation41_spill]] %s5128_s11 }
   0x9   :  { %5165 = sst [smem:[#allocation42_spill]] %s5129_s12 }
   0xa   :  { %5166 = sst [smem:[#allocation43_spill]] %s5130_s13 }
   0xb   :  { %19 = vsyncpa [#allocation5], 0 }
   0xc   :  { %21 = vsyncpa [#allocation5 + $0x1], 0 }
   0xd   :  { %22 = vsyncpa [#allocation8], 0 }
   0xe   :  { %24 = vsyncpa [#allocation8 + $0x1], 0 }
   0xf   :  { %25 = vsyncpa [#allocation11], 0 }
  0x10   :  { %27 = vsyncpa [#allocation11 + $0x1], 0 }
  0x11   :  { %28 = vsyncpa [#allocation14], 0 }
  0x12   :  { %29 = vsyncpa [#allocation6], 0 }
  0x13   :  { %31 = vsyncpa [#allocation6 + $0x1], 0 }
  0x14   :  { %32 = vsyncpa [#allocation18], 0 }
  0x15   :  { %34 = vsyncpa [#allocation18 + $0x1], 0  ;;  %s4235_s25 = smov 0   ;;  %s4237_s26 = smov 0  }
  0x16   :  { %s4239_s27 = smov 0   ;;  %s4241_s28 = smov 0  }
  0x17   :  { %s4243_s29 = smov 0   ;;  %s4245_s30 = smov 0  }
  0x18 LB: > { %5167 = sst [smem:[#allocation26_spill]] %s4121_s25  ;;  %s4266_s14 = sadd.s32 4294967295, %s4141_s30   ;;  %s4141_s30 = sphi %s4245_s30, %s40_s30   ;;  %s4137_s29 = sphi %s4243_s29, %s5229_s29   ;;  %s4133_s28 = sphi %s4241_s28, %s5228_s28   ;;  %s4129_s27 = sphi %s4239_s27, %s5224_s27   ;;  %s4125_s26 = sphi %s4237_s26, %s5227_s26   ;;  %s4121_s25 = sphi %s4235_s25, %s5226_s25  }
  0x19   : > { %5168 = sst [smem:[#allocation27_spill]] %s4129_s27  ;;  %s3323_s15 = sadd.s32 4294967294, %s4141_s30  }
  0x1a   : > { %5169 = sst [smem:[#allocation28_spill]] %s4133_s28  ;;  %p68_p0 = scmp.ne.s32.totalorder %s4129_s27, %s4125_s26 }
  0x1b   : > { %5170 = sst [smem:[#allocation29_spill]] %s4266_s14  ;;  %p69_p1 = scmp.eq.s32.totalorder %s4141_s30, 0 }
  0x1c   : > { %p74_p2 = scmp.ne.s32.totalorder %s4125_s26, %s4121_s25  ;;  %p5138_p3 = scmp.eq.s32.totalorder %s4266_s14, 0 }
  0x1d   : > { %p348_p4 = scmp.eq.s32.totalorder %s4266_s14, 1  ;;  %p4277_p5 = por %p69_p1, %p68_p0 }
  0x1e   : > { %p354_p6 = scmp.eq.s32.totalorder %s3323_s15, 1  ;;  %p4283_p7 = por %p5138_p3, %p74_p2 }
  0x1f   : > { %p4287_p8 = por %p348_p4, %p68_p0  ;;  %p3324_p10 = scmp.ge.s32.totalorder %s4141_s30, 1 }
  0x20   : > { %s5172_s18 = scalar_select %p4283_p7, 1, 0 }
  0x21   : > { %s5173_s19 = scalar_select %p4287_p8, 1, 0 }
  0x22   : > { %p4291_p9 = por %p354_p6, %p74_p2  ;;  %p389_p11 = scmp.lt.s32.totalorder %s4141_s30, 3 }
  0x23   : > { %5174 = sst [smem:[#allocation30_spill]] %s5173_s19  ;;  %s4143_s22 = smov [#allocation12]  }
  0x24   : > { %s5175_s20 = scalar_select %p4291_p9, 1, 0 }
  0x25   : > { %p4297_p12 = pnand %p3324_p10, %p389_p11  ;;  %s401_s23 = sshll.u32 %s4143_s22, 4  ;;  %s4301_s23 = int_to_ptr.vmem [resolvable:$true] %s401_s23 }
  0x26   : > { %5176 = sst [smem:[#allocation31_spill]] %s5175_s20  ;;  %s4144_s15 = smov [#allocation13]  }
  0x27   : > { %s5177_s21 = scalar_select %p4297_p12, 1, 0 }
  0x28   : > { %p3673_p13 = pneg %p4297_p12  ;;  %s417_s16 = sshll.u32 %s4144_s15, 4  ;;  %s4312_s16 = int_to_ptr.vmem [resolvable:$true] %s417_s16 }
  0x29   : > { %s5179_s4 = sld [smem:[#allocation35_spill]] }
  0x2a   : > { %p4308_p1 = pnand %p3673_p13, %p5138_p3 }
  0x2c   : > { %s5178_s24 = scalar_select %p4308_p1, 1, 0 }
  0x2d   : > { %p4323_p4 = pneg %p4308_p1 }
  0x2f   : > { %s3807_s22 = scalar_lea.hbm %s5179_s4, 512 }
  0x30   : > { %p3808_p2 = scmp.ne.s32.totalorder %s5179_s4, %s3807_s22  ;;  %p3814_p11 = scmp.lt.u32.totalorder %s3807_s22, %s5179_s4 }
  0x31   : > { %s5180_s19 = scalar_select %p4323_p4, 1, 0 }
  0x32   : > { %p3810_p6 = pnand %p4323_p4, %p3808_p2 }
  0x34   : > { %p3811_p10 = pneg %p3810_p6 }
  0x36   : > { %p3816_p13 = pnand %p3814_p11, %p3811_p10 }
  0x38   : > { %3819 = shalt.err (!%p3816_p13)
}
  0x39   : > { %s3820_s11 = scalar_lea.vmem %s4301_s23, 512  ;;  %p3828_p8 = scmp.lt.s32.totalorder %s4301_s23, %s4301_s23 }
  0x3a   : > { %p3821_p0 = scmp.ne.s32.totalorder %s4301_s23, %s3820_s11  ;;  %p3829_p7 = scmp.lt.s32.totalorder %s3820_s11, %s3820_s11 }
  0x3c   : > { %p3823_p3 = pnand %p3821_p0, %p4323_p4  ;;  %p3830_p2 = por %p3829_p7, %p3828_p8 }
  0x3e   : > { %p3824_p9 = pneg %p3823_p3 }
  0x40   : > { %p3831_p6 = pnand %p3830_p2, %p3824_p9 }
  0x42   : > { %3834 = shalt.err (!%p3831_p6)
}
  0x43   : > { %s5142_s12 = smov 128   ;;  %s5144_s13 = smov 8  }
  0x44   : > { %3676 = dma.hbm_to_vmem [thread:$0]  (!%p4308_p1), %s5179_s4, 512, %s4301_s23, [#allocation11], %s5142_s12, %s5142_s12, %s5144_s13  }
  0x45   : > { %s5181_s6 = sld [smem:[#allocation37_spill]] }
  0x4b   : > { %s3835_s11 = scalar_lea.hbm %s5181_s6, 512 }
  0x4c   : > { %p3836_p3 = scmp.ne.s32.totalorder %s5181_s6, %s3835_s11  ;;  %p3842_p9 = scmp.lt.u32.totalorder %s3835_s11, %s5181_s6 }
  0x4e   : > { %p3838_p7 = pnand %p3836_p3, %p4323_p4 }
  0x50   : > { %p3839_p8 = pneg %p3838_p7 }
  0x52   : > { %p3844_p0 = pnand %p3842_p9, %p3839_p8 }
  0x54   : > { %3847 = shalt.err (!%p3844_p0)
}
  0x55   : > { %s3848_s23 = scalar_lea.vmem %s4312_s16, 512  ;;  %p3856_p2 = scmp.lt.s32.totalorder %s4312_s16, %s4312_s16 }
  0x56   : > { %p3849_p10 = scmp.ne.s32.totalorder %s4312_s16, %s3848_s23  ;;  %p3857_p6 = scmp.lt.s32.totalorder %s3848_s23, %s3848_s23 }
  0x58   : > { %p3851_p11 = pnand %p3849_p10, %p4323_p4  ;;  %p3858_p3 = por %p3857_p6, %p3856_p2 }
  0x5a   : > { %p3852_p13 = pneg %p3851_p11 }
  0x5c   : > { %p3859_p7 = pnand %p3858_p3, %p3852_p13 }
  0x5e   : > { %3862 = shalt.err (!%p3859_p7)
}
  0x5f   : > { %3679 = dma.hbm_to_vmem [thread:$0]  (!%p4308_p1), %s5181_s6, 512, %s4312_s16, [#allocation14], %s5142_s12, %s5142_s12, %s5144_s13  }
  0x60   : > { %s5182_s10 = sadd.s32 1, %s4137_s29  ;;  %p3706_p9 = scmp.lt.s32.totalorder %s4141_s30, 2 }
  0x61   : > { %p54_p8 = scmp.ge.s32.totalorder %s5182_s10, 2  ;;  %s4377_s20 = sand.u32 1, %s4129_s27  }
  0x62   : > { %s4380_s25 = sshll.u32 %s4137_s29, 8  ;;  %s5183_s28 = smov %s5182_s10 }
  0x63   : > { %s5231_s28 = smov (%p54_p8, %s5183_s28), 0  ;;  %s4387_s22 = sshll.u32 %s4377_s20, 4 }
  0x64   : > { %5184 = sst [smem:[#allocation32_spill]] %s5231_s28  ;;  %p4391_p0 = pnand %p3706_p9, %p4277_p5 }
  0x65   : > { %s56_s15 = ssub.s32 %s4137_s29, %s5231_s28  ;;  %s5147_s11 = sand.u32 1, %s4141_s30  }
  0x66   : > { %s5185_s16 = scalar_select %p4391_p0, 1, 0 }
  0x67   : > { %p59_p10 = scmp.eq.s32.totalorder %s56_s15, 0  ;;  %s5186_s23 = sadd.s32 1, %s4129_s27 }
  0x68   : > { %s5188_s1 = sld [smem:[#allocation34_spill]]  ;;  %s483_s17 = scalar_lea.vmem [#allocation7], %s4387_s22 }
  0x69   : > { %s4401_s5 = scalar_select %p59_p10, %s4129_s27, %s5186_s23  }
  0x6a   : > { %s490_s13 = sshll.u32 %s483_s17, 4  ;;  %s4414_s4 = scalar_lea.sflag [#allocation8], %s5147_s11  ;;  %s4410_s13 = int_to_ptr.vmem [resolvable:$true] %s490_s13 }
  0x6b   : > { %5187 = sst [smem:[#allocation33_spill]] %s4401_s5  ;;  %p4420_p11 = pneg %p4391_p0 }
  0x6e   : > { %s4407_s12 = scalar_lea.hbm %s5188_s1, %s4380_s25  ;;  %s3868_s17 = scalar_lea.hbm %s5188_s1, 512 }
  0x6f   : > { %s3863_s15 = scalar_lea.hbm %s4407_s12, 256  ;;  %p3869_p6 = scmp.lt.u32.totalorder %s4407_s12, %s5188_s1 }
  0x70   : > { %p3864_p5 = scmp.ne.s32.totalorder %s4407_s12, %s3863_s15  ;;  %p3870_p3 = scmp.lt.u32.totalorder %s3868_s17, %s3863_s15 }
  0x71   : > { %p3872_p8 = scmp.lt.u32.totalorder %s3863_s15, %s4407_s12 }
  0x72   : > { %p3866_p13 = pnand %p4420_p11, %p3864_p5  ;;  %p3871_p7 = por %p3870_p3, %p3869_p6 }
  0x74   : > { %p3867_p2 = pneg %p3866_p13  ;;  %p3873_p9 = por %p3872_p8, %p3871_p7 }
  0x76   : > { %p3874_p10 = pnand %p3873_p9, %p3867_p2 }
  0x78   : > { %3877 = shalt.err (!%p3874_p10)
}
  0x79   : > { %s3878_s11 = scalar_lea.vmem %s4410_s13, 256  ;;  %s4147_s9 = smov [#allocation7]  }
  0x7a   : > { %p3879_p5 = scmp.ne.s32.totalorder %s4410_s13, %s3878_s11  ;;  %s3883_s10 = sshll.u32 %s4147_s9, 4  ;;  %s3884_s10 = int_to_ptr.vmem [resolvable:$false] %s3883_s10 }
  0x7b   : > { %s3885_s6 = scalar_lea.vmem %s3884_s10, 512  ;;  %p3886_p1 = scmp.lt.s32.totalorder %s4410_s13, %s3884_s10 }
  0x7c   : > { %p3881_p13 = pnand %p3879_p5, %p4420_p11  ;;  %p3887_p4 = scmp.lt.s32.totalorder %s3885_s6, %s3878_s11 }
  0x7e   : > { %p3882_p12 = pneg %p3881_p13  ;;  %p3888_p6 = por %p3887_p4, %p3886_p1 }
  0x80   : > { %p3889_p3 = pnand %p3888_p6, %p3882_p12 }
  0x82   : > { %3892 = shalt.err (!%p3889_p3)
}
  0x83   : > { %s5190_s28 = smov 8   ;;  %s5191_s15 = smov 128  }
  0x84   : > { %3689 = dma.hbm_to_vmem [thread:$0]  (!%p4391_p0), %s4407_s12, 256, %s4410_s13, %s4414_s4, %s5191_s15, %s5191_s15, %s5190_s28  }
  0x85   : > { %s4148_s17 = smov [#allocation15]   ;;  %s4451_s11 = scalar_lea.hbm %s5117_s0, %s4380_s25 }
  0x86   : > { %s433_s9 = sshll.u32 %s4148_s17, 4  ;;  %s3893_s27 = scalar_lea.hbm %s5125_s8, 512  ;;  %s434_s9 = int_to_ptr.vmem [resolvable:$true] %s433_s9 }
  0x87   : > { %p3894_p12 = scmp.ne.s32.totalorder %s5125_s8, %s3893_s27  ;;  %p5192_p1 = scmp.ne.s32.totalorder %s5180_s19, 0 }
  0x88   : > { %p3900_p7 = scmp.lt.u32.totalorder %s3893_s27, %s5125_s8 }
  0x89   : > { %p3896_p4 = pnand %p3894_p12, %p5192_p1 }
  0x8b   : > { %p3897_p2 = pneg %p3896_p4 }
  0x8d   : > { %p3902_p8 = pnand %p3900_p7, %p3897_p2 }
  0x8f   : > { %3905 = shalt.err (!%p3902_p8)
}
  0x90   : > { %s3906_s1 = scalar_lea.vmem %s434_s9, 512  ;;  %p3914_p13 = scmp.lt.s32.totalorder %s434_s9, %s434_s9 }
  0x91   : > { %p3907_p9 = scmp.ne.s32.totalorder %s434_s9, %s3906_s1  ;;  %p3915_p6 = scmp.lt.s32.totalorder %s3906_s1, %s3906_s1 }
  0x93   : > { %p3909_p10 = pnand %p3907_p9, %p5192_p1  ;;  %p3916_p3 = por %p3915_p6, %p3914_p13 }
  0x95   : > { %p3910_p5 = pneg %p3909_p10 }
  0x97   : > { %p3917_p0 = pnand %p3916_p3, %p3910_p5 }
  0x99   : > { %3920 = shalt.err (!%p3917_p0)
}
  0x9a   : > { %p5193_p12 = scmp.ne.s32.totalorder %s5178_s24, 0  ;;  %s460_s14 = scalar_lea.vmem [#allocation4], %s4387_s22 }
  0x9b   : > { %s469_s19 = sshll.u32 %s460_s14, 4  ;;  %s4481_s17 = scalar_lea.hbm %s5119_s2, %s4380_s25  ;;  %s4475_s19 = int_to_ptr.vmem [resolvable:$true] %s469_s19 }
  0x9c   : > { %3682 = dma.hbm_to_vmem [thread:$0]  (!%p5193_p12), %s5125_s8, 512, %s434_s9, [#allocation14], %s5191_s15, %s5191_s15, %s5190_s28  }
  0x9d   : > { %s457_s10 = scalar_lea.sflag [#allocation5], %s4377_s20  ;;  %s3921_s6 = scalar_lea.hbm %s4451_s11, 256 }
  0x9e   : > { %p3922_p0 = scmp.ne.s32.totalorder %s4451_s11, %s3921_s6  ;;  %s3926_s1 = scalar_lea.hbm %s5117_s0, 512 }
  0x9f   : > { %p3927_p2 = scmp.lt.u32.totalorder %s4451_s11, %s5117_s0  ;;  %p3928_p7 = scmp.lt.u32.totalorder %s3926_s1, %s3921_s6 }
  0xa0   : > { %p3924_p1 = pnand %p3922_p0, %p4420_p11  ;;  %p3930_p9 = scmp.lt.u32.totalorder %s3921_s6, %s4451_s11 }
  0xa1   : > { %p3929_p8 = por %p3928_p7, %p3927_p2 }
  0xa2   : > { %p3925_p4 = pneg %p3924_p1 }
  0xa3   : > { %p3931_p10 = por %p3930_p9, %p3929_p8 }
  0xa5   : > { %p3932_p5 = pnand %p3931_p10, %p3925_p4 }
  0xa7   : > { %3935 = shalt.err (!%p3932_p5)
}
  0xa8   : > { %s3936_s25 = scalar_lea.vmem %s4475_s19, 256  ;;  %s4149_s27 = smov [#allocation4]  }
  0xa9   : > { %p3937_p13 = scmp.ne.s32.totalorder %s4475_s19, %s3936_s25  ;;  %s3941_s14 = sshll.u32 %s4149_s27, 4  ;;  %s3942_s14 = int_to_ptr.vmem [resolvable:$false] %s3941_s14 }
  0xaa   : > { %s3943_s24 = scalar_lea.vmem %s3942_s14, 512  ;;  %p3944_p12 = scmp.lt.s32.totalorder %s4475_s19, %s3942_s14 }
  0xab   : > { %p3939_p6 = pnand %p3937_p13, %p4420_p11  ;;  %p3945_p0 = scmp.lt.s32.totalorder %s3943_s24, %s3936_s25 }
  0xad   : > { %p3940_p3 = pneg %p3939_p6  ;;  %p3946_p1 = por %p3945_p0, %p3944_p12 }
  0xaf   : > { %p3947_p2 = pnand %p3946_p1, %p3940_p3 }
  0xb1   : > { %3950 = shalt.err (!%p3947_p2)
}
  0xb2   : > { %p5194_p4 = scmp.ne.s32.totalorder %s5185_s16, 0  ;;  %s504_s5 = scalar_lea.vmem [#allocation9], %s4387_s22 }
  0xb3   : > { %s511_s6 = sshll.u32 %s504_s5, 4  ;;  %s3338_s12 = sshll.u32 %s4377_s20, 2  ;;  %s4512_s6 = int_to_ptr.vmem [resolvable:$true] %s511_s6 }
  0xb4   : > { %3686 = dma.hbm_to_vmem [thread:$0]  (!%p5194_p4), %s4451_s11, 256, %s4475_s19, %s457_s10, %s5191_s15, %s5191_s15, %s5190_s28  }
  0xb5   : > { %s3951_s13 = scalar_lea.hbm %s4481_s17, 256  ;;  %s3956_s7 = scalar_lea.hbm %s5119_s2, 512 }
  0xb6   : > { %p3952_p7 = scmp.ne.s32.totalorder %s4481_s17, %s3951_s13  ;;  %p3957_p10 = scmp.lt.u32.totalorder %s4481_s17, %s5119_s2 }
  0xb7   : > { %p3958_p5 = scmp.lt.u32.totalorder %s3956_s7, %s3951_s13  ;;  %p3960_p6 = scmp.lt.u32.totalorder %s3951_s13, %s4481_s17 }
  0xb8   : > { %p3954_p8 = pnand %p3952_p7, %p4420_p11 }
  0xb9   : > { %p3959_p13 = por %p3958_p5, %p3957_p10 }
  0xba   : > { %p3955_p9 = pneg %p3954_p8 }
  0xbb   : > { %p3961_p3 = por %p3960_p6, %p3959_p13 }
  0xbd   : > { %p3962_p12 = pnand %p3961_p3, %p3955_p9 }
  0xbf   : > { %3965 = shalt.err (!%p3962_p12)
}
  0xc0   : > { %s3966_s22 = scalar_lea.vmem %s4512_s6, 256  ;;  %s4150_s11 = smov [#allocation9]  }
  0xc1   : > { %p3967_p0 = scmp.ne.s32.totalorder %s4512_s6, %s3966_s22  ;;  %s3971_s19 = sshll.u32 %s4150_s11, 4  ;;  %s3972_s19 = int_to_ptr.vmem [resolvable:$false] %s3971_s19 }
  0xc2   : > { %s3973_s10 = scalar_lea.vmem %s3972_s19, 512  ;;  %p3974_p7 = scmp.lt.s32.totalorder %s4512_s6, %s3972_s19 }
  0xc3   : > { %p3969_p1 = pnand %p3967_p0, %p4420_p11  ;;  %p3975_p8 = scmp.lt.s32.totalorder %s3973_s10, %s3966_s22 }
  0xc5   : > { %p3970_p2 = pneg %p3969_p1  ;;  %p3976_p10 = por %p3975_p8, %p3974_p7 }
  0xc7   : > { %p3977_p5 = pnand %p3976_p10, %p3970_p2 }
  0xc9   : > { %3980 = shalt.err (!%p3977_p5)
}
  0xca   : > { %3692 = dma.hbm_to_vmem [thread:$0]  (!%p5194_p4), %s4481_s17, 256, %s4512_s6, %s4414_s4, %s5191_s15, %s5191_s15, %s5190_s28  }
  0xcb   : > { %s3414_s14 = sshll.u32 %s4137_s29, 6  ;;  %s525_s24 = scalar_lea.vmem [#allocation10], %s3338_s12 }
  0xcc   : > { %s534_s5 = sshll.u32 %s525_s24, 4  ;;  %s4545_s9 = scalar_lea.hbm %s5120_s3, %s3414_s14  ;;  %s4547_s5 = int_to_ptr.vmem [resolvable:$true] %s534_s5 }
  0xcd   : > { %s5195_s7 = sand.u32 1, %s4141_s30   ;;  %s3981_s27 = scalar_lea.hbm %s4545_s9, 64 }
  0xce   : > { %s4551_s25 = scalar_lea.sflag [#allocation11], %s5195_s7  ;;  %p3982_p9 = scmp.ne.s32.totalorder %s4545_s9, %s3981_s27 }
  0xcf   : > { %s3986_s28 = scalar_lea.hbm %s5120_s3, 128  ;;  %p3987_p3 = scmp.lt.u32.totalorder %s4545_s9, %s5120_s3 }
  0xd0   : > { %p3984_p13 = pnand %p3982_p9, %p4420_p11  ;;  %p3988_p12 = scmp.lt.u32.totalorder %s3986_s28, %s3981_s27 }
  0xd1   : > { %p3990_p1 = scmp.lt.u32.totalorder %s3981_s27, %s4545_s9 }
  0xd2   : > { %p3985_p6 = pneg %p3984_p13  ;;  %p3989_p0 = por %p3988_p12, %p3987_p3 }
  0xd4   : > { %p3991_p2 = por %p3990_p1, %p3989_p0 }
  0xd6   : > { %p3992_p7 = pnand %p3991_p2, %p3985_p6 }
  0xd8   : > { %3995 = shalt.err (!%p3992_p7)
}
  0xd9   : > { %s3996_s6 = scalar_lea.vmem %s4547_s5, 64  ;;  %s4151_s12 = smov [#allocation10]  }
  0xda   : > { %p3997_p8 = scmp.ne.s32.totalorder %s4547_s5, %s3996_s6  ;;  %s4001_s22 = sshll.u32 %s4151_s12, 4  ;;  %s4002_s22 = int_to_ptr.vmem [resolvable:$false] %s4001_s22 }
  0xdb   : > { %s4003_s11 = scalar_lea.vmem %s4002_s22, 128  ;;  %p4004_p9 = scmp.lt.s32.totalorder %s4547_s5, %s4002_s22 }
  0xdc   : > { %p3999_p10 = pnand %p3997_p8, %p4420_p11  ;;  %p4005_p13 = scmp.lt.s32.totalorder %s4003_s11, %s3996_s6 }
  0xde   : > { %p4000_p5 = pneg %p3999_p10  ;;  %p4006_p3 = por %p4005_p13, %p4004_p9 }
  0xe0   : > { %p4007_p12 = pnand %p4006_p3, %p4000_p5 }
  0xe2   : > { %4010 = shalt.err (!%p4007_p12)
}
  0xe3   : > { %s4152_s19 = smov 32   ;;  %s4153_s10 = smov 2  }
  0xe4   : > { %3695 = dma.hbm_to_vmem [thread:$0]  (!%p5194_p4), %s4545_s9, 64, %s4547_s5, %s4551_s25, %s4152_s19, %s4152_s19, %s4153_s10  }
  0xe5   : > { %p5196_p11 = scmp.ne.s32.totalorder %s5177_s21, 0 }
  0xe6   : > { %s4578_s23 = sand.u32 (!%p5196_p11), 1, %s4125_s26   ;;  %p5197_p6 = scmp.ne.s32.totalorder (!%p5196_p11), %s5172_s18, 0 }
  0xe7   : > { %546 = sbr.rel (%p5196_p11) target bundleno = 1832 (0x728), region = 68  ;;  %s4581_s14 = sshll.u32 (!%p5196_p11), %s4578_s23, 4 }
  0xe8   : > { %s549_s24 = scalar_lea.sflag (!%p5196_p11), [#allocation5], %s4578_s23  ;;  %s552_s13 = scalar_lea.vmem (!%p5196_p11), [#allocation4], %s4581_s14 }
  0xee   : > { %4092 = dma.done.wait (%p5197_p6), %s549_s24, 256  }
  0xef   : > { %4094 = vsyncadd (%p5197_p6), %s549_s24, 4294967040  ;;  %s5198_s16 = sld [smem:[#allocation29_spill]]  ;;  %s561_s1 = scalar_lea.vmem [#allocation7], %s4581_s14 }
  0xf5   : > { %s557_s21 = sand.u32 1, %s5198_s16  }
  0xf6   : > { %s558_s5 = scalar_lea.sflag [#allocation8], %s557_s21 }
  0xf7   : > { %4096 = dma.done.wait (%p5197_p6), %s558_s5, 512  }
  0xf8   : > { %4098 = vsyncadd (%p5197_p6), %s558_s5, 4294966784  ;;  %s3345_s9 = sshll.u32 %s4578_s23, 2  ;;  %s570_s7 = scalar_lea.vmem [#allocation9], %s4581_s14 }
  0xf9   : > { %s576_s25 = scalar_lea.sflag [#allocation11], %s557_s21  ;;  %s4597_s27 = scalar_lea.vmem [#allocation10], %s3345_s9 }
  0xfa   : > { %4100 = dma.done.wait (%p5197_p6), %s576_s25, 64  }
  0xfb   : > { %4102 = vsyncadd (%p5197_p6), %s576_s25, 4294967232  ;;  %p5199_p4 = scmp.eq.s32.totalorder %s5198_s16, 0 }
  0xfd   : > { %4104 = dma.done.wait (%p5199_p4), [#allocation11], 512   ;;  %p5200_p0 = pmov %p5199_p4 }
  0xff   : > { %4106 = vsyncadd (%p5200_p0), [#allocation11], 4294966784  ;;  %p5201_p1 = pmov %p5200_p0 }
 0x100   : > { %p5202_p2 = pmov %p5200_p0 }
 0x101   : > { %4108 = dma.done.wait (%p5201_p1), [#allocation14], 1024  }
 0x102   : > { %4110 = vsyncadd (%p5202_p2), [#allocation14], 4294966272  ;;  %vm675_vm0 = vcmask 261120   ;;  %v664_v0 = vld [vmem:[#allocation13] sm:$0xff]  ;;  %v665_v1 = vld [vmem:[#allocation13 + $0x8] sm:$0xff]  ;;  %s5203_s20 = sld [smem:[#allocation38_spill]]  ;;  %v876_v36 = vlaneseq }
 0x103   : > { %v666_v2 = vld [vmem:[#allocation13 + $0x10] sm:$0xff]  ;;  %v3577_v3 = vpack.c.bf16 %v665_v1, %v664_v0  ;;  %v667_v4 = vld [vmem:[#allocation13 + $0x18] sm:$0xff]  ;;  %v1470_v7 = vld [vmem:[#allocation12] sm:$0xff]  ;;  %s4154_s28 = smov 112   ;;  %s4155_s15 = smov 120   ;;  %vm1435_vm1 = vcmask 64512  }
 0x104   : > { %v662_v5 = vld [vmem:[%s561_s1] sm:$0xff]  ;;  %v3581_v6 = vpack.c.bf16 %v667_v4, %v666_v2  ;;  %v1472_v10 = vld [vmem:[#allocation12 + $0x10] sm:$0xff]  ;;  %s5204_s12 = sld [smem:[#allocation36_spill]]  ;;  %s4156_s22 = smov 104   ;;  %v759_v26 = vld [vmem:[#allocation15] sm:$0xff]  ;;  %v877_v40 = vshrl.u32 %v876_v36, 7 }
 0x105   : > { %3485 = vmatprep.mubr.msk.f32.mxu0 %vm675_vm0, %v662_v5  ;;  %v1471_v8 = vld [vmem:[#allocation12 + $0x8] sm:$0xff]  ;;  %3578 = vmatprep.subr.bf16.mxu0 %v3577_v3  ;;  %v1473_v11 = vld [vmem:[#allocation12 + $0x18] sm:$0xff]  ;;  %v663_v12 = vld [vmem:[%s561_s1 + $0x8] sm:$0xff]  ;;  %v4157_v34 = vmov 1983009808   ;;  %vm2222_vm5 = vcmask 130048  }
 0x106   : > { %3580 = vmatpush3.bf16.msra.mxu0 %v3577_v3  ;;  %v3593_v9 = vpack.c.bf16 %v1471_v8, %v1470_v7  ;;  %v3597_v13 = vpack.c.bf16 %v1473_v11, %v1472_v10  ;;  %v1468_v14 = vld [vmem:[%s552_s13] sm:$0xff]  ;;  %v1469_v15 = vld [vmem:[%s552_s13 + $0x8] sm:$0xff]  ;;  %v874_v35 = vunpack.c.l.s4 %v4157_v34  ;;  %v4158_v41 = vmov 1934713408   ;;  %vm4746_vm2 = vmpackc.low %vm1435_vm1, %vm1435_vm1  ;;  %s5211_s10 = sld [smem:[#allocation39_spill]]  ;;  %s3350_s24 = sshll.u32 %s4578_s23, 6 }
 0x107   : > { %3582 = vmatprep.subr.bf16.mxu0 %v3581_v6  ;;  %v760_v27 = vld [vmem:[#allocation15 + $0x8] sm:$0xff]  ;;  %v761_v29 = vld [vmem:[#allocation15 + $0x10] sm:$0xff]  ;;  %v762_v30 = vld [vmem:[#allocation15 + $0x18] sm:$0xff]  ;;  %v906_v42 = vunpack.c.l.s4 %v4158_v41  ;;  %s4925_s13 = scalar_lea.vmem [#allocation17], %s3350_s24  ;;  %s5212_s5 = sld [smem:[#allocation40_spill]]  ;;  %vm2967_vm6 = vcmask 195584  }
 0x108   : > { %v3351_v16 = vld [vmem:[%s5203_s20] ss:$0 sm:$0xff]  ;;  %v3585_v28 = vpack.c.bf16 %v760_v27, %v759_v26  ;;  %v3589_v31 = vpack.c.bf16 %v762_v30, %v761_v29  ;;  %v758_v33 = vld [vmem:[%s570_s7 + $0x8] sm:$0xff]  ;;  %v875_v39 = vunpack.c.0.s8 %v874_v35  ;;  %s4159_s4 = smov 16   ;;  %s4160_s20 = smov 8  }
 0x109   : > { %v757_v32 = vld [vmem:[%s570_s7] sm:$0xff]  ;;  %v907_v48 = vunpack.c.0.s8 %v906_v42  ;;  %s5214_s17 = sld [smem:[#allocation30_spill]]  ;;  %s5215_s19 = sld [smem:[#allocation43_spill]] }
 0x10a   : > { %3584 = vmatpush3.bf16.msra.mxu0 %v3581_v6  ;;  %v3365_v22 = vld [vmem:[%s5204_s12] ss:$0 sm:$0xff]  ;;  %3586 = vmatprep.subr.bf16.mxu1 %v3585_v28  ;;  %v4662_v45 = vsub.s32 %v875_v39, %v877_v40  ;;  %s3103_s12 = sshll.u32 %s4925_s13, 4  ;;  %s3070_s24 = scalar_lea.sflag [#allocation18], %s4578_s23  ;;  %s5024_s12 = int_to_ptr.vmem [resolvable:$true] %s3103_s12 }
 0x10b   : > { %3594 = vmatprep.subr.bf16.mxu0 %v3593_v9  ;;  %3588 = vmatpush3.bf16.msra.mxu1 %v3585_v28  ;;  %v4668_v59 = vsub.s32 %v907_v48, %v877_v40  ;;  %s4011_s16 = scalar_lea.vmem %s5024_s12, 1024  ;;  %s4162_s21 = smov [#allocation17]  }
 0x10c   : > { %3590 = vmatprep.subr.bf16.mxu1 %v3589_v31  ;;  %3496 = vmatprep.mubr.msk.f32.mxu1 %vm675_vm0, %v757_v32  ;;  %p4012_p7 = scmp.ne.s32.totalorder %s5024_s12, %s4011_s16  ;;  %s4015_s1 = sshll.u32 %s4162_s21, 4  ;;  %s4016_s1 = int_to_ptr.vmem [resolvable:$false] %s4015_s1 }
 0x10d   : > { %3486 = vmatmul.mubr.msk.f32.vlgmr.msra.gmra.mrb[0].mxu0 %vm675_vm0, %v663_v12  ;;  %p4018_p9 = scmp.lt.s32.totalorder %s5024_s12, %s4016_s1 }
 0x10e   : > { %3596 = vmatpush3.bf16.msra.mxu0 %v3593_v9  ;;  %3507 = vmatprep.mubr.msk.f32.mxu0 %vm675_vm0, %v1468_v14 }
 0x10f   : > { %3598 = vmatprep.subr.bf16.mxu0 %v3597_v13  ;;  %3592 = vmatpush3.bf16.msra.mxu1 %v3589_v31  ;;  %p5216_p8 = scmp.ne.s32.totalorder %s5214_s17, 0 }
 0x111   : > { %p4013_p10 = pnand %p4012_p7, %p5216_p8 }
 0x112   : > { %3600 = vmatpush3.bf16.msra.mxu0 %v3597_v13  ;;  %3497 = vmatmul.mubr.msk.f32.vlgmr.msra.gmra.mrb[0].mxu1 %vm675_vm0, %v758_v33 }
 0x113   : > { %p4014_p5 = pneg %p4013_p10 }
 0x115   : > { %3508 = vmatmul.mubr.msk.f32.vlgmr.msra.gmra.mrb[2].mxu0 %vm675_vm0, %v1469_v15 }
 0x1e0   : > { %v3487_v17 = vpop.f32.mrb[0].mxu0 }
 0x1e1   : > { %v754_v18 = vadd.f32 %v3487_v17, %v3351_v16  ;;  %v748_v19 = vpop.f32.mrb[1].mxu0 }
 0x1e2   : > { %v4628_v20 = vadd.f32 %v3351_v16, %v748_v19 }
 0x1e3   : > { %861 = vrot.lane.b32.xlu1 %v754_v18, %s4154_s28  ;;  %855 = vrot.lane.b32.xlu0 %v754_v18, %s4155_s15 }
 0x1e7   : > { %859 = vrot.lane.b32.xlu1 %v4628_v20, %s4154_s28  ;;  %853 = vrot.lane.b32.xlu0 %v4628_v20, %s4155_s15 }
 0x1e8   : > { %v3509_v21 = vpop.f32.mrb[2].mxu0 }
 0x1e9   : > { %v1554_v23 = vpop.f32.mrb[3].mxu0  ;;  %v4637_v24 = vadd.f32 %v3509_v21, %v3365_v22 }
 0x1ea   : > { %v4642_v25 = vadd.f32 %v3365_v22, %v1554_v23 }
 0x1eb   : > { %867 = vrot.lane.b32.xlu1 %v754_v18, %s4156_s22  ;;  %865 = vrot.lane.b32.xlu0 %v4628_v20, %s4156_s22 }
 0x1ef   : > { %1567 = vrot.lane.b32.xlu1 %v4637_v24, %s4155_s15  ;;  %1565 = vrot.lane.b32.xlu0 %v4642_v25, %s4155_s15 }
 0x1f3   : > { %1571 = vrot.lane.b32.xlu1 %v4642_v25, %s4154_s28  ;;  %1577 = vrot.lane.b32.xlu0 %v4642_v25, %s4156_s22 }
 0x1f7   : > { %1579 = vrot.lane.b32.xlu1 %v4637_v24, %s4156_s22  ;;  %1573 = vrot.lane.b32.xlu0 %v4637_v24, %s4154_s28 }
 0x255   : > { %v862_v37 = vpop.permute.xlu1 %861  ;;  %v856_v38 = vpop.permute.xlu0 %855 }
 0x256   : > { %v939_v46 = vcombine.low %v754_v18, %v862_v37  ;;  %v940_v47 = vcombine.high %v754_v18, %v862_v37 }
 0x258   : > { %v947_v57 = vrot.slane %v939_v46, %v4662_v45  ;;  %v954_v58 = vrot.slane %v940_v47, %v4662_v45 }
 0x259   : > { %v860_v43 = vpop.permute.xlu1 %859  ;;  %v854_v44 = vpop.permute.xlu0 %853 }
 0x25a   : > { %v871_v49 = vcombine.low %v4628_v20, %v860_v43  ;;  %v872_v50 = vcombine.high %v4628_v20, %v860_v43 }
 0x25c   : > { %v879_v0 = vrot.slane %v871_v49, %v4662_v45  ;;  %v886_v1 = vrot.slane %v872_v50, %v4662_v45 }
 0x25d   : > { %v868_v51 = vpop.permute.xlu1 %867  ;;  %v866_v52 = vpop.permute.xlu0 %865 }
 0x25e   : > { %v955_v53 = vcombine.low %v856_v38, %v868_v51  ;;  %v956_v54 = vcombine.high %v856_v38, %v868_v51  ;;  %v887_v55 = vcombine.low %v854_v44, %v866_v52  ;;  %v888_v56 = vcombine.high %v854_v44, %v866_v52 }
 0x260   : > { %v963_v60 = vrot.slane %v955_v53, %v4662_v45  ;;  %v970_v61 = vrot.slane %v956_v54, %v4662_v45  ;;  %v895_v62 = vrot.slane %v887_v55, %v4662_v45  ;;  %v902_v63 = vrot.slane %v888_v56, %v4662_v45 }
 0x261   : > { %v4676_v6 = vpop.permute.xlu1 %1567  ;;  %v4678_v7 = vpop.permute.xlu0 %1565 }
 0x262   : > { %v971_v2 = vcombine.low %v947_v57, %v963_v60  ;;  %v972_v3 = vcombine.high %v947_v57, %v963_v60  ;;  %v987_v4 = vcombine.low %v954_v58, %v970_v61  ;;  %v988_v5 = vcombine.high %v954_v58, %v970_v61 }
 0x263   : > { %v903_v8 = vcombine.low %v879_v0, %v895_v62  ;;  %v904_v9 = vcombine.high %v879_v0, %v895_v62  ;;  %v919_v10 = vcombine.low %v886_v1, %v902_v63  ;;  %v920_v11 = vcombine.high %v886_v1, %v902_v63 }
 0x264   : > { %v979_v12 = vrot.slane %v971_v2, %v4668_v59  ;;  %v986_v13 = vrot.slane %v972_v3, %v4668_v59  ;;  %v995_v14 = vrot.slane %v987_v4, %v4668_v59  ;;  %v1002_v15 = vrot.slane %v988_v5, %v4668_v59 }
 0x265   : > { %v911_v16 = vrot.slane %v903_v8, %v4668_v59  ;;  %v918_v17 = vrot.slane %v904_v9, %v4668_v59  ;;  %v927_v18 = vrot.slane %v919_v10, %v4668_v59  ;;  %v934_v19 = vrot.slane %v920_v11, %v4668_v59  ;;  %v1572_v34 = vpop.permute.xlu1 %1571  ;;  %v1578_v35 = vpop.permute.xlu0 %1577 }
 0x266   : > { %v1075_v20 = vcombine.low %v979_v12, %v986_v13  ;;  %v3359_v21 = vcombine.high %v979_v12, %v986_v13  ;;  %v1091_v22 = vcombine.low %v995_v14, %v1002_v15  ;;  %v3360_v23 = vcombine.high %v995_v14, %v1002_v15 }
 0x267   : > { %v1007_v26 = vcombine.low %v911_v16, %v918_v17  ;;  %v3357_v27 = vcombine.high %v911_v16, %v918_v17  ;;  %v1023_v28 = vcombine.low %v927_v18, %v934_v19  ;;  %v3358_v29 = vcombine.high %v927_v18, %v934_v19 }
 0x268   : > { %v1082_v30 = vrot.slane %v1075_v20, %v4662_v45  ;;  %v1090_v31 = vrot.slane %v3359_v21, %v4662_v45  ;;  %v1098_v32 = vrot.slane %v1091_v22, %v4662_v45  ;;  %v1106_v33 = vrot.slane %v3360_v23, %v4662_v45 }
 0x269   : > { %v1014_v36 = vrot.slane %v1007_v26, %v4662_v45  ;;  %v1022_v37 = vrot.slane %v3357_v27, %v4662_v45  ;;  %v1030_v38 = vrot.slane %v1023_v28, %v4662_v45  ;;  %v1038_v39 = vrot.slane %v3358_v29, %v4662_v45  ;;  %v1580_v62 = vpop.permute.xlu1 %1579  ;;  %v1574_v63 = vpop.permute.xlu0 %1573 }
 0x26a   : > { %v1107_v40 = vcombine.low %v1082_v30, %v1090_v31  ;;  %v1108_v41 = vcombine.high %v1082_v30, %v1090_v31  ;;  %v1123_v42 = vcombine.low %v1098_v32, %v1106_v33  ;;  %v1124_v43 = vcombine.high %v1098_v32, %v1106_v33 }
 0x26b   : > { %v1039_v44 = vcombine.low %v1014_v36, %v1022_v37  ;;  %v1040_v46 = vcombine.high %v1014_v36, %v1022_v37  ;;  %v1055_v47 = vcombine.low %v1030_v38, %v1038_v39  ;;  %v1056_v48 = vcombine.high %v1030_v38, %v1038_v39 }
 0x26c   : > { %v1115_v49 = vrot.slane %v1107_v40, %v4668_v59  ;;  %v1122_v50 = vrot.slane %v1108_v41, %v4668_v59  ;;  %v1131_v51 = vrot.slane %v1123_v42, %v4668_v59  ;;  %v1138_v52 = vrot.slane %v1124_v43, %v4668_v59 }
 0x26d   : > { %v1047_v53 = vrot.slane %v1039_v44, %v4668_v59  ;;  %v1054_v54 = vrot.slane %v1040_v46, %v4668_v59  ;;  %v1063_v55 = vrot.slane %v1055_v47, %v4668_v59  ;;  %v1070_v56 = vrot.slane %v1056_v48, %v4668_v59 }
 0x26e   : > { %v1139_v57 = vcombine.low %v1115_v49, %v1131_v51  ;;  %v1140_v58 = vcombine.high %v1115_v49, %v1131_v51  ;;  %v1141_v60 = vcombine.low %v1122_v50, %v1138_v52  ;;  %v1142_v61 = vcombine.high %v1122_v50, %v1138_v52 }
 0x26f   : > { %v1071_v0 = vcombine.low %v1047_v53, %v1063_v55  ;;  %v1072_v1 = vcombine.high %v1047_v53, %v1063_v55  ;;  %v1073_v2 = vcombine.low %v1054_v54, %v1070_v56  ;;  %v1074_v3 = vcombine.high %v1054_v54, %v1070_v56 }
 0x270   : > { %1437 = vst.msk [vmem:[#allocation2 + $0x8] sm:$0xff] %vm1435_vm1, %v1139_v57  ;;  %1439 = vst.msk [vmem:[#allocation2 + $0x18] sm:$0xff] %vm1435_vm1, %v1140_v58  ;;  %v1583_v4 = vcombine.low %v4642_v25, %v1572_v34  ;;  %v1584_v5 = vcombine.high %v4642_v25, %v1572_v34  ;;  %v1599_v8 = vcombine.low %v4678_v7, %v1578_v35 }
 0x271   : > { %1441 = vst.msk [vmem:[#allocation2 + $0x28] sm:$0xff] %vm1435_vm1, %v1141_v60  ;;  %1443 = vst.msk [vmem:[#allocation2 + $0x38] sm:$0xff] %vm1435_vm1, %v1142_v61  ;;  %v1600_v9 = vcombine.high %v4678_v7, %v1578_v35  ;;  %v1667_v10 = vcombine.low %v4676_v6, %v1580_v62  ;;  %v1668_v11 = vcombine.high %v4676_v6, %v1580_v62 }
 0x272   : > { %1436 = vst.msk [vmem:[#allocation2] sm:$0xff] %vm1435_vm1, %v1071_v0  ;;  %1438 = vst.msk [vmem:[#allocation2 + $0x10] sm:$0xff] %vm1435_vm1, %v1072_v1  ;;  %v1651_v12 = vcombine.low %v4637_v24, %v1574_v63  ;;  %v1652_v25 = vcombine.high %v4637_v24, %v1574_v63  ;;  %v1591_v13 = vrot.slane %v1583_v4, %v4662_v45 }
 0x273   : > { %1440 = vst.msk [vmem:[#allocation2 + $0x20] sm:$0xff] %vm1435_vm1, %v1073_v2  ;;  %1442 = vst.msk [vmem:[#allocation2 + $0x30] sm:$0xff] %vm1435_vm1, %v1074_v3  ;;  %v1598_v7 = vrot.slane %v1584_v5, %v4662_v45  ;;  %v1607_v14 = vrot.slane %v1599_v8, %v4662_v45  ;;  %v1614_v15 = vrot.slane %v1600_v9, %v4662_v45 }
 0x274   : > { %v1675_v16 = vrot.slane %v1667_v10, %v4662_v45  ;;  %v1682_v17 = vrot.slane %v1668_v11, %v4662_v45  ;;  %v1659_v18 = vrot.slane %v1651_v12, %v4662_v45  ;;  %v1666_v6 = vrot.slane %v1652_v25, %v4662_v45 }
 0x275   : > { %v1615_v19 = vcombine.low %v1591_v13, %v1607_v14  ;;  %v1616_v20 = vcombine.high %v1591_v13, %v1607_v14  ;;  %v1631_v21 = vcombine.low %v1598_v7, %v1614_v15  ;;  %v1632_v24 = vcombine.high %v1598_v7, %v1614_v15 }
 0x276   : > { %v1683_v22 = vcombine.low %v1659_v18, %v1675_v16  ;;  %v1684_v23 = vcombine.high %v1659_v18, %v1675_v16  ;;  %v1699_v26 = vcombine.low %v1666_v6, %v1682_v17  ;;  %v1700_v27 = vcombine.high %v1666_v6, %v1682_v17 }
 0x277   : > { %v1623_v28 = vrot.slane %v1615_v19, %v4668_v59  ;;  %v1630_v29 = vrot.slane %v1616_v20, %v4668_v59  ;;  %v1639_v30 = vrot.slane %v1631_v21, %v4668_v59  ;;  %v1646_v31 = vrot.slane %v1632_v24, %v4668_v59  ;;  %v1453_v40 = vld [vmem:[#allocation2 + $0x8] sm:$0xff]  ;;  %v1455_v48 = vld [vmem:[#allocation2 + $0x18] sm:$0xff] }
 0x278   : > { %v1691_v32 = vrot.slane %v1683_v22, %v4668_v59  ;;  %v1698_v33 = vrot.slane %v1684_v23, %v4668_v59  ;;  %v1707_v34 = vrot.slane %v1699_v26, %v4668_v59  ;;  %v1714_v35 = vrot.slane %v1700_v27, %v4668_v59  ;;  %v1457_v60 = vld [vmem:[#allocation2 + $0x28] sm:$0xff]  ;;  %v1459_v2 = vld [vmem:[#allocation2 + $0x38] sm:$0xff]  ;;  %v3498_v27 = vpop.f32.mrb[0].mxu1 }
 0x279   : > { %v1719_v36 = vcombine.low %v1623_v28, %v1630_v29  ;;  %v3368_v37 = vcombine.high %v1623_v28, %v1630_v29  ;;  %v1735_v38 = vcombine.low %v1639_v30, %v1646_v31  ;;  %v3369_v39 = vcombine.high %v1639_v30, %v1646_v31  ;;  %v1452_v46 = vld [vmem:[#allocation2] sm:$0xff]  ;;  %v1454_v47 = vld [vmem:[#allocation2 + $0x10] sm:$0xff]  ;;  %v842_v28 = vpop.f32.mrb[1].mxu1 }
 0x27a   : > { %v1787_v41 = vcombine.low %v1691_v32, %v1698_v33  ;;  %v3370_v42 = vcombine.high %v1691_v32, %v1698_v33  ;;  %v1803_v43 = vcombine.low %v1707_v34, %v1714_v35  ;;  %v3371_v44 = vcombine.high %v1707_v34, %v1714_v35  ;;  %v1456_v58 = vld [vmem:[#allocation2 + $0x20] sm:$0xff]  ;;  %v1458_v1 = vld [vmem:[#allocation2 + $0x30] sm:$0xff] }
 0x27b   : > { %v1726_v49 = vrot.slane %v1719_v36, %v4662_v45  ;;  %v1734_v50 = vrot.slane %v3368_v37, %v4662_v45  ;;  %v1742_v51 = vrot.slane %v1735_v38, %v4662_v45  ;;  %v1750_v52 = vrot.slane %v3369_v39, %v4662_v45  ;;  %v3418_v29 = vld [vmem:[%s4597_s27] sm:$0xf]  }
 0x27c   : > { %v1794_v53 = vrot.slane %v1787_v41, %v4662_v45  ;;  %v1802_v54 = vrot.slane %v3370_v42, %v4662_v45  ;;  %v1810_v55 = vrot.slane %v1803_v43, %v4662_v45  ;;  %v1818_v56 = vrot.slane %v3371_v44, %v4662_v45 }
 0x27d   : > { %v1751_v61 = vcombine.low %v1726_v49, %v1734_v50  ;;  %v1767_v62 = vcombine.low %v1742_v51, %v1750_v52  ;;  %v3601_v63 = vpack.c.bf16 %v1453_v40, %v1452_v46  ;;  %v3607_v0 = vpack.c.bf16 %v1455_v48, %v1454_v47 }
 0x27e   : > { %v1819_v3 = vcombine.low %v1794_v53, %v1802_v54  ;;  %v1835_v4 = vcombine.low %v1810_v55, %v1818_v56  ;;  %v3613_v9 = vpack.c.bf16 %v1457_v60, %v1456_v58  ;;  %v3619_v10 = vpack.c.bf16 %v1459_v2, %v1458_v1 }
 0x27f   : > { %v1759_v5 = vrot.slane %v1751_v61, %v4668_v59  ;;  %v1775_v8 = vrot.slane %v1767_v62, %v4668_v59  ;;  %3603 = vmatprep.subr.msk.bf16.mxu1 %vm4746_vm2, %v3601_v63  ;;  %3609 = vmatprep.subr.msk.bf16.mxu0 %vm4746_vm2, %v3607_v0  ;;  %v1752_v7 = vcombine.high %v1726_v49, %v1734_v50  ;;  %v3420_v30 = vunpack.c.1.s8 %v3418_v29 }
 0x280   : > { %3606 = vmatpush3.bf16.xpose.msk.msra.mxu1 %vm4746_vm2, %v3601_v63  ;;  %3612 = vmatpush3.bf16.xpose.msk.msra.mxu0 %vm4746_vm2, %v3607_v0  ;;  %v1827_v11 = vrot.slane %v1819_v3, %v4668_v59  ;;  %v1843_v12 = vrot.slane %v1835_v4, %v4668_v59  ;;  %v1768_v14 = vcombine.high %v1742_v51, %v1750_v52  ;;  %v3419_v31 = vunpack.c.0.s8 %v3418_v29  ;;  %v3354_v52 = vld [vmem:[%s5211_s10] ss:$0 sm:$0xff] }
 0x281   : > { %v1783_v25 = vcombine.low %v1759_v5, %v1775_v8  ;;  %v1784_v13 = vcombine.high %v1759_v5, %v1775_v8  ;;  %3615 = vmatprep.subr.msk.bf16.mxu1 %vm4746_vm2, %v3613_v9  ;;  %3621 = vmatprep.subr.msk.bf16.mxu0 %vm4746_vm2, %v3619_v10  ;;  %v1766_v15 = vrot.slane %v1752_v7, %v4668_v59  ;;  %vm4783_vm3 = vcmp.eq.s32.totalorder %v3420_v30, 0 }
 0x282   : > { %v1782_v16 = vrot.slane %v1768_v14, %v4668_v59  ;;  %v1820_v17 = vcombine.high %v1794_v53, %v1802_v54  ;;  %v1836_v18 = vcombine.high %v1810_v55, %v1818_v56  ;;  %v1851_v6 = vcombine.low %v1827_v11, %v1843_v12 }
 0x283   : > { %3514 = vmatprep.mubr.msk.f32.mxu1 %vm1435_vm1, %v1783_v25  ;;  %3521 = vmatprep.mubr.msk.f32.mxu0 %vm1435_vm1, %v1784_v13  ;;  %v1852_v19 = vcombine.high %v1827_v11, %v1843_v12  ;;  %vm4787_vm4 = vcmp.eq.s32.totalorder %v3419_v31, 0  ;;  %v843_v55 = vadd.f32 %v3354_v52, %v842_v28  ;;  %v4823_v57 = vadd.f32 %v3498_v27, %v3354_v52 }
 0x284   : > { %v1785_v20 = vcombine.low %v1766_v15, %v1782_v16  ;;  %v1786_v21 = vcombine.high %v1766_v15, %v1782_v16  ;;  %v1834_v24 = vrot.slane %v1820_v17, %v4668_v59  ;;  %v1850_v22 = vrot.slane %v1836_v18, %v4668_v59 }
 0x286   : > { %v1853_v23 = vcombine.low %v1834_v24, %v1850_v22  ;;  %v1854_v26 = vcombine.high %v1834_v24, %v1850_v22 }
 0x287   : > { %3515 = vmatmul.mubr.msk.f32.vlgmr.msra.gmra.mrb[2].mxu1 %vm1435_vm1, %v1851_v6  ;;  %3522 = vmatmul.mubr.msk.f32.vlgmr.msra.gmra.mrb[4].mxu0 %vm1435_vm1, %v1852_v19 }
 0x288   : > { %3618 = vmatpush3.bf16.xpose.msk.msra.mxu1 %vm4746_vm2, %v3613_v9  ;;  %3528 = vmatprep.mubr.msk.f32.mxu1 %vm1435_vm1, %v1785_v20 }
 0x289   : > { %3624 = vmatpush3.bf16.xpose.msk.msra.mxu0 %vm4746_vm2, %v3619_v10  ;;  %3535 = vmatprep.mubr.msk.f32.mxu0 %vm1435_vm1, %v1786_v21 }
 0x28f   : > { %3529 = vmatmul.mubr.msk.f32.vlgmr.msra.gmra.mrb[4].mxu1 %vm1435_vm1, %v1853_v23 }
 0x290   : > { %3536 = vmatmul.mubr.msk.f32.vlgmr.msra.gmra.mrb[6].mxu0 %vm1435_vm1, %v1854_v26 }
 0x35a   : > { %v3516_v34 = vpop.f32.mrb[2].mxu1  ;;  %v3523_v35 = vpop.f32.mrb[4].mxu0 }
 0x35b   : > { %v2215_v36 = vsel %vm4783_vm3, -1e+10, %v3516_v34  ;;  %v1934_v37 = vpop.f32.mrb[3].mxu1  ;;  %v2021_v38 = vpop.f32.mrb[5].mxu0  ;;  %v4802_v44 = vsel %vm4783_vm3, -1e+10, %v3523_v35 }
 0x35c   : > { %v2214_v39 = vsel %vm4787_vm4, -1e+10, %v1934_v37  ;;  %v2226_v40 = vsel %vm2222_vm5, %v2215_v36, -inf  ;;  %v2216_v42 = vsel %vm4787_vm4, -1e+10, %v2021_v38  ;;  %v2232_v50 = vsel %vm2222_vm5, %v4802_v44, -inf }
 0x35d   : > { %2227 = vmax.xlane.f32.xlu1 %v2226_v40  ;;  %v2223_v41 = vsel %vm2222_vm5, %v2214_v39, -inf  ;;  %v2229_v43 = vsel %vm2222_vm5, %v2216_v42, -inf }
 0x35e   : > { %2224 = vmax.xlane.f32.xlu0 %v2223_v41 }
 0x362   : > { %2230 = vmax.xlane.f32.xlu0 %v2229_v43  ;;  %v3530_v46 = vpop.f32.mrb[4].mxu1 }
 0x363   : > { %v3537_v47 = vpop.f32.mrb[6].mxu0  ;;  %v2108_v48 = vpop.f32.mrb[5].mxu1  ;;  %v4808_v51 = vsel %vm4783_vm3, -1e+10, %v3530_v46 }
 0x364   : > { %v2195_v49 = vpop.f32.mrb[7].mxu0  ;;  %v2238_v53 = vsel %vm2222_vm5, %v4808_v51, -inf  ;;  %v4817_v54 = vsel %vm4783_vm3, -1e+10, %v3537_v47  ;;  %v4830_v58 = vsel %vm4787_vm4, -1e+10, %v2108_v48 }
 0x365   : > { %v2244_v56 = vsel %vm2222_vm5, %v4817_v54, -inf  ;;  %v2235_v60 = vsel %vm2222_vm5, %v4830_v58, -inf  ;;  %v4836_v61 = vsel %vm4787_vm4, -1e+10, %v2195_v49 }
 0x366   : > { %2233 = vmax.xlane.f32.xlu0 %v2232_v50  ;;  %v2241_v62 = vsel %vm2222_vm5, %v4836_v61, -inf }
 0x36a   : > { %2239 = vmax.xlane.f32.xlu0 %v2238_v53 }
 0x36e   : > { %1145 = vrot.lane.b32.xlu1 %v843_v55, %s4155_s15  ;;  %2245 = vmax.xlane.f32.xlu0 %v2244_v56 }
 0x372   : > { %1151 = vrot.lane.b32.xlu1 %v843_v55, %s4154_s28 }
 0x384   : > { %1147 = vrot.lane.b32.xlu0 %v4823_v57, %s4155_s15  ;;  %s5213_s15 = sld [smem:[#allocation28_spill]] }
 0x388   : > { %1157 = vrot.lane.b32.xlu0 %v843_v55, %s4156_s22 }
 0x38a   : > { %s3416_s6 = sshll.u32 %s5213_s15, 10 }
 0x38b   : > { %s5022_s10 = scalar_lea.hbm %s5215_s19, %s3416_s6 }
 0x396   : > { %2236 = vmax.xlane.f32.xlu1 %v2235_v60 }
 0x39a   : > { %2242 = vmax.xlane.f32.xlu1 %v2241_v62 }
 0x3ab   : > { %1153 = vrot.lane.b32.xlu1 %v4823_v57, %s4154_s28  ;;  %s4161_s28 = smov 24  }
 0x3ea   : > { %v2228_v63 = vpop.xlane.xlu1 %2227 }
 0x3eb   : > { %v2248_v0 = vsub.f32 %v2215_v36, %v2228_v63  ;;  %v2225_v1 = vpop.xlane.xlu0 %2224 }
 0x3ec   : > { %v2247_v2 = vsub.f32 %v2214_v39, %v2225_v1 }
 0x3ed   : > { %v2257_v3 = vmul.f32 1.442695, %v2248_v0 }
 0x3ee   : > { %v2255_v4 = vmul.f32 1.442695, %v2247_v2  ;;  %v1146_v25 = vpop.permute.xlu1 %1145 }
 0x3ef   : > { %3775 = vpow2.f32 %v2257_v3  ;;  %v2231_v5 = vpop.xlane.xlu0 %2230 }
 0x3f0   : > { %3777 = vpow2.f32 %v2255_v4  ;;  %v2249_v8 = vsub.f32 %v2216_v42, %v2231_v5 }
 0x3f2   : > { %v2259_v9 = vmul.f32 1.442695, %v2249_v8  ;;  %v1152_v17 = vpop.permute.xlu1 %1151 }
 0x3f3   : > { %v2234_v10 = vpop.xlane.xlu0 %2233  ;;  %v1163_v19 = vcombine.low %v843_v55, %v1152_v17  ;;  %v1164_v20 = vcombine.high %v843_v55, %v1152_v17 }
 0x3f4   : > { %3779 = vpow2.f32 %v2259_v9  ;;  %v2250_v1 = vsub.f32 %v4802_v44, %v2234_v10 }
 0x3f5   : > { %v1171_v23 = vrot.slane %v1163_v19, %v4662_v45  ;;  %v1178_v26 = vrot.slane %v1164_v20, %v4662_v45 }
 0x3f6   : > { %v2261_v2 = vmul.f32 1.442695, %v2250_v1 }
 0x3f7   : > { %v2240_v11 = vpop.xlane.xlu0 %2239 }
 0x3f8   : > { %v2252_v3 = vsub.f32 %v4808_v51, %v2240_v11  ;;  %3781 = vpow2.f32 %v2261_v2 }
 0x3f9   : > { %v4842_v12 = vpop.eup %3775 }
 0x3fa   : > { %v4844_v13 = vpop.eup %3777  ;;  %v2274_v7 = vsel %vm2222_vm5, %v4842_v12, 0.0  ;;  %v2265_v8 = vmul.f32 1.442695, %v2252_v3 }
 0x3fb   : > { %2275 = vadd.xlane.f32.xlu0 %v2274_v7  ;;  %v4848_v14 = vpop.xlane.xlu0 %2245  ;;  %v2271_v15 = vsel %vm2222_vm5, %v4844_v13, 0.0 }
 0x3fc   : > { %2272 = vadd.xlane.f32.xlu1 %v2271_v15  ;;  %v2254_v9 = vsub.f32 %v4817_v54, %v4848_v14 }
 0x3fe   : > { %v4852_v16 = vpop.eup %3779  ;;  %v2269_v17 = vmul.f32 1.442695, %v2254_v9 }
 0x3ff   : > { %v4854_v18 = vpop.permute.xlu0 %1147  ;;  %v2277_v6 = vsel %vm2222_vm5, %v4852_v16, 0.0 }
 0x400   : > { %2278 = vadd.xlane.f32.xlu0 %v2277_v6 }
 0x402   : > { %v4886_v44 = vpop.eup %3781 }
 0x403   : > { %v1158_v21 = vpop.permute.xlu0 %1157  ;;  %v2280_v51 = vsel %vm2222_vm5, %v4886_v44, 0.0 }
 0x404   : > { %v1179_v24 = vcombine.low %v1146_v25, %v1158_v21  ;;  %v1180_v22 = vcombine.high %v1146_v25, %v1158_v21 }
 0x406   : > { %v1187_v27 = vrot.slane %v1179_v24, %v4662_v45  ;;  %v1194_v28 = vrot.slane %v1180_v22, %v4662_v45 }
 0x408   : > { %v1195_v29 = vcombine.low %v1171_v23, %v1187_v27  ;;  %v1196_v30 = vcombine.high %v1171_v23, %v1187_v27  ;;  %v1211_v31 = vcombine.low %v1178_v26, %v1194_v28  ;;  %v1212_v32 = vcombine.high %v1178_v26, %v1194_v28 }
 0x40a   : > { %v1203_v33 = vrot.slane %v1195_v29, %v4668_v59  ;;  %v1210_v34 = vrot.slane %v1196_v30, %v4668_v59  ;;  %v1219_v35 = vrot.slane %v1211_v31, %v4668_v59  ;;  %v1226_v36 = vrot.slane %v1212_v32, %v4668_v59 }
 0x40c   : > { %v1299_v37 = vcombine.low %v1203_v33, %v1210_v34  ;;  %v3361_v38 = vcombine.high %v1203_v33, %v1210_v34  ;;  %v1315_v39 = vcombine.low %v1219_v35, %v1226_v36  ;;  %v3362_v40 = vcombine.high %v1219_v35, %v1226_v36 }
 0x40d   : > { %1159 = vrot.lane.b32.xlu1 %v4823_v57, %s4156_s22 }
 0x40e   : > { %v1306_v41 = vrot.slane %v1299_v37, %v4662_v45  ;;  %v1314_v42 = vrot.slane %v3361_v38, %v4662_v45  ;;  %v1322_v43 = vrot.slane %v1315_v39, %v4662_v45  ;;  %v1330_v46 = vrot.slane %v3362_v40, %v4662_v45 }
 0x410   : > { %v1331_v47 = vcombine.low %v1306_v41, %v1314_v42  ;;  %v1332_v48 = vcombine.high %v1306_v41, %v1314_v42  ;;  %v1347_v49 = vcombine.low %v1322_v43, %v1330_v46  ;;  %v1348_v50 = vcombine.high %v1322_v43, %v1330_v46 }
 0x412   : > { %v1339_v52 = vrot.slane %v1331_v47, %v4668_v59  ;;  %v1346_v53 = vrot.slane %v1332_v48, %v4668_v59  ;;  %v1355_v55 = vrot.slane %v1347_v49, %v4668_v59  ;;  %v1362_v56 = vrot.slane %v1348_v50, %v4668_v59 }
 0x414   : > { %v1363_v60 = vcombine.low %v1339_v52, %v1355_v55  ;;  %v1364_v62 = vcombine.high %v1339_v52, %v1355_v55  ;;  %v1365_v63 = vcombine.low %v1346_v53, %v1362_v56  ;;  %v1366_v0 = vcombine.high %v1346_v53, %v1362_v56 }
 0x416   : > { %1444 = vst.msk [vmem:[#allocation3] sm:$0xff] %vm1435_vm1, %v1363_v60  ;;  %1446 = vst.msk [vmem:[#allocation3 + $0x10] sm:$0xff] %vm1435_vm1, %v1364_v62 }
 0x417   : > { %1448 = vst.msk [vmem:[#allocation3 + $0x20] sm:$0xff] %vm1435_vm1, %v1365_v63  ;;  %1450 = vst.msk [vmem:[#allocation3 + $0x30] sm:$0xff] %vm1435_vm1, %v1366_v0 }
 0x423   : > { %v2237_v4 = vpop.xlane.xlu1 %2236 }
 0x424   : > { %v2251_v5 = vsub.f32 %v4830_v58, %v2237_v4 }
 0x426   : > { %v2263_v25 = vmul.f32 1.442695, %v2251_v5 }
 0x427   : > { %v2243_v7 = vpop.xlane.xlu1 %2242 }
 0x428   : > { %3783 = vpow2.f32 %v2263_v25  ;;  %v2253_v15 = vsub.f32 %v4836_v61, %v2243_v7 }
 0x429   : > { %3785 = vpow2.f32 %v2265_v8 }
 0x42a   : > { %v2267_v6 = vmul.f32 1.442695, %v2253_v15 }
 0x42b   : > { %v1154_v21 = vpop.permute.xlu1 %1153 }
 0x42c   : > { %3787 = vpow2.f32 %v2267_v6  ;;  %v1231_v23 = vcombine.low %v4823_v57, %v1154_v21  ;;  %v1232_v26 = vcombine.high %v4823_v57, %v1154_v21  ;;  %v1460_v21 = vld [vmem:[#allocation3] sm:$0xff] }
 0x42d   : > { %3789 = vpow2.f32 %v2269_v17 }
 0x42e   : > { %v1239_v31 = vrot.slane %v1231_v23, %v4662_v45  ;;  %v1246_v32 = vrot.slane %v1232_v26, %v4662_v45  ;;  %v1462_v26 = vld [vmem:[#allocation3 + $0x10] sm:$0xff] }
 0x431   : > { %2281 = vadd.xlane.f32.xlu1 %v2280_v51 }
 0x432   : > { %v4890_v58 = vpop.eup %3783 }
 0x433   : > { %v2283_v54 = vsel %vm2222_vm5, %v4890_v58, 0.0  ;;  %v4894_v10 = vpop.eup %3785 }
 0x434   : > { %2284 = vadd.xlane.f32.xlu0 %v2283_v54  ;;  %v2286_v11 = vsel %vm2222_vm5, %v4894_v10, 0.0 }
 0x436   : > { %v4896_v61 = vpop.eup %3787 }
 0x437   : > { %v2289_v14 = vsel %vm2222_vm5, %v4896_v61, 0.0  ;;  %v4902_v19 = vpop.eup %3789 }
 0x438   : > { %2287 = vadd.xlane.f32.xlu0 %v2286_v11  ;;  %2290 = vadd.xlane.f32.xlu1 %v2289_v14  ;;  %v2292_v20 = vsel %vm2222_vm5, %v4902_v19, 0.0 }
 0x43c   : > { %2293 = vadd.xlane.f32.xlu0 %v2292_v20 }
 0x488   : > { %v2276_v24 = vpop.xlane.xlu0 %2275 }
 0x489   : > { %3791 = vrcp.f32 %v2276_v24  ;;  %v2273_v22 = vpop.xlane.xlu1 %2272 }
 0x48a   : > { %3793 = vrcp.f32 %v2273_v22 }
 0x48d   : > { %v2279_v27 = vpop.xlane.xlu0 %2278  ;;  %v1160_v28 = vpop.permute.xlu1 %1159 }
 0x48e   : > { %3795 = vrcp.f32 %v2279_v27  ;;  %v1247_v29 = vcombine.low %v4854_v18, %v1160_v28  ;;  %v1248_v30 = vcombine.high %v4854_v18, %v1160_v28  ;;  %v1464_v28 = vld [vmem:[#allocation3 + $0x20] sm:$0xff] }
 0x490   : > { %v1255_v33 = vrot.slane %v1247_v29, %v4662_v45  ;;  %v1262_v34 = vrot.slane %v1248_v30, %v4662_v45 }
 0x492   : > { %v1263_v35 = vcombine.low %v1239_v31, %v1255_v33  ;;  %v1264_v36 = vcombine.high %v1239_v31, %v1255_v33  ;;  %v1279_v37 = vcombine.low %v1246_v32, %v1262_v34  ;;  %v1280_v57 = vcombine.high %v1246_v32, %v1262_v34 }
 0x493   : > { %v3792_v38 = vpop.eup %3791 }
 0x494   : > { %v3794_v39 = vpop.eup %3793  ;;  %v2304_v40 = vmul.f32 %v3792_v38, %v2276_v24  ;;  %v1271_v41 = vrot.slane %v1263_v35, %v4668_v59  ;;  %v1278_v18 = vrot.slane %v1264_v36, %v4668_v59  ;;  %v1287_v42 = vrot.slane %v1279_v37, %v4668_v59 }
 0x495   : > { %v2303_v43 = vmul.f32 %v3794_v39, %v2273_v22  ;;  %v1294_v46 = vrot.slane %v1280_v57, %v4668_v59 }
 0x496   : > { %v2312_v47 = vsub.f32 2.0, %v2304_v40  ;;  %v1367_v48 = vcombine.low %v1271_v41, %v1278_v18  ;;  %v3363_v49 = vcombine.high %v1271_v41, %v1278_v18 }
 0x497   : > { %v2311_v50 = vsub.f32 2.0, %v2303_v43  ;;  %v1383_v52 = vcombine.low %v1287_v42, %v1294_v46  ;;  %v3364_v53 = vcombine.high %v1287_v42, %v1294_v46 }
 0x498   : > { %v3796_v55 = vpop.eup %3795  ;;  %v2320_v56 = vmul.f32 %v3792_v38, %v2312_v47  ;;  %v1374_v60 = vrot.slane %v1367_v48, %v4662_v45  ;;  %v1382_v62 = vrot.slane %v3363_v49, %v4662_v45  ;;  %v1466_v48 = vld [vmem:[#allocation3 + $0x30] sm:$0xff] }
 0x499   : > { %v2319_v63 = vmul.f32 %v3794_v39, %v2311_v50  ;;  %v2305_v0 = vmul.f32 %v3796_v55, %v2279_v27  ;;  %v1390_v1 = vrot.slane %v1383_v52, %v4662_v45  ;;  %v1398_v2 = vrot.slane %v3364_v53, %v4662_v45 }
 0x49a   : > { %v2328_v3 = vmul.f32 %v4842_v12, %v2320_v56  ;;  %v1399_v4 = vcombine.low %v1374_v60, %v1382_v62  ;;  %v1400_v5 = vcombine.high %v1374_v60, %v1382_v62 }
 0x49b   : > { %v2327_v8 = vmul.f32 %v4844_v13, %v2319_v63  ;;  %v2313_v9 = vsub.f32 2.0, %v2305_v0  ;;  %v1415_v25 = vcombine.low %v1390_v1, %v1398_v2  ;;  %v1416_v7 = vcombine.high %v1390_v1, %v1398_v2 }
 0x49c   : > { %2336 = vst.msk [vmem:[%s4925_s13 + $0x8] sm:$0xff] %vm2222_vm5, %v2328_v3  ;;  %v1407_v15 = vrot.slane %v1399_v4, %v4668_v59  ;;  %v1414_v17 = vrot.slane %v1400_v5, %v4668_v59 }
 0x49d   : > { %2335 = vst.msk [vmem:[%s4925_s13] sm:$0xff] %vm2222_vm5, %v2327_v8  ;;  %v2321_v12 = vmul.f32 %v3796_v55, %v2313_v9  ;;  %v1423_v6 = vrot.slane %v1415_v25, %v4668_v59  ;;  %v1430_v13 = vrot.slane %v1416_v7, %v4668_v59  ;;  %3542 = vmatprep.mubr.msk.f32.mxu1 %vm2222_vm5, %v2327_v8 }
 0x49f   : > { %v2329_v51 = vmul.f32 %v4852_v16, %v2321_v12  ;;  %v1431_v54 = vcombine.low %v1407_v15, %v1423_v6  ;;  %v1432_v11 = vcombine.high %v1407_v15, %v1423_v6  ;;  %v1433_v14 = vcombine.low %v1414_v17, %v1430_v13 }
 0x4a0   : > { %v1434_v20 = vcombine.high %v1414_v17, %v1430_v13 }
 0x4a1   : > { %2337 = vst.msk [vmem:[%s4925_s13 + $0x10] sm:$0xff] %vm2222_vm5, %v2329_v51 }
 0x4a2   : > { %1445 = vst.msk [vmem:[#allocation3 + $0x8] sm:$0xff] %vm1435_vm1, %v1431_v54  ;;  %1447 = vst.msk [vmem:[#allocation3 + $0x18] sm:$0xff] %vm1435_vm1, %v1432_v11 }
 0x4a3   : > { %1449 = vst.msk [vmem:[#allocation3 + $0x28] sm:$0xff] %vm1435_vm1, %v1433_v14  ;;  %1451 = vst.msk [vmem:[#allocation3 + $0x38] sm:$0xff] %vm1435_vm1, %v1434_v20 }
 0x4a9   : > { %v1461_v24 = vld [vmem:[#allocation3 + $0x8] sm:$0xff]  ;;  %v1463_v22 = vld [vmem:[#allocation3 + $0x18] sm:$0xff] }
 0x4aa   : > { %v3625_v23 = vpack.c.bf16 %v1461_v24, %v1460_v21  ;;  %v3629_v16 = vpack.c.bf16 %v1463_v22, %v1462_v26  ;;  %v1465_v27 = vld [vmem:[#allocation3 + $0x28] sm:$0xff]  ;;  %v1467_v41 = vld [vmem:[#allocation3 + $0x38] sm:$0xff] }
 0x4ab   : > { %v3633_v29 = vpack.c.bf16 %v1465_v27, %v1464_v28  ;;  %v3637_v50 = vpack.c.bf16 %v1467_v41, %v1466_v48 }
 0x4ac   : > { %3626 = vmatprep.subr.bf16.mxu1 %v3625_v23 }
 0x4ad   : > { %3628 = vmatpush3.bf16.msra.mxu1 %v3625_v23 }
 0x4ae   : > { %3630 = vmatprep.subr.bf16.mxu1 %v3629_v16 }
 0x4b0   : > { %3543 = vmatmul.mubr.msk.f32.vlgmr.msra.gmra.mrb[6].mxu1 %vm2222_vm5, %v2328_v3 }
 0x4b1   : > { %3632 = vmatpush3.bf16.msra.mxu1 %v3629_v16  ;;  %3549 = vmatprep.mubr.msk.f32.mxu1 %vm2222_vm5, %v2329_v51 }
 0x4b2   : > { %3634 = vmatprep.subr.bf16.mxu1 %v3633_v29 }
 0x4be   : > { %v2282_v30 = vpop.xlane.xlu1 %2281 }
 0x4bf   : > { %3797 = vrcp.f32 %v2282_v30 }
 0x4c1   : > { %v2285_v31 = vpop.xlane.xlu0 %2284 }
 0x4c2   : > { %3799 = vrcp.f32 %v2285_v31 }
 0x4c5   : > { %v2288_v32 = vpop.xlane.xlu0 %2287  ;;  %v2291_v33 = vpop.xlane.xlu1 %2290 }
 0x4c6   : > { %3801 = vrcp.f32 %v2288_v32 }
 0x4c7   : > { %3803 = vrcp.f32 %v2291_v33 }
 0x4c9   : > { %v3798_v34 = vpop.eup %3797  ;;  %v2294_v35 = vpop.xlane.xlu0 %2293 }
 0x4ca   : > { %v2306_v36 = vmul.f32 %v3798_v34, %v2282_v30  ;;  %3805 = vrcp.f32 %v2294_v35 }
 0x4cc   : > { %v3800_v37 = vpop.eup %3799  ;;  %v2314_v57 = vsub.f32 2.0, %v2306_v36 }
 0x4cd   : > { %v2307_v38 = vmul.f32 %v3800_v37, %v2285_v31 }
 0x4ce   : > { %v2322_v39 = vmul.f32 %v3798_v34, %v2314_v57 }
 0x4cf   : > { %v2315_v40 = vsub.f32 2.0, %v2307_v38 }
 0x4d0   : > { %v3802_v18 = vpop.eup %3801  ;;  %v2330_v42 = vmul.f32 %v4886_v44, %v2322_v39 }
 0x4d1   : > { %v3804_v43 = vpop.eup %3803  ;;  %v2323_v46 = vmul.f32 %v3800_v37, %v2315_v40  ;;  %v2308_v47 = vmul.f32 %v3802_v18, %v2288_v32 }
 0x4d2   : > { %2338 = vst.msk [vmem:[%s4925_s13 + $0x18] sm:$0xff] %vm2222_vm5, %v2330_v42  ;;  %v2309_v49 = vmul.f32 %v3804_v43, %v2291_v33  ;;  %3550 = vmatmul.mubr.msk.f32.vlgmr.msra.gmra.mrb[8].mxu1 %vm2222_vm5, %v2330_v42 }
 0x4d3   : > { %v2331_v52 = vmul.f32 %v4890_v58, %v2323_v46  ;;  %v2316_v53 = vsub.f32 2.0, %v2308_v47  ;;  %3636 = vmatpush3.bf16.msra.mxu1 %v3633_v29 }
 0x4d4   : > { %v3806_v55 = vpop.eup %3805  ;;  %v2317_v56 = vsub.f32 2.0, %v2309_v49  ;;  %3638 = vmatprep.subr.bf16.mxu1 %v3637_v50 }
 0x4d5   : > { %2339 = vst.msk [vmem:[%s4925_s13 + $0x20] sm:$0xff] %vm2222_vm5, %v2331_v52  ;;  %v2324_v44 = vmul.f32 %v3802_v18, %v2316_v53  ;;  %v2310_v60 = vmul.f32 %v3806_v55, %v2294_v35  ;;  %3556 = vmatprep.mubr.msk.f32.mxu1 %vm2222_vm5, %v2331_v52 }
 0x4d6   : > { %v2325_v62 = vmul.f32 %v3804_v43, %v2317_v56 }
 0x4d7   : > { %v2332_v63 = vmul.f32 %v4894_v10, %v2324_v44  ;;  %v2318_v0 = vsub.f32 2.0, %v2310_v60 }
 0x4d8   : > { %v2333_v1 = vmul.f32 %v4896_v61, %v2325_v62 }
 0x4d9   : > { %2340 = vst.msk [vmem:[%s4925_s13 + $0x28] sm:$0xff] %vm2222_vm5, %v2332_v63  ;;  %v2326_v58 = vmul.f32 %v3806_v55, %v2318_v0  ;;  %3557 = vmatmul.mubr.msk.f32.vlgmr.msra.gmra.mrb[10].mxu1 %vm2222_vm5, %v2332_v63 }
 0x4da   : > { %2341 = vst.msk [vmem:[%s4925_s13 + $0x30] sm:$0xff] %vm2222_vm5, %v2333_v1  ;;  %3640 = vmatpush3.bf16.msra.mxu1 %v3637_v50  ;;  %3563 = vmatprep.mubr.msk.f32.mxu1 %vm2222_vm5, %v2333_v1 }
 0x4db   : > { %v2334_v2 = vmul.f32 %v4902_v19, %v2326_v58 }
 0x4dd   : > { %2342 = vst.msk [vmem:[%s4925_s13 + $0x38] sm:$0xff] %vm2222_vm5, %v2334_v2  ;;  %3564 = vmatmul.mubr.msk.f32.vlgmr.msra.gmra.mrb[12].mxu1 %vm2222_vm5, %v2334_v2  ;;  %s4017_s13 = scalar_lea.vmem %s4016_s1, 2048 }
 0x4de   : > { %p4019_p13 = scmp.lt.s32.totalorder %s4017_s13, %s4011_s16 }
 0x4e0   : > { %p4020_p3 = por %p4019_p13, %p4018_p9 }
 0x4e2   : > { %p4021_p12 = pnand %p4020_p3, %p4014_p5 }
 0x583   : > { %v3544_v10 = vpop.f32.mrb[6].mxu1 }
 0x584   : > { %v2415_v3 = vpop.f32.mrb[7].mxu1 }
 0x5a5   : > { %v3551_v4 = vpop.f32.mrb[8].mxu1 }
 0x5a6   : > { %v2496_v61 = vpop.f32.mrb[9].mxu1 }
 0x5ac   : > { %v3558_v5 = vpop.f32.mrb[10].mxu1 }
 0x5ad   : > { %v2735_v8 = vcombine.low %v3544_v10, %v3558_v5  ;;  %v2736_v9 = vcombine.high %v3544_v10, %v3558_v5  ;;  %v2577_v25 = vpop.f32.mrb[11].mxu1 }
 0x5ae   : > { %v2667_v7 = vcombine.low %v2415_v3, %v2577_v25  ;;  %v2668_v15 = vcombine.high %v2415_v3, %v2577_v25 }
 0x5af   : > { %v2743_v54 = vrot.slane %v2735_v8, %v4662_v45  ;;  %v2750_v11 = vrot.slane %v2736_v9, %v4662_v45 }
 0x5b0   : > { %v3565_v17 = vpop.f32.mrb[12].mxu1  ;;  %v2675_v21 = vrot.slane %v2667_v7, %v4662_v45  ;;  %v2682_v24 = vrot.slane %v2668_v15, %v4662_v45  ;;  %v2970_v15 = vld [vmem:[%s5212_s5] sm:$0xff] }
 0x5b1   : > { %v2751_v12 = vcombine.low %v3551_v4, %v3565_v17  ;;  %v2752_v6 = vcombine.high %v3551_v4, %v3565_v17  ;;  %v2658_v13 = vpop.f32.mrb[13].mxu1  ;;  %v2971_v17 = vld [vmem:[%s5212_s5 + $0x8] sm:$0xff] }
 0x5b2   : > { %v2683_v51 = vcombine.low %v2496_v61, %v2658_v13  ;;  %v2684_v19 = vcombine.high %v2496_v61, %v2658_v13 }
 0x5b3   : > { %v2759_v14 = vrot.slane %v2751_v12, %v4662_v45  ;;  %v2766_v20 = vrot.slane %v2752_v6, %v4662_v45 }
 0x5b4   : > { %v2691_v22 = vrot.slane %v2683_v51, %v4662_v45  ;;  %v2698_v23 = vrot.slane %v2684_v19, %v4662_v45  ;;  %v2972_v19 = vld [vmem:[%s5212_s5 + $0x10] sm:$0xff] }
 0x5b5   : > { %v2767_v26 = vcombine.low %v2743_v54, %v2759_v14  ;;  %v2768_v16 = vcombine.high %v2743_v54, %v2759_v14  ;;  %v2783_v27 = vcombine.low %v2750_v11, %v2766_v20  ;;  %v2784_v28 = vcombine.high %v2750_v11, %v2766_v20 }
 0x5b6   : > { %v2699_v29 = vcombine.low %v2675_v21, %v2691_v22  ;;  %v2700_v30 = vcombine.high %v2675_v21, %v2691_v22  ;;  %v2715_v31 = vcombine.low %v2682_v24, %v2698_v23  ;;  %v2716_v32 = vcombine.high %v2682_v24, %v2698_v23 }
 0x5b7   : > { %v2775_v33 = vrot.slane %v2767_v26, %v4668_v59  ;;  %v2782_v34 = vrot.slane %v2768_v16, %v4668_v59  ;;  %v2791_v35 = vrot.slane %v2783_v27, %v4668_v59  ;;  %v2798_v36 = vrot.slane %v2784_v28, %v4668_v59 }
 0x5b8   : > { %v2707_v37 = vrot.slane %v2699_v29, %v4668_v59  ;;  %v2714_v57 = vrot.slane %v2700_v30, %v4668_v59  ;;  %v2723_v38 = vrot.slane %v2715_v31, %v4668_v59  ;;  %v2730_v39 = vrot.slane %v2716_v32, %v4668_v59 }
 0x5b9   : > { %v2871_v40 = vcombine.low %v2775_v33, %v2782_v34  ;;  %v3398_v41 = vcombine.high %v2775_v33, %v2782_v34  ;;  %v2887_v18 = vcombine.low %v2791_v35, %v2798_v36  ;;  %v3399_v42 = vcombine.high %v2791_v35, %v2798_v36 }
 0x5ba   : > { %v2803_v43 = vcombine.low %v2707_v37, %v2714_v57  ;;  %v3396_v46 = vcombine.high %v2707_v37, %v2714_v57  ;;  %v2819_v47 = vcombine.low %v2723_v38, %v2730_v39  ;;  %v3397_v48 = vcombine.high %v2723_v38, %v2730_v39 }
 0x5bb   : > { %v2878_v49 = vrot.slane %v2871_v40, %v4662_v45  ;;  %v2886_v50 = vrot.slane %v3398_v41, %v4662_v45  ;;  %v2894_v52 = vrot.slane %v2887_v18, %v4662_v45  ;;  %v2902_v53 = vrot.slane %v3399_v42, %v4662_v45 }
 0x5bc   : > { %v2810_v55 = vrot.slane %v2803_v43, %v4662_v45  ;;  %v2818_v56 = vrot.slane %v3396_v46, %v4662_v45  ;;  %v2826_v44 = vrot.slane %v2819_v47, %v4662_v45  ;;  %v2834_v60 = vrot.slane %v3397_v48, %v4662_v45 }
 0x5bd   : > { %v2904_v62 = vcombine.high %v2878_v49, %v2886_v50  ;;  %v2920_v63 = vcombine.high %v2894_v52, %v2902_v53  ;;  %v2903_v0 = vcombine.low %v2878_v49, %v2886_v50  ;;  %v2919_v1 = vcombine.low %v2894_v52, %v2902_v53 }
 0x5be   : > { %v2836_v58 = vcombine.high %v2810_v55, %v2818_v56  ;;  %v2852_v2 = vcombine.high %v2826_v44, %v2834_v60  ;;  %v2835_v10 = vcombine.low %v2810_v55, %v2818_v56  ;;  %v2851_v3 = vcombine.low %v2826_v44, %v2834_v60 }
 0x5bf   : > { %v2918_v4 = vrot.slane %v2904_v62, %v4668_v59  ;;  %v2934_v61 = vrot.slane %v2920_v63, %v4668_v59  ;;  %v2911_v5 = vrot.slane %v2903_v0, %v4668_v59  ;;  %v2927_v8 = vrot.slane %v2919_v1, %v4668_v59 }
 0x5c0   : > { %v2850_v9 = vrot.slane %v2836_v58, %v4668_v59  ;;  %v2866_v45 = vrot.slane %v2852_v2, %v4668_v59  ;;  %v2843_v25 = vrot.slane %v2835_v10, %v4668_v59  ;;  %v2859_v7 = vrot.slane %v2851_v3, %v4668_v59  ;;  %v2973_v59 = vld [vmem:[%s5212_s5 + $0x18] sm:$0xff] }
 0x5c1   : > { %v2937_v12 = vcombine.low %v2918_v4, %v2934_v61  ;;  %v2936_v6 = vcombine.high %v2911_v5, %v2927_v8  ;;  %v2938_v13 = vcombine.high %v2918_v4, %v2934_v61  ;;  %v2935_v51 = vcombine.low %v2911_v5, %v2927_v8 }
 0x5c2   : > { %v2870_v54 = vcombine.high %v2850_v9, %v2866_v45  ;;  %v2868_v11 = vcombine.high %v2843_v25, %v2859_v7  ;;  %v2869_v14 = vcombine.low %v2850_v9, %v2866_v45  ;;  %v2867_v20 = vcombine.low %v2843_v25, %v2859_v7 }
 0x5c3   : > { %2951 = vrot.lane.b32.xlu1 %v2937_v12, %s4159_s4  ;;  %2943 = vrot.lane.b32.xlu0 %v2936_v6, %s4160_s20  ;;  %v3641_v21 = vpack.c.bf16 %v2971_v17, %v2970_v15  ;;  %v3645_v24 = vpack.c.bf16 %v2973_v59, %v2972_v19 }
 0x5c5   : > { %3642 = vmatprep.subr.bf16.mxu0 %v3641_v21 }
 0x5c6   : > { %3644 = vmatpush3.bf16.msra.mxu0 %v3641_v21 }
 0x5c7   : > { %2957 = vrot.lane.b32.xlu0 %v2870_v54, %s4161_s28  ;;  %2941 = vrot.lane.b32.xlu1 %v2868_v11, %s4160_s20 }
 0x5c8   : > { %3646 = vmatprep.subr.bf16.mxu0 %v3645_v24 }
 0x5ca   : > { %3648 = vmatpush3.bf16.msra.mxu0 %v3645_v24 }
 0x5cb   : > { %2949 = vrot.lane.b32.xlu1 %v2869_v14, %s4159_s4 }
 0x5cf   : > { %2959 = vrot.lane.b32.xlu1 %v2938_v13, %s4161_s28 }
 0x635   : > { %v2952_v22 = vpop.permute.xlu1 %2951  ;;  %v2944_v23 = vpop.permute.xlu0 %2943 }
 0x636   : > { %v2964_v28 = vsel %vm1435_vm1, %v2935_v51, %v2944_v23 }
 0x637   : > { %v2966_v32 = vsel %vm2222_vm5, %v2964_v28, %v2952_v22 }
 0x639   : > { %v2942_v26 = vpop.permute.xlu1 %2941  ;;  %v2958_v29 = vpop.permute.xlu0 %2957 }
 0x63a   : > { %v2963_v16 = vsel %vm1435_vm1, %v2867_v20, %v2942_v26 }
 0x63d   : > { %v2950_v27 = vpop.permute.xlu1 %2949 }
 0x63e   : > { %v2965_v30 = vsel %vm2222_vm5, %v2963_v16, %v2950_v27 }
 0x63f   : > { %v2968_v31 = vsel %vm2967_vm6, %v2965_v30, %v2958_v29 }
 0x640   : > { %3574 = vmatprep.mubr.msk.f32.mxu0 %vm675_vm0, %v2968_v31 }
 0x641   : > { %v2960_v33 = vpop.permute.xlu1 %2959 }
 0x642   : > { %v2969_v34 = vsel %vm2967_vm6, %v2966_v32, %v2960_v33 }
 0x643   : > { %3575 = vmatmul.mubr.msk.f32.vlgmr.msra.gmra.mrb[8].mxu0 %vm675_vm0, %v2969_v34 }
 0x644   : > { %4024 = shalt.err (!%p4021_p12)
}
 0x645   : > { %s4025_s9 = scalar_lea.hbm %s5022_s10, 1024  ;;  %s4029_s27 = scalar_lea.hbm %s5215_s19, 2048 }
 0x646   : > { %p4026_p11 = scmp.ne.s32.totalorder %s5022_s10, %s4025_s9  ;;  %p4030_p0 = scmp.lt.u32.totalorder %s5022_s10, %s5215_s19 }
 0x647   : > { %p4031_p1 = scmp.lt.u32.totalorder %s4029_s27, %s4025_s9  ;;  %p4033_p7 = scmp.lt.u32.totalorder %s4025_s9, %s5022_s10 }
 0x648   : > { %p4027_p6 = pnand %p4026_p11, %p5216_p8 }
 0x649   : > { %p4032_p2 = por %p4031_p1, %p4030_p0 }
 0x64a   : > { %p4028_p4 = pneg %p4027_p6 }
 0x64b   : > { %p4034_p10 = por %p4033_p7, %p4032_p2 }
 0x64d   : > { %p4035_p5 = pnand %p4034_p10, %p4028_p4 }
 0x64f   : > { %4038 = shalt.err (!%p4035_p5)
}
 0x650   : > { %s4163_s28 = smov 128   ;;  %s5217_s11 = sld [smem:[#allocation41_spill]] }
 0x651   : > { %3670 = dma.vmem_to_hbm [thread:$0]  (%p5216_p8), %s5024_s12, 1024, %s5022_s10, %s3070_s24, %s4163_s28, %s4163_s28, %s4160_s20  }
 0x652   : > { %s646_s16 = scalar_lea.vmem [#allocation16], %s4581_s14  ;;  %s3415_s1 = sshll.u32 %s5213_s15, 8 }
 0x653   : > { %s3085_s21 = sshll.u32 %s646_s16, 4  ;;  %s5218_s12 = sld [smem:[#allocation42_spill]]  ;;  %s5058_s21 = int_to_ptr.vmem [resolvable:$true] %s3085_s21 }
 0x654   : > { %s3065_s14 = scalar_lea.sflag [#allocation6], %s4578_s23  ;;  %s4039_s15 = scalar_lea.vmem %s5058_s21, 256 }
 0x655   : > { %p4040_p9 = scmp.ne.s32.totalorder %s5058_s21, %s4039_s15  ;;  %s4164_s24 = smov [#allocation16]  }
 0x656   : > { %v3400_v35 = vld [vmem:[%s5217_s11] ss:$0 sm:$0xff]  ;;  %s4043_s7 = sshll.u32 %s4164_s24, 4  ;;  %s4044_s7 = int_to_ptr.vmem [resolvable:$false] %s4043_s7 }
 0x657   : > { %p4041_p13 = pnand %p4040_p9, %p5216_p8  ;;  %s4045_s25 = scalar_lea.vmem %s4044_s7, 512 }
 0x658   : > { %p4046_p12 = scmp.lt.s32.totalorder %s5058_s21, %s4044_s7  ;;  %p4047_p11 = scmp.lt.s32.totalorder %s4045_s25, %s4039_s15 }
 0x659   : > { %s5063_s10 = scalar_lea.hbm %s5218_s12, %s3415_s1  ;;  %p4042_p3 = pneg %p4041_p13 }
 0x65a   : > { %p4048_p6 = por %p4047_p11, %p4046_p12 }
 0x65c   : > { %p4049_p4 = pnand %p4048_p6, %p4042_p3 }
 0x716   : > { %v3576_v36 = vpop.f32.mrb[8].mxu0 }
 0x717   : > { %v3059_v37 = vadd.f32 %v3576_v36, %v3400_v35  ;;  %v3053_v57 = vpop.f32.mrb[9].mxu0 }
 0x718   : > { %v3054_v38 = vadd.f32 %v3400_v35, %v3053_v57 }
 0x719   : > { %3063 = vst.msk [vmem:[%s646_s16 + $0x8] sm:$0xff] %vm675_vm0, %v3059_v37 }
 0x71a   : > { %3062 = vst.msk [vmem:[%s646_s16] sm:$0xff] %vm675_vm0, %v3054_v38 }
 0x71b   : > { %4052 = shalt.err (!%p4049_p4)
}
 0x71c   : > { %s4053_s27 = scalar_lea.hbm %s5063_s10, 256  ;;  %s4057_s6 = scalar_lea.hbm %s5218_s12, 512 }
 0x71d   : > { %p4054_p0 = scmp.ne.s32.totalorder %s5063_s10, %s4053_s27  ;;  %p4058_p7 = scmp.lt.u32.totalorder %s5063_s10, %s5218_s12 }
 0x71e   : > { %p4059_p10 = scmp.lt.u32.totalorder %s4057_s6, %s4053_s27  ;;  %p4061_p9 = scmp.lt.u32.totalorder %s4053_s27, %s5063_s10 }
 0x71f   : > { %p4055_p1 = pnand %p4054_p0, %p5216_p8 }
 0x720   : > { %p4060_p5 = por %p4059_p10, %p4058_p7 }
 0x721   : > { %p4056_p2 = pneg %p4055_p1 }
 0x722   : > { %p4062_p13 = por %p4061_p9, %p4060_p5 }
 0x724   : > { %p4063_p3 = pnand %p4062_p13, %p4056_p2 }
 0x726   : > { %4066 = shalt.err (!%p4063_p3)
}
 0x727   : > { %3669 = dma.vmem_to_hbm [thread:$0]  (%p5216_p8), %s5058_s21, 256, %s5063_s10, %s3065_s14, %s4163_s28, %s4163_s28, %s4160_s20  }
 0x728 PF: > { %s5219_s16 = sld [smem:[#allocation26_spill]]  ;;  %s5220_s1 = sld [smem:[#allocation31_spill]] }
 0x729   : > { %p5222_p11 = scmp.ge.s32.totalorder %s4141_s30, 2 }
 0x72e   : > { %s3118_s13 = sand.u32 1, %s5219_s16   ;;  %p5221_p12 = scmp.ne.s32.totalorder %s5220_s1, 0 }
 0x72f   : > { %s3119_s9 = scalar_lea.sflag [#allocation6], %s3118_s13 }
 0x730   : > { %p3697_p6 = pnand %p5222_p11, %p5221_p12 }
 0x732   : > { %4112 = dma.done.wait (!%p3697_p6), %s3119_s9, 256  }
 0x733   : > { %4114 = vsyncadd (!%p3697_p6), %s3119_s9, 4294967040  ;;  %s3128_s17 = scalar_lea.sflag [#allocation18], %s3118_s13 }
 0x734   : > { %4116 = dma.done.wait (!%p3697_p6), %s3128_s17, 1024  }
 0x735   : > { %4118 = vsyncadd (!%p3697_p6), %s3128_s17, 4294966272  ;;  %s40_s30 = sadd.s32 1, %s4141_s30   ;;  %s5223_s23 = sld [smem:[#allocation27_spill]] }
 0x736   : > { %p37_p4 = scmp.ge.s32.totalorder %s40_s30, 4   ;;  %s5224_s27 = sld [smem:[#allocation33_spill]] }
 0x737   : > { %s5225_s20 = sld [smem:[#allocation32_spill]]  ;;  %s5226_s25 = smov %s4125_s26 }
 0x738   : > { %s5228_s28 = smov %s4137_s29  ;;  %39 = sbr.rel (!%p37_p4) target bundleno = 24 (0x18), region = 183 }
 0x73b   : > { %s5227_s26 = smov %s5223_s23 }
 0x73d   : > { %s5229_s29 = smov %s5225_s20 }
 0x73f   :  { %3133 = vsyncpa [#allocation5], 1 }
 0x740   :  { %3135 = vsyncpa [#allocation5 + $0x1], 1 }
 0x741   :  { %3136 = vsyncpa [#allocation8], 1 }
 0x742   :  { %3138 = vsyncpa [#allocation8 + $0x1], 1 }
 0x743   :  { %3139 = vsyncpa [#allocation11], 1 }
 0x744   :  { %3141 = vsyncpa [#allocation11 + $0x1], 1 }
 0x745   :  { %3142 = vsyncpa [#allocation14], 1 }
 0x746   :  { %3143 = vsyncpa [#allocation6], 1 }
 0x747   :  { %3145 = vsyncpa [#allocation6 + $0x1], 1 }
 0x748   :  { %3146 = vsyncpa [#allocation18], 1 }
 0x749   :  { %3148 = vsyncpa [#allocation18 + $0x1], 1 }

</bundles_post_ra>
